<compile_context>
chip_gen: v6e
topology: v6e:2x2x1
jax: 0.10.0
libtpu: 0.0.40
codegen_flags: <defaults>
</compile_context>

<pallas_src>
import jax
import jax.numpy as jnp
from jax.experimental import pallas as pl
from jax.experimental.pallas import tpu as pltpu


# ----------------------------------------------------------------------------
# Pallas kernel: 2-layer bidirectional GRU recurrence + dot-product attention.
# Time loop fully unrolled (S is small) so every slice/index is static.
# ----------------------------------------------------------------------------
def _make_kernel(B, S, E, H, out_w):
    G = 3 * H

    def kernel(x_ref,
               wxf0, wxb0, bf0, bb0, bhn0, wr0, wz0, wn0,
               wxf1, wxb1, bf1, bb1, bhn1, wr1, wz1, wn1,
               out_ref):
        f32 = jnp.float32
        x2d = x_ref[...].reshape(S * B, E)               # (S*B, E), time-major rows

        # Direction mask for the stacked hidden state:
        # fwd rows keep lanes [0:H], bwd rows keep lanes [H:2H].
        row = jax.lax.broadcasted_iota(jnp.int32, (2 * B, 2 * H), 0)
        col = jax.lax.broadcasted_iota(jnp.int32, (2 * B, 2 * H), 1)
        dirmask = ((row < B) == (col < H)).astype(f32)

        def run_layer(inp2d, wxf_ref, wxb_ref, bf_ref, bb_ref, bhn_ref,
                      wr_ref, wz_ref, wn_ref):
            # Hoisted input->hidden projection for ALL timesteps, both directions
            # (biases for r/z gates already folded into bf/bb in the wrapper).
            gif = (jnp.dot(inp2d, wxf_ref[...], preferred_element_type=f32)
                   + bf_ref[...]).reshape(S, B, G)
            gib = (jnp.dot(inp2d, wxb_ref[...], preferred_element_type=f32)
                   + bb_ref[...]).reshape(S, B, G)
            gif_r, gif_z, gif_n = gif[:, :, 0:H], gif[:, :, H:2 * H], gif[:, :, 2 * H:G]
            gib_r, gib_z, gib_n = gib[:, :, 0:H], gib[:, :, H:2 * H], gib[:, :, 2 * H:G]

            wr = wr_ref[...]                              # (2H, H) = [Whh_f_r; Whh_b_r]
            wz = wz_ref[...]
            wn = wn_ref[...]
            bhn = bhn_ref[...]                            # (2B, H) fused b_hn per direction

            h = jnp.zeros((2 * B, H), f32)                # rows [fwd batch ; bwd batch]
            hpad = jnp.zeros((2 * B, 2 * H), f32)         # [h_f, 0 ; 0, h_b]
            outs = []
            # TODO(synk): switch to lax.fori_loop over a VMEM slab if S grows beyond ~32.
            for t in range(S):
                tb = S - 1 - t                            # bwd direction time index
                gi_r = jnp.concatenate([gif_r[t], gib_r[tb]], axis=0)   # (2B, H)
                gi_z = jnp.concatenate([gif_z[t], gib_z[tb]], axis=0)
                gi_n = jnp.concatenate([gif_n[t], gib_n[tb]], axis=0)

                # One block-stacked recurrent matmul per gate serves both directions.
                ghr = jnp.dot(hpad, wr, preferred_element_type=f32)
                ghz = jnp.dot(hpad, wz, preferred_element_type=f32)
                ghn = jnp.dot(hpad, wn, preferred_element_type=f32)

                r = jax.nn.sigmoid(gi_r + ghr)
                z = jax.nn.sigmoid(gi_z + ghz)
                n = jnp.tanh(gi_n + r * (ghn + bhn))
                h = n + z * (h - n)                       # == (1-z)*n + z*h
                hpad = jnp.concatenate([h, h], axis=-1) * dirmask
                outs.append(h)
            return outs

        # ---- layer 0 (input size E) -------------------------------------------------
        outs0 = run_layer(x2d, wxf0, wxb0, bf0, bb0, bhn0, wr0, wz0, wn0)
        # assemble time-major slab (S, B, 2H) -> (S*B, 2H) for the layer-1 hoisted matmul
        of0 = jnp.stack([outs0[t][:B] for t in range(S)], axis=0)            # (S,B,H)
        ob0 = jnp.stack([outs0[S - 1 - t][B:] for t in range(S)], axis=0)    # (S,B,H)
        inp1 = jnp.concatenate([of0, ob0], axis=-1).reshape(S * B, 2 * H)

        # TODO(synk): inter-layer GRU dropout (p=0.7) is train-only; identity in eval.

        # ---- layer 1 (input size 2H) ------------------------------------------------
        outs1 = run_layer(inp1, wxf1, wxb1, bf1, bb1, bhn1, wr1, wz1, wn1)
        # batch-major slab (B, S, 2H) for the attention contractions
        of1 = jnp.stack([outs1[t][:B] for t in range(S)], axis=1)            # (B,S,H)
        ob1 = jnp.stack([outs1[S - 1 - t][B:] for t in range(S)], axis=1)    # (B,S,H)
        o1 = jnp.concatenate([of1, ob1], axis=-1)                            # (B,S,2H)
        final = jnp.concatenate([outs1[S - 1][:B], outs1[0][B:]], axis=-1)   # (B,2H)

        # ---- attention: two batched MXU contractions + softmax ----------------------
        scores = jnp.einsum('bqd,bkd->bqk', final[:, None, :], o1,
                            preferred_element_type=f32).reshape(B, S)
        m = jnp.max(scores, axis=-1, keepdims=True)
        e = jnp.exp(scores - m)
        soft = e * pl.reciprocal(jnp.sum(e, axis=-1, keepdims=True), approx=True)
        attn = jnp.einsum('bqk,bkd->bqd', soft[:, None, :], o1,
                          preferred_element_type=f32).reshape(B, 2 * H)

        # TODO(synk): nn.Dropout(0.5) after attention is train-only; identity in eval.
        if out_w > 2 * H:
            attn = jnp.concatenate(
                [attn, jnp.zeros((B, out_w - 2 * H), f32)], axis=-1)
        out_ref[...] = attn

    return kernel


# ----------------------------------------------------------------------------
# Wrapper: embedding gather + weight re-layout in plain JAX, one pallas_call.
# ----------------------------------------------------------------------------
def lstm_with_attention_forward(tokens, emb_table, gru_params):
    B, S = tokens.shape
    _, E = emb_table.shape
    H = gru_params[0][1].shape[0]          # W_hh^T : (H, 3H)

    emb = jnp.take(emb_table, tokens, axis=0).astype(jnp.float32)   # (B, S, E)
    x = jnp.transpose(emb, (1, 0, 2))                               # (S, B, E) time-major

    args = [x]
    for l in range(2):
        wihf, whhf, bihf, bhhf = gru_params[2 * l]       # forward direction
        wihb, whhb, bihb, bhhb = gru_params[2 * l + 1]   # backward direction
        zero_n = jnp.zeros((1, H), jnp.float32)
        # gi-side biases with b_hh folded for r,z gates (b_hn must stay inside r*(.))
        bf = bihf + jnp.concatenate([bhhf[:, :2 * H], zero_n], axis=1)   # (1, 3H)
        bb = bihb + jnp.concatenate([bhhb[:, :2 * H], zero_n], axis=1)   # (1, 3H)
        bhn = jnp.concatenate([jnp.tile(bhhf[:, 2 * H:], (B, 1)),
                               jnp.tile(bhhb[:, 2 * H:], (B, 1))], axis=0)  # (2B, H)
        # block-stacked recurrent weights, split per gate
        wr = jnp.concatenate([whhf[:, 0:H], whhb[:, 0:H]], axis=0)          # (2H, H)
        wz = jnp.concatenate([whhf[:, H:2 * H], whhb[:, H:2 * H]], axis=0)  # (2H, H)
        wn = jnp.concatenate([whhf[:, 2 * H:], whhb[:, 2 * H:]], axis=0)    # (2H, H)
        args += [wihf, wihb, bf, bb, bhn, wr, wz, wn]

    out_w = ((2 * H + 127) // 128) * 128    # lane-dense (128-multiple) output width
    kernel = _make_kernel(B, S, E, H, out_w)
    out = pl.pallas_call(
        kernel,
        out_shape=jax.ShapeDtypeStruct((B, out_w), jnp.float32),
        in_specs=[pl.BlockSpec(memory_space=pltpu.MemorySpace.VMEM)] * len(args),
        out_specs=pl.BlockSpec(memory_space=pltpu.MemorySpace.VMEM),
    )(*args)
    return out[:, :2 * H]


# ----------------------------------------------------------------------------
# Deterministic parameter init (PyTorch-style uniform(-1/sqrt(H), 1/sqrt(H))).
# Layout: W_ih^T (in_dim, 3H), W_hh^T (H, 3H), biases (1, 3H); gate order [r,z,n].
# ----------------------------------------------------------------------------
def init_gru_params(key, E, H):
    params = []
    bound = 1.0 / (H ** 0.5)
    keys = jax.random.split(key, 16)
    i = 0
    for _, in_dim in [(0, E), (1, 2 * H)]:          # layer 0 input E, layer 1 input 2H
        for _ in range(2):                          # fwd, bwd
            wih = jax.random.uniform(keys[i], (in_dim, 3 * H), jnp.float32, -bound, bound); i += 1
            whh = jax.random.uniform(keys[i], (H, 3 * H), jnp.float32, -bound, bound); i += 1
            bih = jax.random.uniform(keys[i], (1, 3 * H), jnp.float32, -bound, bound); i += 1
            bhh = jax.random.uniform(keys[i], (1, 3 * H), jnp.float32, -bound, bound); i += 1
            params.append((wih, whh, bih, bhh))
    return params


# ----------------------------------------------------------------------------
# Pure-JAX reference for validation.
# ----------------------------------------------------------------------------
def reference_forward(tokens, emb_table, gru_params):
    emb = jnp.take(emb_table, tokens, axis=0).astype(jnp.float32)
    B, S, _ = emb.shape
    H = gru_params[0][1].shape[0]

    def gru_dir(x, p, reverse):
        wih, whh, bih, bhh = p
        h = jnp.zeros((B, H), jnp.float32)
        hs = {}
        ts = range(S - 1, -1, -1) if reverse else range(S)
        for t in ts:
            gi = x[:, t, :] @ wih + bih
            gh = h @ whh + bhh
            r = jax.nn.sigmoid(gi[:, :H] + gh[:, :H])
            z = jax.nn.sigmoid(gi[:, H:2 * H] + gh[:, H:2 * H])
            n = jnp.tanh(gi[:, 2 * H:] + r * gh[:, 2 * H:])
            h = (1.0 - z) * n + z * h
            hs[t] = h
        return jnp.stack([hs[t] for t in range(S)], axis=1)

    f0 = gru_dir(emb, gru_params[0], False)
    b0 = gru_dir(emb, gru_params[1], True)
    x1 = jnp.concatenate([f0, b0], axis=-1)
    f1 = gru_dir(x1, gru_params[2], False)
    b1 = gru_dir(x1, gru_params[3], True)
    O = jnp.concatenate([f1, b1], axis=-1)          # (B, S, 2H)
    final = O[:, -1, :]
    scores = jnp.einsum('bsd,bd->bs', O, final)
    soft = jax.nn.softmax(scores, axis=1)
    return jnp.einsum('bsd,bs->bd', O, soft)


if __name__ == "__main__":
    B, S, E, H, V = 2, 8, 32, 32, 50

    key = jax.random.PRNGKey(0)
    k_emb, k_tok, k_gru = jax.random.split(key, 3)

    emb_table = jax.random.normal(k_emb, (V, E), jnp.float32) * 0.1
    emb_table = emb_table.at[0].set(0.0)            # padding_idx=0 (zero row)
    tokens = jax.random.randint(k_tok, (B, S), 0, V).astype(jnp.int32)
    gru_params = init_gru_params(k_gru, E, H)

    out = lstm_with_attention_forward(tokens, emb_table, gru_params)
    out = jax.block_until_ready(out)

    ref = reference_forward(tokens, emb_table, gru_params)
    assert out.shape == (B, 2 * H)
    assert jnp.allclose(out, ref, atol=2e-3, rtol=2e-3)

    print("KERNEL_OK")
</pallas_src>

<mosaic_0001>
module attributes {stable_mosaic.version = 11 : i64} {
  func.func @kernel(%arg0: memref<8x2x32xf32, #tpu.memory_space<vmem>>, %arg1: memref<32x96xf32, #tpu.memory_space<vmem>>, %arg2: memref<32x96xf32, #tpu.memory_space<vmem>>, %arg3: memref<1x96xf32, #tpu.memory_space<vmem>>, %arg4: memref<1x96xf32, #tpu.memory_space<vmem>>, %arg5: memref<4x32xf32, #tpu.memory_space<vmem>>, %arg6: memref<64x32xf32, #tpu.memory_space<vmem>>, %arg7: memref<64x32xf32, #tpu.memory_space<vmem>>, %arg8: memref<64x32xf32, #tpu.memory_space<vmem>>, %arg9: memref<64x96xf32, #tpu.memory_space<vmem>>, %arg10: memref<64x96xf32, #tpu.memory_space<vmem>>, %arg11: memref<1x96xf32, #tpu.memory_space<vmem>>, %arg12: memref<1x96xf32, #tpu.memory_space<vmem>>, %arg13: memref<4x32xf32, #tpu.memory_space<vmem>>, %arg14: memref<64x32xf32, #tpu.memory_space<vmem>>, %arg15: memref<64x32xf32, #tpu.memory_space<vmem>>, %arg16: memref<64x32xf32, #tpu.memory_space<vmem>>, %arg17: memref<2x128xf32, #tpu.memory_space<vmem>>) attributes {dimension_semantics = [], scalar_prefetch = 0 : i64, scratch_operands = 0 : i64, tpu.core_type = #tpu.core_type<tc>} {
    %c0 = arith.constant 0 : index
    %c0_0 = arith.constant 0 : index
    %c0_1 = arith.constant 0 : index
    %0 = vector.load %arg0[%c0, %c0_0, %c0_1] : memref<8x2x32xf32, #tpu.memory_space<vmem>>, vector<8x2x32xf32>
    %1 = vector.shape_cast %0 : vector<8x2x32xf32> to vector<16x32xf32>
    %2 = tpu.iota {dimensions = array<i32: 0>} : vector<4x64xi32>
    %3 = tpu.iota {dimensions = array<i32: 1>} : vector<4x64xi32>
    %c2_i32 = arith.constant 2 : i32
    %4 = vector.broadcast %c2_i32 : i32 to vector<4x64xi32>
    %5 = arith.cmpi slt, %2, %4 : vector<4x64xi32>
    %c32_i32 = arith.constant 32 : i32
    %6 = vector.broadcast %c32_i32 : i32 to vector<4x64xi32>
    %7 = arith.cmpi slt, %3, %6 : vector<4x64xi32>
    %8 = arith.xori %5, %7 : vector<4x64xi1>
    %cst = arith.constant dense<true> : vector<4x64xi1>
    %9 = arith.xori %8, %cst : vector<4x64xi1>
    %10 = arith.extui %9 : vector<4x64xi1> to vector<4x64xi32>
    %11 = arith.sitofp %10 : vector<4x64xi32> to vector<4x64xf32>
    %c0_2 = arith.constant 0 : index
    %c0_3 = arith.constant 0 : index
    %12 = vector.load %arg1[%c0_2, %c0_3] : memref<32x96xf32, #tpu.memory_space<vmem>>, vector<32x96xf32>
    %cst_4 = arith.constant dense<0.000000e+00> : vector<16x96xf32>
    %13 = tpu.matmul %1, %12, %cst_4 {dimension_numbers = #tpu.dot_dimension_numbers<[1], [0], [0], [1], [0, 0, 1, 1], [], []>} : vector<16x32xf32>, vector<32x96xf32>, vector<16x96xf32> -> vector<16x96xf32>
    %c0_5 = arith.constant 0 : index
    %c0_6 = arith.constant 0 : index
    %14 = vector.load %arg3[%c0_5, %c0_6] : memref<1x96xf32, #tpu.memory_space<vmem>>, vector<1x96xf32>
    %15 = vector.broadcast %14 : vector<1x96xf32> to vector<16x96xf32>
    %16 = arith.addf %13, %15 : vector<16x96xf32>
    %17 = vector.shape_cast %16 : vector<16x96xf32> to vector<8x2x96xf32>
    %c0_7 = arith.constant 0 : index
    %c0_8 = arith.constant 0 : index
    %18 = vector.load %arg2[%c0_7, %c0_8] : memref<32x96xf32, #tpu.memory_space<vmem>>, vector<32x96xf32>
    %cst_9 = arith.constant dense<0.000000e+00> : vector<16x96xf32>
    %19 = tpu.matmul %1, %18, %cst_9 {dimension_numbers = #tpu.dot_dimension_numbers<[1], [0], [0], [1], [0, 0, 1, 1], [], []>} : vector<16x32xf32>, vector<32x96xf32>, vector<16x96xf32> -> vector<16x96xf32>
    %c0_10 = arith.constant 0 : index
    %c0_11 = arith.constant 0 : index
    %20 = vector.load %arg4[%c0_10, %c0_11] : memref<1x96xf32, #tpu.memory_space<vmem>>, vector<1x96xf32>
    %21 = vector.broadcast %20 : vector<1x96xf32> to vector<16x96xf32>
    %22 = arith.addf %19, %21 : vector<16x96xf32>
    %23 = vector.shape_cast %22 : vector<16x96xf32> to vector<8x2x96xf32>
    %24 = vector.extract_strided_slice %17 {offsets = [0, 0, 0], sizes = [8, 2, 32], strides = [1, 1, 1]} : vector<8x2x96xf32> to vector<8x2x32xf32>
    %25 = vector.extract_strided_slice %17 {offsets = [0, 0, 32], sizes = [8, 2, 32], strides = [1, 1, 1]} : vector<8x2x96xf32> to vector<8x2x32xf32>
    %26 = vector.extract_strided_slice %17 {offsets = [0, 0, 64], sizes = [8, 2, 32], strides = [1, 1, 1]} : vector<8x2x96xf32> to vector<8x2x32xf32>
    %27 = vector.extract_strided_slice %23 {offsets = [0, 0, 0], sizes = [8, 2, 32], strides = [1, 1, 1]} : vector<8x2x96xf32> to vector<8x2x32xf32>
    %28 = vector.extract_strided_slice %23 {offsets = [0, 0, 32], sizes = [8, 2, 32], strides = [1, 1, 1]} : vector<8x2x96xf32> to vector<8x2x32xf32>
    %29 = vector.extract_strided_slice %23 {offsets = [0, 0, 64], sizes = [8, 2, 32], strides = [1, 1, 1]} : vector<8x2x96xf32> to vector<8x2x32xf32>
    %c0_12 = arith.constant 0 : index
    %c0_13 = arith.constant 0 : index
    %30 = vector.load %arg6[%c0_12, %c0_13] : memref<64x32xf32, #tpu.memory_space<vmem>>, vector<64x32xf32>
    %c0_14 = arith.constant 0 : index
    %c0_15 = arith.constant 0 : index
    %31 = vector.load %arg7[%c0_14, %c0_15] : memref<64x32xf32, #tpu.memory_space<vmem>>, vector<64x32xf32>
    %c0_16 = arith.constant 0 : index
    %c0_17 = arith.constant 0 : index
    %32 = vector.load %arg8[%c0_16, %c0_17] : memref<64x32xf32, #tpu.memory_space<vmem>>, vector<64x32xf32>
    %c0_18 = arith.constant 0 : index
    %c0_19 = arith.constant 0 : index
    %33 = vector.load %arg5[%c0_18, %c0_19] : memref<4x32xf32, #tpu.memory_space<vmem>>, vector<4x32xf32>
    %cst_20 = arith.constant 0.000000e+00 : f32
    %34 = vector.broadcast %cst_20 : f32 to vector<4x32xf32>
    %cst_21 = arith.constant 0.000000e+00 : f32
    %35 = vector.broadcast %cst_21 : f32 to vector<4x64xf32>
    %36 = vector.extract_strided_slice %24 {offsets = [0, 0, 0], sizes = [1, 2, 32], strides = [1, 1, 1]} : vector<8x2x32xf32> to vector<1x2x32xf32>
    %37 = vector.shape_cast %36 : vector<1x2x32xf32> to vector<2x32xf32>
    %38 = vector.extract_strided_slice %27 {offsets = [7, 0, 0], sizes = [1, 2, 32], strides = [1, 1, 1]} : vector<8x2x32xf32> to vector<1x2x32xf32>
    %39 = vector.shape_cast %38 : vector<1x2x32xf32> to vector<2x32xf32>
    %40 = tpu.concatenate %37, %39 in 0 : vector<2x32xf32>, vector<2x32xf32> -> vector<4x32xf32>
    %41 = vector.extract_strided_slice %25 {offsets = [0, 0, 0], sizes = [1, 2, 32], strides = [1, 1, 1]} : vector<8x2x32xf32> to vector<1x2x32xf32>
    %42 = vector.shape_cast %41 : vector<1x2x32xf32> to vector<2x32xf32>
    %43 = vector.extract_strided_slice %28 {offsets = [7, 0, 0], sizes = [1, 2, 32], strides = [1, 1, 1]} : vector<8x2x32xf32> to vector<1x2x32xf32>
    %44 = vector.shape_cast %43 : vector<1x2x32xf32> to vector<2x32xf32>
    %45 = tpu.concatenate %42, %44 in 0 : vector<2x32xf32>, vector<2x32xf32> -> vector<4x32xf32>
    %46 = vector.extract_strided_slice %26 {offsets = [0, 0, 0], sizes = [1, 2, 32], strides = [1, 1, 1]} : vector<8x2x32xf32> to vector<1x2x32xf32>
    %47 = vector.shape_cast %46 : vector<1x2x32xf32> to vector<2x32xf32>
    %48 = vector.extract_strided_slice %29 {offsets = [7, 0, 0], sizes = [1, 2, 32], strides = [1, 1, 1]} : vector<8x2x32xf32> to vector<1x2x32xf32>
    %49 = vector.shape_cast %48 : vector<1x2x32xf32> to vector<2x32xf32>
    %50 = tpu.concatenate %47, %49 in 0 : vector<2x32xf32>, vector<2x32xf32> -> vector<4x32xf32>
    %cst_22 = arith.constant dense<0.000000e+00> : vector<4x32xf32>
    %51 = tpu.matmul %35, %30, %cst_22 {dimension_numbers = #tpu.dot_dimension_numbers<[1], [0], [0], [1], [0, 0, 1, 1], [], []>} : vector<4x64xf32>, vector<64x32xf32>, vector<4x32xf32> -> vector<4x32xf32>
    %cst_23 = arith.constant dense<0.000000e+00> : vector<4x32xf32>
    %52 = tpu.matmul %35, %31, %cst_23 {dimension_numbers = #tpu.dot_dimension_numbers<[1], [0], [0], [1], [0, 0, 1, 1], [], []>} : vector<4x64xf32>, vector<64x32xf32>, vector<4x32xf32> -> vector<4x32xf32>
    %cst_24 = arith.constant dense<0.000000e+00> : vector<4x32xf32>
    %53 = tpu.matmul %35, %32, %cst_24 {dimension_numbers = #tpu.dot_dimension_numbers<[1], [0], [0], [1], [0, 0, 1, 1], [], []>} : vector<4x64xf32>, vector<64x32xf32>, vector<4x32xf32> -> vector<4x32xf32>
    %54 = arith.addf %40, %51 : vector<4x32xf32>
    %55 = arith.negf %54 : vector<4x32xf32>
    %56 = math.exp %55 : vector<4x32xf32>
    %cst_25 = arith.constant 1.000000e+00 : f32
    %57 = vector.broadcast %cst_25 : f32 to vector<4x32xf32>
    %58 = arith.addf %57, %56 : vector<4x32xf32>
    %59 = arith.divf %57, %58 : vector<4x32xf32>
    %60 = arith.addf %45, %52 : vector<4x32xf32>
    %61 = arith.negf %60 : vector<4x32xf32>
    %62 = math.exp %61 : vector<4x32xf32>
    %cst_26 = arith.constant 1.000000e+00 : f32
    %63 = vector.broadcast %cst_26 : f32 to vector<4x32xf32>
    %64 = arith.addf %63, %62 : vector<4x32xf32>
    %65 = arith.divf %63, %64 : vector<4x32xf32>
    %66 = arith.addf %53, %33 : vector<4x32xf32>
    %67 = arith.mulf %59, %66 : vector<4x32xf32>
    %68 = arith.addf %50, %67 : vector<4x32xf32>
    %69 = math.tanh %68 : vector<4x32xf32>
    %70 = arith.subf %34, %69 : vector<4x32xf32>
    %71 = arith.mulf %65, %70 : vector<4x32xf32>
    %72 = arith.addf %69, %71 : vector<4x32xf32>
    %73 = tpu.concatenate %72, %72 in 1 : vector<4x32xf32>, vector<4x32xf32> -> vector<4x64xf32>
    %74 = arith.mulf %73, %11 : vector<4x64xf32>
    %75 = vector.extract_strided_slice %24 {offsets = [1, 0, 0], sizes = [1, 2, 32], strides = [1, 1, 1]} : vector<8x2x32xf32> to vector<1x2x32xf32>
    %76 = vector.shape_cast %75 : vector<1x2x32xf32> to vector<2x32xf32>
    %77 = vector.extract_strided_slice %27 {offsets = [6, 0, 0], sizes = [1, 2, 32], strides = [1, 1, 1]} : vector<8x2x32xf32> to vector<1x2x32xf32>
    %78 = vector.shape_cast %77 : vector<1x2x32xf32> to vector<2x32xf32>
    %79 = tpu.concatenate %76, %78 in 0 : vector<2x32xf32>, vector<2x32xf32> -> vector<4x32xf32>
    %80 = vector.extract_strided_slice %25 {offsets = [1, 0, 0], sizes = [1, 2, 32], strides = [1, 1, 1]} : vector<8x2x32xf32> to vector<1x2x32xf32>
    %81 = vector.shape_cast %80 : vector<1x2x32xf32> to vector<2x32xf32>
    %82 = vector.extract_strided_slice %28 {offsets = [6, 0, 0], sizes = [1, 2, 32], strides = [1, 1, 1]} : vector<8x2x32xf32> to vector<1x2x32xf32>
    %83 = vector.shape_cast %82 : vector<1x2x32xf32> to vector<2x32xf32>
    %84 = tpu.concatenate %81, %83 in 0 : vector<2x32xf32>, vector<2x32xf32> -> vector<4x32xf32>
    %85 = vector.extract_strided_slice %26 {offsets = [1, 0, 0], sizes = [1, 2, 32], strides = [1, 1, 1]} : vector<8x2x32xf32> to vector<1x2x32xf32>
    %86 = vector.shape_cast %85 : vector<1x2x32xf32> to vector<2x32xf32>
    %87 = vector.extract_strided_slice %29 {offsets = [6, 0, 0], sizes = [1, 2, 32], strides = [1, 1, 1]} : vector<8x2x32xf32> to vector<1x2x32xf32>
    %88 = vector.shape_cast %87 : vector<1x2x32xf32> to vector<2x32xf32>
    %89 = tpu.concatenate %86, %88 in 0 : vector<2x32xf32>, vector<2x32xf32> -> vector<4x32xf32>
    %cst_27 = arith.constant dense<0.000000e+00> : vector<4x32xf32>
    %90 = tpu.matmul %74, %30, %cst_27 {dimension_numbers = #tpu.dot_dimension_numbers<[1], [0], [0], [1], [0, 0, 1, 1], [], []>} : vector<4x64xf32>, vector<64x32xf32>, vector<4x32xf32> -> vector<4x32xf32>
    %cst_28 = arith.constant dense<0.000000e+00> : vector<4x32xf32>
    %91 = tpu.matmul %74, %31, %cst_28 {dimension_numbers = #tpu.dot_dimension_numbers<[1], [0], [0], [1], [0, 0, 1, 1], [], []>} : vector<4x64xf32>, vector<64x32xf32>, vector<4x32xf32> -> vector<4x32xf32>
    %cst_29 = arith.constant dense<0.000000e+00> : vector<4x32xf32>
    %92 = tpu.matmul %74, %32, %cst_29 {dimension_numbers = #tpu.dot_dimension_numbers<[1], [0], [0], [1], [0, 0, 1, 1], [], []>} : vector<4x64xf32>, vector<64x32xf32>, vector<4x32xf32> -> vector<4x32xf32>
    %93 = arith.addf %79, %90 : vector<4x32xf32>
    %94 = arith.negf %93 : vector<4x32xf32>
    %95 = math.exp %94 : vector<4x32xf32>
    %cst_30 = arith.constant 1.000000e+00 : f32
    %96 = vector.broadcast %cst_30 : f32 to vector<4x32xf32>
    %97 = arith.addf %96, %95 : vector<4x32xf32>
    %98 = arith.divf %96, %97 : vector<4x32xf32>
    %99 = arith.addf %84, %91 : vector<4x32xf32>
    %100 = arith.negf %99 : vector<4x32xf32>
    %101 = math.exp %100 : vector<4x32xf32>
    %cst_31 = arith.constant 1.000000e+00 : f32
    %102 = vector.broadcast %cst_31 : f32 to vector<4x32xf32>
    %103 = arith.addf %102, %101 : vector<4x32xf32>
    %104 = arith.divf %102, %103 : vector<4x32xf32>
    %105 = arith.addf %92, %33 : vector<4x32xf32>
    %106 = arith.mulf %98, %105 : vector<4x32xf32>
    %107 = arith.addf %89, %106 : vector<4x32xf32>
    %108 = math.tanh %107 : vector<4x32xf32>
    %109 = arith.subf %72, %108 : vector<4x32xf32>
    %110 = arith.mulf %104, %109 : vector<4x32xf32>
    %111 = arith.addf %108, %110 : vector<4x32xf32>
    %112 = tpu.concatenate %111, %111 in 1 : vector<4x32xf32>, vector<4x32xf32> -> vector<4x64xf32>
    %113 = arith.mulf %112, %11 : vector<4x64xf32>
    %114 = vector.extract_strided_slice %24 {offsets = [2, 0, 0], sizes = [1, 2, 32], strides = [1, 1, 1]} : vector<8x2x32xf32> to vector<1x2x32xf32>
    %115 = vector.shape_cast %114 : vector<1x2x32xf32> to vector<2x32xf32>
    %116 = vector.extract_strided_slice %27 {offsets = [5, 0, 0], sizes = [1, 2, 32], strides = [1, 1, 1]} : vector<8x2x32xf32> to vector<1x2x32xf32>
    %117 = vector.shape_cast %116 : vector<1x2x32xf32> to vector<2x32xf32>
    %118 = tpu.concatenate %115, %117 in 0 : vector<2x32xf32>, vector<2x32xf32> -> vector<4x32xf32>
    %119 = vector.extract_strided_slice %25 {offsets = [2, 0, 0], sizes = [1, 2, 32], strides = [1, 1, 1]} : vector<8x2x32xf32> to vector<1x2x32xf32>
    %120 = vector.shape_cast %119 : vector<1x2x32xf32> to vector<2x32xf32>
    %121 = vector.extract_strided_slice %28 {offsets = [5, 0, 0], sizes = [1, 2, 32], strides = [1, 1, 1]} : vector<8x2x32xf32> to vector<1x2x32xf32>
    %122 = vector.shape_cast %121 : vector<1x2x32xf32> to vector<2x32xf32>
    %123 = tpu.concatenate %120, %122 in 0 : vector<2x32xf32>, vector<2x32xf32> -> vector<4x32xf32>
    %124 = vector.extract_strided_slice %26 {offsets = [2, 0, 0], sizes = [1, 2, 32], strides = [1, 1, 1]} : vector<8x2x32xf32> to vector<1x2x32xf32>
    %125 = vector.shape_cast %124 : vector<1x2x32xf32> to vector<2x32xf32>
    %126 = vector.extract_strided_slice %29 {offsets = [5, 0, 0], sizes = [1, 2, 32], strides = [1, 1, 1]} : vector<8x2x32xf32> to vector<1x2x32xf32>
    %127 = vector.shape_cast %126 : vector<1x2x32xf32> to vector<2x32xf32>
    %128 = tpu.concatenate %125, %127 in 0 : vector<2x32xf32>, vector<2x32xf32> -> vector<4x32xf32>
    %cst_32 = arith.constant dense<0.000000e+00> : vector<4x32xf32>
    %129 = tpu.matmul %113, %30, %cst_32 {dimension_numbers = #tpu.dot_dimension_numbers<[1], [0], [0], [1], [0, 0, 1, 1], [], []>} : vector<4x64xf32>, vector<64x32xf32>, vector<4x32xf32> -> vector<4x32xf32>
    %cst_33 = arith.constant dense<0.000000e+00> : vector<4x32xf32>
    %130 = tpu.matmul %113, %31, %cst_33 {dimension_numbers = #tpu.dot_dimension_numbers<[1], [0], [0], [1], [0, 0, 1, 1], [], []>} : vector<4x64xf32>, vector<64x32xf32>, vector<4x32xf32> -> vector<4x32xf32>
    %cst_34 = arith.constant dense<0.000000e+00> : vector<4x32xf32>
    %131 = tpu.matmul %113, %32, %cst_34 {dimension_numbers = #tpu.dot_dimension_numbers<[1], [0], [0], [1], [0, 0, 1, 1], [], []>} : vector<4x64xf32>, vector<64x32xf32>, vector<4x32xf32> -> vector<4x32xf32>
    %132 = arith.addf %118, %129 : vector<4x32xf32>
    %133 = arith.negf %132 : vector<4x32xf32>
    %134 = math.exp %133 : vector<4x32xf32>
    %cst_35 = arith.constant 1.000000e+00 : f32
    %135 = vector.broadcast %cst_35 : f32 to vector<4x32xf32>
    %136 = arith.addf %135, %134 : vector<4x32xf32>
    %137 = arith.divf %135, %136 : vector<4x32xf32>
    %138 = arith.addf %123, %130 : vector<4x32xf32>
    %139 = arith.negf %138 : vector<4x32xf32>
    %140 = math.exp %139 : vector<4x32xf32>
    %cst_36 = arith.constant 1.000000e+00 : f32
    %141 = vector.broadcast %cst_36 : f32 to vector<4x32xf32>
    %142 = arith.addf %141, %140 : vector<4x32xf32>
    %143 = arith.divf %141, %142 : vector<4x32xf32>
    %144 = arith.addf %131, %33 : vector<4x32xf32>
    %145 = arith.mulf %137, %144 : vector<4x32xf32>
    %146 = arith.addf %128, %145 : vector<4x32xf32>
    %147 = math.tanh %146 : vector<4x32xf32>
    %148 = arith.subf %111, %147 : vector<4x32xf32>
    %149 = arith.mulf %143, %148 : vector<4x32xf32>
    %150 = arith.addf %147, %149 : vector<4x32xf32>
    %151 = tpu.concatenate %150, %150 in 1 : vector<4x32xf32>, vector<4x32xf32> -> vector<4x64xf32>
    %152 = arith.mulf %151, %11 : vector<4x64xf32>
    %153 = vector.extract_strided_slice %24 {offsets = [3, 0, 0], sizes = [1, 2, 32], strides = [1, 1, 1]} : vector<8x2x32xf32> to vector<1x2x32xf32>
    %154 = vector.shape_cast %153 : vector<1x2x32xf32> to vector<2x32xf32>
    %155 = vector.extract_strided_slice %27 {offsets = [4, 0, 0], sizes = [1, 2, 32], strides = [1, 1, 1]} : vector<8x2x32xf32> to vector<1x2x32xf32>
    %156 = vector.shape_cast %155 : vector<1x2x32xf32> to vector<2x32xf32>
    %157 = tpu.concatenate %154, %156 in 0 : vector<2x32xf32>, vector<2x32xf32> -> vector<4x32xf32>
    %158 = vector.extract_strided_slice %25 {offsets = [3, 0, 0], sizes = [1, 2, 32], strides = [1, 1, 1]} : vector<8x2x32xf32> to vector<1x2x32xf32>
    %159 = vector.shape_cast %158 : vector<1x2x32xf32> to vector<2x32xf32>
    %160 = vector.extract_strided_slice %28 {offsets = [4, 0, 0], sizes = [1, 2, 32], strides = [1, 1, 1]} : vector<8x2x32xf32> to vector<1x2x32xf32>
    %161 = vector.shape_cast %160 : vector<1x2x32xf32> to vector<2x32xf32>
    %162 = tpu.concatenate %159, %161 in 0 : vector<2x32xf32>, vector<2x32xf32> -> vector<4x32xf32>
    %163 = vector.extract_strided_slice %26 {offsets = [3, 0, 0], sizes = [1, 2, 32], strides = [1, 1, 1]} : vector<8x2x32xf32> to vector<1x2x32xf32>
    %164 = vector.shape_cast %163 : vector<1x2x32xf32> to vector<2x32xf32>
    %165 = vector.extract_strided_slice %29 {offsets = [4, 0, 0], sizes = [1, 2, 32], strides = [1, 1, 1]} : vector<8x2x32xf32> to vector<1x2x32xf32>
    %166 = vector.shape_cast %165 : vector<1x2x32xf32> to vector<2x32xf32>
    %167 = tpu.concatenate %164, %166 in 0 : vector<2x32xf32>, vector<2x32xf32> -> vector<4x32xf32>
    %cst_37 = arith.constant dense<0.000000e+00> : vector<4x32xf32>
    %168 = tpu.matmul %152, %30, %cst_37 {dimension_numbers = #tpu.dot_dimension_numbers<[1], [0], [0], [1], [0, 0, 1, 1], [], []>} : vector<4x64xf32>, vector<64x32xf32>, vector<4x32xf32> -> vector<4x32xf32>
    %cst_38 = arith.constant dense<0.000000e+00> : vector<4x32xf32>
    %169 = tpu.matmul %152, %31, %cst_38 {dimension_numbers = #tpu.dot_dimension_numbers<[1], [0], [0], [1], [0, 0, 1, 1], [], []>} : vector<4x64xf32>, vector<64x32xf32>, vector<4x32xf32> -> vector<4x32xf32>
    %cst_39 = arith.constant dense<0.000000e+00> : vector<4x32xf32>
    %170 = tpu.matmul %152, %32, %cst_39 {dimension_numbers = #tpu.dot_dimension_numbers<[1], [0], [0], [1], [0, 0, 1, 1], [], []>} : vector<4x64xf32>, vector<64x32xf32>, vector<4x32xf32> -> vector<4x32xf32>
    %171 = arith.addf %157, %168 : vector<4x32xf32>
    %172 = arith.negf %171 : vector<4x32xf32>
    %173 = math.exp %172 : vector<4x32xf32>
    %cst_40 = arith.constant 1.000000e+00 : f32
    %174 = vector.broadcast %cst_40 : f32 to vector<4x32xf32>
    %175 = arith.addf %174, %173 : vector<4x32xf32>
    %176 = arith.divf %174, %175 : vector<4x32xf32>
    %177 = arith.addf %162, %169 : vector<4x32xf32>
    %178 = arith.negf %177 : vector<4x32xf32>
    %179 = math.exp %178 : vector<4x32xf32>
    %cst_41 = arith.constant 1.000000e+00 : f32
    %180 = vector.broadcast %cst_41 : f32 to vector<4x32xf32>
    %181 = arith.addf %180, %179 : vector<4x32xf32>
    %182 = arith.divf %180, %181 : vector<4x32xf32>
    %183 = arith.addf %170, %33 : vector<4x32xf32>
    %184 = arith.mulf %176, %183 : vector<4x32xf32>
    %185 = arith.addf %167, %184 : vector<4x32xf32>
    %186 = math.tanh %185 : vector<4x32xf32>
    %187 = arith.subf %150, %186 : vector<4x32xf32>
    %188 = arith.mulf %182, %187 : vector<4x32xf32>
    %189 = arith.addf %186, %188 : vector<4x32xf32>
    %190 = tpu.concatenate %189, %189 in 1 : vector<4x32xf32>, vector<4x32xf32> -> vector<4x64xf32>
    %191 = arith.mulf %190, %11 : vector<4x64xf32>
    %192 = vector.extract_strided_slice %24 {offsets = [4, 0, 0], sizes = [1, 2, 32], strides = [1, 1, 1]} : vector<8x2x32xf32> to vector<1x2x32xf32>
    %193 = vector.shape_cast %192 : vector<1x2x32xf32> to vector<2x32xf32>
    %194 = vector.extract_strided_slice %27 {offsets = [3, 0, 0], sizes = [1, 2, 32], strides = [1, 1, 1]} : vector<8x2x32xf32> to vector<1x2x32xf32>
    %195 = vector.shape_cast %194 : vector<1x2x32xf32> to vector<2x32xf32>
    %196 = tpu.concatenate %193, %195 in 0 : vector<2x32xf32>, vector<2x32xf32> -> vector<4x32xf32>
    %197 = vector.extract_strided_slice %25 {offsets = [4, 0, 0], sizes = [1, 2, 32], strides = [1, 1, 1]} : vector<8x2x32xf32> to vector<1x2x32xf32>
    %198 = vector.shape_cast %197 : vector<1x2x32xf32> to vector<2x32xf32>
    %199 = vector.extract_strided_slice %28 {offsets = [3, 0, 0], sizes = [1, 2, 32], strides = [1, 1, 1]} : vector<8x2x32xf32> to vector<1x2x32xf32>
    %200 = vector.shape_cast %199 : vector<1x2x32xf32> to vector<2x32xf32>
    %201 = tpu.concatenate %198, %200 in 0 : vector<2x32xf32>, vector<2x32xf32> -> vector<4x32xf32>
    %202 = vector.extract_strided_slice %26 {offsets = [4, 0, 0], sizes = [1, 2, 32], strides = [1, 1, 1]} : vector<8x2x32xf32> to vector<1x2x32xf32>
    %203 = vector.shape_cast %202 : vector<1x2x32xf32> to vector<2x32xf32>
    %204 = vector.extract_strided_slice %29 {offsets = [3, 0, 0], sizes = [1, 2, 32], strides = [1, 1, 1]} : vector<8x2x32xf32> to vector<1x2x32xf32>
    %205 = vector.shape_cast %204 : vector<1x2x32xf32> to vector<2x32xf32>
    %206 = tpu.concatenate %203, %205 in 0 : vector<2x32xf32>, vector<2x32xf32> -> vector<4x32xf32>
    %cst_42 = arith.constant dense<0.000000e+00> : vector<4x32xf32>
    %207 = tpu.matmul %191, %30, %cst_42 {dimension_numbers = #tpu.dot_dimension_numbers<[1], [0], [0], [1], [0, 0, 1, 1], [], []>} : vector<4x64xf32>, vector<64x32xf32>, vector<4x32xf32> -> vector<4x32xf32>
    %cst_43 = arith.constant dense<0.000000e+00> : vector<4x32xf32>
    %208 = tpu.matmul %191, %31, %cst_43 {dimension_numbers = #tpu.dot_dimension_numbers<[1], [0], [0], [1], [0, 0, 1, 1], [], []>} : vector<4x64xf32>, vector<64x32xf32>, vector<4x32xf32> -> vector<4x32xf32>
    %cst_44 = arith.constant dense<0.000000e+00> : vector<4x32xf32>
    %209 = tpu.matmul %191, %32, %cst_44 {dimension_numbers = #tpu.dot_dimension_numbers<[1], [0], [0], [1], [0, 0, 1, 1], [], []>} : vector<4x64xf32>, vector<64x32xf32>, vector<4x32xf32> -> vector<4x32xf32>
    %210 = arith.addf %196, %207 : vector<4x32xf32>
    %211 = arith.negf %210 : vector<4x32xf32>
    %212 = math.exp %211 : vector<4x32xf32>
    %cst_45 = arith.constant 1.000000e+00 : f32
    %213 = vector.broadcast %cst_45 : f32 to vector<4x32xf32>
    %214 = arith.addf %213, %212 : vector<4x32xf32>
    %215 = arith.divf %213, %214 : vector<4x32xf32>
    %216 = arith.addf %201, %208 : vector<4x32xf32>
    %217 = arith.negf %216 : vector<4x32xf32>
    %218 = math.exp %217 : vector<4x32xf32>
    %cst_46 = arith.constant 1.000000e+00 : f32
    %219 = vector.broadcast %cst_46 : f32 to vector<4x32xf32>
    %220 = arith.addf %219, %218 : vector<4x32xf32>
    %221 = arith.divf %219, %220 : vector<4x32xf32>
    %222 = arith.addf %209, %33 : vector<4x32xf32>
    %223 = arith.mulf %215, %222 : vector<4x32xf32>
    %224 = arith.addf %206, %223 : vector<4x32xf32>
    %225 = math.tanh %224 : vector<4x32xf32>
    %226 = arith.subf %189, %225 : vector<4x32xf32>
    %227 = arith.mulf %221, %226 : vector<4x32xf32>
    %228 = arith.addf %225, %227 : vector<4x32xf32>
    %229 = tpu.concatenate %228, %228 in 1 : vector<4x32xf32>, vector<4x32xf32> -> vector<4x64xf32>
    %230 = arith.mulf %229, %11 : vector<4x64xf32>
    %231 = vector.extract_strided_slice %24 {offsets = [5, 0, 0], sizes = [1, 2, 32], strides = [1, 1, 1]} : vector<8x2x32xf32> to vector<1x2x32xf32>
    %232 = vector.shape_cast %231 : vector<1x2x32xf32> to vector<2x32xf32>
    %233 = vector.extract_strided_slice %27 {offsets = [2, 0, 0], sizes = [1, 2, 32], strides = [1, 1, 1]} : vector<8x2x32xf32> to vector<1x2x32xf32>
    %234 = vector.shape_cast %233 : vector<1x2x32xf32> to vector<2x32xf32>
    %235 = tpu.concatenate %232, %234 in 0 : vector<2x32xf32>, vector<2x32xf32> -> vector<4x32xf32>
    %236 = vector.extract_strided_slice %25 {offsets = [5, 0, 0], sizes = [1, 2, 32], strides = [1, 1, 1]} : vector<8x2x32xf32> to vector<1x2x32xf32>
    %237 = vector.shape_cast %236 : vector<1x2x32xf32> to vector<2x32xf32>
    %238 = vector.extract_strided_slice %28 {offsets = [2, 0, 0], sizes = [1, 2, 32], strides = [1, 1, 1]} : vector<8x2x32xf32> to vector<1x2x32xf32>
    %239 = vector.shape_cast %238 : vector<1x2x32xf32> to vector<2x32xf32>
    %240 = tpu.concatenate %237, %239 in 0 : vector<2x32xf32>, vector<2x32xf32> -> vector<4x32xf32>
    %241 = vector.extract_strided_slice %26 {offsets = [5, 0, 0], sizes = [1, 2, 32], strides = [1, 1, 1]} : vector<8x2x32xf32> to vector<1x2x32xf32>
    %242 = vector.shape_cast %241 : vector<1x2x32xf32> to vector<2x32xf32>
    %243 = vector.extract_strided_slice %29 {offsets = [2, 0, 0], sizes = [1, 2, 32], strides = [1, 1, 1]} : vector<8x2x32xf32> to vector<1x2x32xf32>
    %244 = vector.shape_cast %243 : vector<1x2x32xf32> to vector<2x32xf32>
    %245 = tpu.concatenate %242, %244 in 0 : vector<2x32xf32>, vector<2x32xf32> -> vector<4x32xf32>
    %cst_47 = arith.constant dense<0.000000e+00> : vector<4x32xf32>
    %246 = tpu.matmul %230, %30, %cst_47 {dimension_numbers = #tpu.dot_dimension_numbers<[1], [0], [0], [1], [0, 0, 1, 1], [], []>} : vector<4x64xf32>, vector<64x32xf32>, vector<4x32xf32> -> vector<4x32xf32>
    %cst_48 = arith.constant dense<0.000000e+00> : vector<4x32xf32>
    %247 = tpu.matmul %230, %31, %cst_48 {dimension_numbers = #tpu.dot_dimension_numbers<[1], [0], [0], [1], [0, 0, 1, 1], [], []>} : vector<4x64xf32>, vector<64x32xf32>, vector<4x32xf32> -> vector<4x32xf32>
    %cst_49 = arith.constant dense<0.000000e+00> : vector<4x32xf32>
    %248 = tpu.matmul %230, %32, %cst_49 {dimension_numbers = #tpu.dot_dimension_numbers<[1], [0], [0], [1], [0, 0, 1, 1], [], []>} : vector<4x64xf32>, vector<64x32xf32>, vector<4x32xf32> -> vector<4x32xf32>
    %249 = arith.addf %235, %246 : vector<4x32xf32>
    %250 = arith.negf %249 : vector<4x32xf32>
    %251 = math.exp %250 : vector<4x32xf32>
    %cst_50 = arith.constant 1.000000e+00 : f32
    %252 = vector.broadcast %cst_50 : f32 to vector<4x32xf32>
    %253 = arith.addf %252, %251 : vector<4x32xf32>
    %254 = arith.divf %252, %253 : vector<4x32xf32>
    %255 = arith.addf %240, %247 : vector<4x32xf32>
    %256 = arith.negf %255 : vector<4x32xf32>
    %257 = math.exp %256 : vector<4x32xf32>
    %cst_51 = arith.constant 1.000000e+00 : f32
    %258 = vector.broadcast %cst_51 : f32 to vector<4x32xf32>
    %259 = arith.addf %258, %257 : vector<4x32xf32>
    %260 = arith.divf %258, %259 : vector<4x32xf32>
    %261 = arith.addf %248, %33 : vector<4x32xf32>
    %262 = arith.mulf %254, %261 : vector<4x32xf32>
    %263 = arith.addf %245, %262 : vector<4x32xf32>
    %264 = math.tanh %263 : vector<4x32xf32>
    %265 = arith.subf %228, %264 : vector<4x32xf32>
    %266 = arith.mulf %260, %265 : vector<4x32xf32>
    %267 = arith.addf %264, %266 : vector<4x32xf32>
    %268 = tpu.concatenate %267, %267 in 1 : vector<4x32xf32>, vector<4x32xf32> -> vector<4x64xf32>
    %269 = arith.mulf %268, %11 : vector<4x64xf32>
    %270 = vector.extract_strided_slice %24 {offsets = [6, 0, 0], sizes = [1, 2, 32], strides = [1, 1, 1]} : vector<8x2x32xf32> to vector<1x2x32xf32>
    %271 = vector.shape_cast %270 : vector<1x2x32xf32> to vector<2x32xf32>
    %272 = vector.extract_strided_slice %27 {offsets = [1, 0, 0], sizes = [1, 2, 32], strides = [1, 1, 1]} : vector<8x2x32xf32> to vector<1x2x32xf32>
    %273 = vector.shape_cast %272 : vector<1x2x32xf32> to vector<2x32xf32>
    %274 = tpu.concatenate %271, %273 in 0 : vector<2x32xf32>, vector<2x32xf32> -> vector<4x32xf32>
    %275 = vector.extract_strided_slice %25 {offsets = [6, 0, 0], sizes = [1, 2, 32], strides = [1, 1, 1]} : vector<8x2x32xf32> to vector<1x2x32xf32>
    %276 = vector.shape_cast %275 : vector<1x2x32xf32> to vector<2x32xf32>
    %277 = vector.extract_strided_slice %28 {offsets = [1, 0, 0], sizes = [1, 2, 32], strides = [1, 1, 1]} : vector<8x2x32xf32> to vector<1x2x32xf32>
    %278 = vector.shape_cast %277 : vector<1x2x32xf32> to vector<2x32xf32>
    %279 = tpu.concatenate %276, %278 in 0 : vector<2x32xf32>, vector<2x32xf32> -> vector<4x32xf32>
    %280 = vector.extract_strided_slice %26 {offsets = [6, 0, 0], sizes = [1, 2, 32], strides = [1, 1, 1]} : vector<8x2x32xf32> to vector<1x2x32xf32>
    %281 = vector.shape_cast %280 : vector<1x2x32xf32> to vector<2x32xf32>
    %282 = vector.extract_strided_slice %29 {offsets = [1, 0, 0], sizes = [1, 2, 32], strides = [1, 1, 1]} : vector<8x2x32xf32> to vector<1x2x32xf32>
    %283 = vector.shape_cast %282 : vector<1x2x32xf32> to vector<2x32xf32>
    %284 = tpu.concatenate %281, %283 in 0 : vector<2x32xf32>, vector<2x32xf32> -> vector<4x32xf32>
    %cst_52 = arith.constant dense<0.000000e+00> : vector<4x32xf32>
    %285 = tpu.matmul %269, %30, %cst_52 {dimension_numbers = #tpu.dot_dimension_numbers<[1], [0], [0], [1], [0, 0, 1, 1], [], []>} : vector<4x64xf32>, vector<64x32xf32>, vector<4x32xf32> -> vector<4x32xf32>
    %cst_53 = arith.constant dense<0.000000e+00> : vector<4x32xf32>
    %286 = tpu.matmul %269, %31, %cst_53 {dimension_numbers = #tpu.dot_dimension_numbers<[1], [0], [0], [1], [0, 0, 1, 1], [], []>} : vector<4x64xf32>, vector<64x32xf32>, vector<4x32xf32> -> vector<4x32xf32>
    %cst_54 = arith.constant dense<0.000000e+00> : vector<4x32xf32>
    %287 = tpu.matmul %269, %32, %cst_54 {dimension_numbers = #tpu.dot_dimension_numbers<[1], [0], [0], [1], [0, 0, 1, 1], [], []>} : vector<4x64xf32>, vector<64x32xf32>, vector<4x32xf32> -> vector<4x32xf32>
    %288 = arith.addf %274, %285 : vector<4x32xf32>
    %289 = arith.negf %288 : vector<4x32xf32>
    %290 = math.exp %289 : vector<4x32xf32>
    %cst_55 = arith.constant 1.000000e+00 : f32
    %291 = vector.broadcast %cst_55 : f32 to vector<4x32xf32>
    %292 = arith.addf %291, %290 : vector<4x32xf32>
    %293 = arith.divf %291, %292 : vector<4x32xf32>
    %294 = arith.addf %279, %286 : vector<4x32xf32>
    %295 = arith.negf %294 : vector<4x32xf32>
    %296 = math.exp %295 : vector<4x32xf32>
    %cst_56 = arith.constant 1.000000e+00 : f32
    %297 = vector.broadcast %cst_56 : f32 to vector<4x32xf32>
    %298 = arith.addf %297, %296 : vector<4x32xf32>
    %299 = arith.divf %297, %298 : vector<4x32xf32>
    %300 = arith.addf %287, %33 : vector<4x32xf32>
    %301 = arith.mulf %293, %300 : vector<4x32xf32>
    %302 = arith.addf %284, %301 : vector<4x32xf32>
    %303 = math.tanh %302 : vector<4x32xf32>
    %304 = arith.subf %267, %303 : vector<4x32xf32>
    %305 = arith.mulf %299, %304 : vector<4x32xf32>
    %306 = arith.addf %303, %305 : vector<4x32xf32>
    %307 = tpu.concatenate %306, %306 in 1 : vector<4x32xf32>, vector<4x32xf32> -> vector<4x64xf32>
    %308 = arith.mulf %307, %11 : vector<4x64xf32>
    %309 = vector.extract_strided_slice %24 {offsets = [7, 0, 0], sizes = [1, 2, 32], strides = [1, 1, 1]} : vector<8x2x32xf32> to vector<1x2x32xf32>
    %310 = vector.shape_cast %309 : vector<1x2x32xf32> to vector<2x32xf32>
    %311 = vector.extract_strided_slice %27 {offsets = [0, 0, 0], sizes = [1, 2, 32], strides = [1, 1, 1]} : vector<8x2x32xf32> to vector<1x2x32xf32>
    %312 = vector.shape_cast %311 : vector<1x2x32xf32> to vector<2x32xf32>
    %313 = tpu.concatenate %310, %312 in 0 : vector<2x32xf32>, vector<2x32xf32> -> vector<4x32xf32>
    %314 = vector.extract_strided_slice %25 {offsets = [7, 0, 0], sizes = [1, 2, 32], strides = [1, 1, 1]} : vector<8x2x32xf32> to vector<1x2x32xf32>
    %315 = vector.shape_cast %314 : vector<1x2x32xf32> to vector<2x32xf32>
    %316 = vector.extract_strided_slice %28 {offsets = [0, 0, 0], sizes = [1, 2, 32], strides = [1, 1, 1]} : vector<8x2x32xf32> to vector<1x2x32xf32>
    %317 = vector.shape_cast %316 : vector<1x2x32xf32> to vector<2x32xf32>
    %318 = tpu.concatenate %315, %317 in 0 : vector<2x32xf32>, vector<2x32xf32> -> vector<4x32xf32>
    %319 = vector.extract_strided_slice %26 {offsets = [7, 0, 0], sizes = [1, 2, 32], strides = [1, 1, 1]} : vector<8x2x32xf32> to vector<1x2x32xf32>
    %320 = vector.shape_cast %319 : vector<1x2x32xf32> to vector<2x32xf32>
    %321 = vector.extract_strided_slice %29 {offsets = [0, 0, 0], sizes = [1, 2, 32], strides = [1, 1, 1]} : vector<8x2x32xf32> to vector<1x2x32xf32>
    %322 = vector.shape_cast %321 : vector<1x2x32xf32> to vector<2x32xf32>
    %323 = tpu.concatenate %320, %322 in 0 : vector<2x32xf32>, vector<2x32xf32> -> vector<4x32xf32>
    %cst_57 = arith.constant dense<0.000000e+00> : vector<4x32xf32>
    %324 = tpu.matmul %308, %30, %cst_57 {dimension_numbers = #tpu.dot_dimension_numbers<[1], [0], [0], [1], [0, 0, 1, 1], [], []>} : vector<4x64xf32>, vector<64x32xf32>, vector<4x32xf32> -> vector<4x32xf32>
    %cst_58 = arith.constant dense<0.000000e+00> : vector<4x32xf32>
    %325 = tpu.matmul %308, %31, %cst_58 {dimension_numbers = #tpu.dot_dimension_numbers<[1], [0], [0], [1], [0, 0, 1, 1], [], []>} : vector<4x64xf32>, vector<64x32xf32>, vector<4x32xf32> -> vector<4x32xf32>
    %cst_59 = arith.constant dense<0.000000e+00> : vector<4x32xf32>
    %326 = tpu.matmul %308, %32, %cst_59 {dimension_numbers = #tpu.dot_dimension_numbers<[1], [0], [0], [1], [0, 0, 1, 1], [], []>} : vector<4x64xf32>, vector<64x32xf32>, vector<4x32xf32> -> vector<4x32xf32>
    %327 = arith.addf %313, %324 : vector<4x32xf32>
    %328 = arith.negf %327 : vector<4x32xf32>
    %329 = math.exp %328 : vector<4x32xf32>
    %cst_60 = arith.constant 1.000000e+00 : f32
    %330 = vector.broadcast %cst_60 : f32 to vector<4x32xf32>
    %331 = arith.addf %330, %329 : vector<4x32xf32>
    %332 = arith.divf %330, %331 : vector<4x32xf32>
    %333 = arith.addf %318, %325 : vector<4x32xf32>
    %334 = arith.negf %333 : vector<4x32xf32>
    %335 = math.exp %334 : vector<4x32xf32>
    %cst_61 = arith.constant 1.000000e+00 : f32
    %336 = vector.broadcast %cst_61 : f32 to vector<4x32xf32>
    %337 = arith.addf %336, %335 : vector<4x32xf32>
    %338 = arith.divf %336, %337 : vector<4x32xf32>
    %339 = arith.addf %326, %33 : vector<4x32xf32>
    %340 = arith.mulf %332, %339 : vector<4x32xf32>
    %341 = arith.addf %323, %340 : vector<4x32xf32>
    %342 = math.tanh %341 : vector<4x32xf32>
    %343 = arith.subf %306, %342 : vector<4x32xf32>
    %344 = arith.mulf %338, %343 : vector<4x32xf32>
    %345 = arith.addf %342, %344 : vector<4x32xf32>
    %346 = vector.extract_strided_slice %72 {offsets = [0, 0], sizes = [2, 32], strides = [1, 1]} : vector<4x32xf32> to vector<2x32xf32>
    %347 = vector.extract_strided_slice %111 {offsets = [0, 0], sizes = [2, 32], strides = [1, 1]} : vector<4x32xf32> to vector<2x32xf32>
    %348 = vector.extract_strided_slice %150 {offsets = [0, 0], sizes = [2, 32], strides = [1, 1]} : vector<4x32xf32> to vector<2x32xf32>
    %349 = vector.extract_strided_slice %189 {offsets = [0, 0], sizes = [2, 32], strides = [1, 1]} : vector<4x32xf32> to vector<2x32xf32>
    %350 = vector.extract_strided_slice %228 {offsets = [0, 0], sizes = [2, 32], strides = [1, 1]} : vector<4x32xf32> to vector<2x32xf32>
    %351 = vector.extract_strided_slice %267 {offsets = [0, 0], sizes = [2, 32], strides = [1, 1]} : vector<4x32xf32> to vector<2x32xf32>
    %352 = vector.extract_strided_slice %306 {offsets = [0, 0], sizes = [2, 32], strides = [1, 1]} : vector<4x32xf32> to vector<2x32xf32>
    %353 = vector.extract_strided_slice %345 {offsets = [0, 0], sizes = [2, 32], strides = [1, 1]} : vector<4x32xf32> to vector<2x32xf32>
    %354 = vector.shape_cast %346 : vector<2x32xf32> to vector<1x2x32xf32>
    %355 = vector.shape_cast %347 : vector<2x32xf32> to vector<1x2x32xf32>
    %356 = vector.shape_cast %348 : vector<2x32xf32> to vector<1x2x32xf32>
    %357 = vector.shape_cast %349 : vector<2x32xf32> to vector<1x2x32xf32>
    %358 = vector.shape_cast %350 : vector<2x32xf32> to vector<1x2x32xf32>
    %359 = vector.shape_cast %351 : vector<2x32xf32> to vector<1x2x32xf32>
    %360 = vector.shape_cast %352 : vector<2x32xf32> to vector<1x2x32xf32>
    %361 = vector.shape_cast %353 : vector<2x32xf32> to vector<1x2x32xf32>
    %362 = tpu.concatenate %354, %355, %356, %357, %358, %359, %360, %361 in 0 : vector<1x2x32xf32>, vector<1x2x32xf32>, vector<1x2x32xf32>, vector<1x2x32xf32>, vector<1x2x32xf32>, vector<1x2x32xf32>, vector<1x2x32xf32>, vector<1x2x32xf32> -> vector<8x2x32xf32>
    %363 = vector.extract_strided_slice %345 {offsets = [2, 0], sizes = [2, 32], strides = [1, 1]} : vector<4x32xf32> to vector<2x32xf32>
    %364 = vector.extract_strided_slice %306 {offsets = [2, 0], sizes = [2, 32], strides = [1, 1]} : vector<4x32xf32> to vector<2x32xf32>
    %365 = vector.extract_strided_slice %267 {offsets = [2, 0], sizes = [2, 32], strides = [1, 1]} : vector<4x32xf32> to vector<2x32xf32>
    %366 = vector.extract_strided_slice %228 {offsets = [2, 0], sizes = [2, 32], strides = [1, 1]} : vector<4x32xf32> to vector<2x32xf32>
    %367 = vector.extract_strided_slice %189 {offsets = [2, 0], sizes = [2, 32], strides = [1, 1]} : vector<4x32xf32> to vector<2x32xf32>
    %368 = vector.extract_strided_slice %150 {offsets = [2, 0], sizes = [2, 32], strides = [1, 1]} : vector<4x32xf32> to vector<2x32xf32>
    %369 = vector.extract_strided_slice %111 {offsets = [2, 0], sizes = [2, 32], strides = [1, 1]} : vector<4x32xf32> to vector<2x32xf32>
    %370 = vector.extract_strided_slice %72 {offsets = [2, 0], sizes = [2, 32], strides = [1, 1]} : vector<4x32xf32> to vector<2x32xf32>
    %371 = vector.shape_cast %363 : vector<2x32xf32> to vector<1x2x32xf32>
    %372 = vector.shape_cast %364 : vector<2x32xf32> to vector<1x2x32xf32>
    %373 = vector.shape_cast %365 : vector<2x32xf32> to vector<1x2x32xf32>
    %374 = vector.shape_cast %366 : vector<2x32xf32> to vector<1x2x32xf32>
    %375 = vector.shape_cast %367 : vector<2x32xf32> to vector<1x2x32xf32>
    %376 = vector.shape_cast %368 : vector<2x32xf32> to vector<1x2x32xf32>
    %377 = vector.shape_cast %369 : vector<2x32xf32> to vector<1x2x32xf32>
    %378 = vector.shape_cast %370 : vector<2x32xf32> to vector<1x2x32xf32>
    %379 = tpu.concatenate %371, %372, %373, %374, %375, %376, %377, %378 in 0 : vector<1x2x32xf32>, vector<1x2x32xf32>, vector<1x2x32xf32>, vector<1x2x32xf32>, vector<1x2x32xf32>, vector<1x2x32xf32>, vector<1x2x32xf32>, vector<1x2x32xf32> -> vector<8x2x32xf32>
    %380 = tpu.concatenate %362, %379 in 2 : vector<8x2x32xf32>, vector<8x2x32xf32> -> vector<8x2x64xf32>
    %381 = vector.shape_cast %380 : vector<8x2x64xf32> to vector<16x64xf32>
    %c0_62 = arith.constant 0 : index
    %c0_63 = arith.constant 0 : index
    %382 = vector.load %arg9[%c0_62, %c0_63] : memref<64x96xf32, #tpu.memory_space<vmem>>, vector<64x96xf32>
    %cst_64 = arith.constant dense<0.000000e+00> : vector<16x96xf32>
    %383 = tpu.matmul %381, %382, %cst_64 {dimension_numbers = #tpu.dot_dimension_numbers<[1], [0], [0], [1], [0, 0, 1, 1], [], []>} : vector<16x64xf32>, vector<64x96xf32>, vector<16x96xf32> -> vector<16x96xf32>
    %c0_65 = arith.constant 0 : index
    %c0_66 = arith.constant 0 : index
    %384 = vector.load %arg11[%c0_65, %c0_66] : memref<1x96xf32, #tpu.memory_space<vmem>>, vector<1x96xf32>
    %385 = vector.broadcast %384 : vector<1x96xf32> to vector<16x96xf32>
    %386 = arith.addf %383, %385 : vector<16x96xf32>
    %387 = vector.shape_cast %386 : vector<16x96xf32> to vector<8x2x96xf32>
    %c0_67 = arith.constant 0 : index
    %c0_68 = arith.constant 0 : index
    %388 = vector.load %arg10[%c0_67, %c0_68] : memref<64x96xf32, #tpu.memory_space<vmem>>, vector<64x96xf32>
    %cst_69 = arith.constant dense<0.000000e+00> : vector<16x96xf32>
    %389 = tpu.matmul %381, %388, %cst_69 {dimension_numbers = #tpu.dot_dimension_numbers<[1], [0], [0], [1], [0, 0, 1, 1], [], []>} : vector<16x64xf32>, vector<64x96xf32>, vector<16x96xf32> -> vector<16x96xf32>
    %c0_70 = arith.constant 0 : index
    %c0_71 = arith.constant 0 : index
    %390 = vector.load %arg12[%c0_70, %c0_71] : memref<1x96xf32, #tpu.memory_space<vmem>>, vector<1x96xf32>
    %391 = vector.broadcast %390 : vector<1x96xf32> to vector<16x96xf32>
    %392 = arith.addf %389, %391 : vector<16x96xf32>
    %393 = vector.shape_cast %392 : vector<16x96xf32> to vector<8x2x96xf32>
    %394 = vector.extract_strided_slice %387 {offsets = [0, 0, 0], sizes = [8, 2, 32], strides = [1, 1, 1]} : vector<8x2x96xf32> to vector<8x2x32xf32>
    %395 = vector.extract_strided_slice %387 {offsets = [0, 0, 32], sizes = [8, 2, 32], strides = [1, 1, 1]} : vector<8x2x96xf32> to vector<8x2x32xf32>
    %396 = vector.extract_strided_slice %387 {offsets = [0, 0, 64], sizes = [8, 2, 32], strides = [1, 1, 1]} : vector<8x2x96xf32> to vector<8x2x32xf32>
    %397 = vector.extract_strided_slice %393 {offsets = [0, 0, 0], sizes = [8, 2, 32], strides = [1, 1, 1]} : vector<8x2x96xf32> to vector<8x2x32xf32>
    %398 = vector.extract_strided_slice %393 {offsets = [0, 0, 32], sizes = [8, 2, 32], strides = [1, 1, 1]} : vector<8x2x96xf32> to vector<8x2x32xf32>
    %399 = vector.extract_strided_slice %393 {offsets = [0, 0, 64], sizes = [8, 2, 32], strides = [1, 1, 1]} : vector<8x2x96xf32> to vector<8x2x32xf32>
    %c0_72 = arith.constant 0 : index
    %c0_73 = arith.constant 0 : index
    %400 = vector.load %arg14[%c0_72, %c0_73] : memref<64x32xf32, #tpu.memory_space<vmem>>, vector<64x32xf32>
    %c0_74 = arith.constant 0 : index
    %c0_75 = arith.constant 0 : index
    %401 = vector.load %arg15[%c0_74, %c0_75] : memref<64x32xf32, #tpu.memory_space<vmem>>, vector<64x32xf32>
    %c0_76 = arith.constant 0 : index
    %c0_77 = arith.constant 0 : index
    %402 = vector.load %arg16[%c0_76, %c0_77] : memref<64x32xf32, #tpu.memory_space<vmem>>, vector<64x32xf32>
    %c0_78 = arith.constant 0 : index
    %c0_79 = arith.constant 0 : index
    %403 = vector.load %arg13[%c0_78, %c0_79] : memref<4x32xf32, #tpu.memory_space<vmem>>, vector<4x32xf32>
    %cst_80 = arith.constant 0.000000e+00 : f32
    %404 = vector.broadcast %cst_80 : f32 to vector<4x32xf32>
    %cst_81 = arith.constant 0.000000e+00 : f32
    %405 = vector.broadcast %cst_81 : f32 to vector<4x64xf32>
    %406 = vector.extract_strided_slice %394 {offsets = [0, 0, 0], sizes = [1, 2, 32], strides = [1, 1, 1]} : vector<8x2x32xf32> to vector<1x2x32xf32>
    %407 = vector.shape_cast %406 : vector<1x2x32xf32> to vector<2x32xf32>
    %408 = vector.extract_strided_slice %397 {offsets = [7, 0, 0], sizes = [1, 2, 32], strides = [1, 1, 1]} : vector<8x2x32xf32> to vector<1x2x32xf32>
    %409 = vector.shape_cast %408 : vector<1x2x32xf32> to vector<2x32xf32>
    %410 = tpu.concatenate %407, %409 in 0 : vector<2x32xf32>, vector<2x32xf32> -> vector<4x32xf32>
    %411 = vector.extract_strided_slice %395 {offsets = [0, 0, 0], sizes = [1, 2, 32], strides = [1, 1, 1]} : vector<8x2x32xf32> to vector<1x2x32xf32>
    %412 = vector.shape_cast %411 : vector<1x2x32xf32> to vector<2x32xf32>
    %413 = vector.extract_strided_slice %398 {offsets = [7, 0, 0], sizes = [1, 2, 32], strides = [1, 1, 1]} : vector<8x2x32xf32> to vector<1x2x32xf32>
    %414 = vector.shape_cast %413 : vector<1x2x32xf32> to vector<2x32xf32>
    %415 = tpu.concatenate %412, %414 in 0 : vector<2x32xf32>, vector<2x32xf32> -> vector<4x32xf32>
    %416 = vector.extract_strided_slice %396 {offsets = [0, 0, 0], sizes = [1, 2, 32], strides = [1, 1, 1]} : vector<8x2x32xf32> to vector<1x2x32xf32>
    %417 = vector.shape_cast %416 : vector<1x2x32xf32> to vector<2x32xf32>
    %418 = vector.extract_strided_slice %399 {offsets = [7, 0, 0], sizes = [1, 2, 32], strides = [1, 1, 1]} : vector<8x2x32xf32> to vector<1x2x32xf32>
    %419 = vector.shape_cast %418 : vector<1x2x32xf32> to vector<2x32xf32>
    %420 = tpu.concatenate %417, %419 in 0 : vector<2x32xf32>, vector<2x32xf32> -> vector<4x32xf32>
    %cst_82 = arith.constant dense<0.000000e+00> : vector<4x32xf32>
    %421 = tpu.matmul %405, %400, %cst_82 {dimension_numbers = #tpu.dot_dimension_numbers<[1], [0], [0], [1], [0, 0, 1, 1], [], []>} : vector<4x64xf32>, vector<64x32xf32>, vector<4x32xf32> -> vector<4x32xf32>
    %cst_83 = arith.constant dense<0.000000e+00> : vector<4x32xf32>
    %422 = tpu.matmul %405, %401, %cst_83 {dimension_numbers = #tpu.dot_dimension_numbers<[1], [0], [0], [1], [0, 0, 1, 1], [], []>} : vector<4x64xf32>, vector<64x32xf32>, vector<4x32xf32> -> vector<4x32xf32>
    %cst_84 = arith.constant dense<0.000000e+00> : vector<4x32xf32>
    %423 = tpu.matmul %405, %402, %cst_84 {dimension_numbers = #tpu.dot_dimension_numbers<[1], [0], [0], [1], [0, 0, 1, 1], [], []>} : vector<4x64xf32>, vector<64x32xf32>, vector<4x32xf32> -> vector<4x32xf32>
    %424 = arith.addf %410, %421 : vector<4x32xf32>
    %425 = arith.negf %424 : vector<4x32xf32>
    %426 = math.exp %425 : vector<4x32xf32>
    %cst_85 = arith.constant 1.000000e+00 : f32
    %427 = vector.broadcast %cst_85 : f32 to vector<4x32xf32>
    %428 = arith.addf %427, %426 : vector<4x32xf32>
    %429 = arith.divf %427, %428 : vector<4x32xf32>
    %430 = arith.addf %415, %422 : vector<4x32xf32>
    %431 = arith.negf %430 : vector<4x32xf32>
    %432 = math.exp %431 : vector<4x32xf32>
    %cst_86 = arith.constant 1.000000e+00 : f32
    %433 = vector.broadcast %cst_86 : f32 to vector<4x32xf32>
    %434 = arith.addf %433, %432 : vector<4x32xf32>
    %435 = arith.divf %433, %434 : vector<4x32xf32>
    %436 = arith.addf %423, %403 : vector<4x32xf32>
    %437 = arith.mulf %429, %436 : vector<4x32xf32>
    %438 = arith.addf %420, %437 : vector<4x32xf32>
    %439 = math.tanh %438 : vector<4x32xf32>
    %440 = arith.subf %404, %439 : vector<4x32xf32>
    %441 = arith.mulf %435, %440 : vector<4x32xf32>
    %442 = arith.addf %439, %441 : vector<4x32xf32>
    %443 = tpu.concatenate %442, %442 in 1 : vector<4x32xf32>, vector<4x32xf32> -> vector<4x64xf32>
    %444 = arith.mulf %443, %11 : vector<4x64xf32>
    %445 = vector.extract_strided_slice %394 {offsets = [1, 0, 0], sizes = [1, 2, 32], strides = [1, 1, 1]} : vector<8x2x32xf32> to vector<1x2x32xf32>
    %446 = vector.shape_cast %445 : vector<1x2x32xf32> to vector<2x32xf32>
    %447 = vector.extract_strided_slice %397 {offsets = [6, 0, 0], sizes = [1, 2, 32], strides = [1, 1, 1]} : vector<8x2x32xf32> to vector<1x2x32xf32>
    %448 = vector.shape_cast %447 : vector<1x2x32xf32> to vector<2x32xf32>
    %449 = tpu.concatenate %446, %448 in 0 : vector<2x32xf32>, vector<2x32xf32> -> vector<4x32xf32>
    %450 = vector.extract_strided_slice %395 {offsets = [1, 0, 0], sizes = [1, 2, 32], strides = [1, 1, 1]} : vector<8x2x32xf32> to vector<1x2x32xf32>
    %451 = vector.shape_cast %450 : vector<1x2x32xf32> to vector<2x32xf32>
    %452 = vector.extract_strided_slice %398 {offsets = [6, 0, 0], sizes = [1, 2, 32], strides = [1, 1, 1]} : vector<8x2x32xf32> to vector<1x2x32xf32>
    %453 = vector.shape_cast %452 : vector<1x2x32xf32> to vector<2x32xf32>
    %454 = tpu.concatenate %451, %453 in 0 : vector<2x32xf32>, vector<2x32xf32> -> vector<4x32xf32>
    %455 = vector.extract_strided_slice %396 {offsets = [1, 0, 0], sizes = [1, 2, 32], strides = [1, 1, 1]} : vector<8x2x32xf32> to vector<1x2x32xf32>
    %456 = vector.shape_cast %455 : vector<1x2x32xf32> to vector<2x32xf32>
    %457 = vector.extract_strided_slice %399 {offsets = [6, 0, 0], sizes = [1, 2, 32], strides = [1, 1, 1]} : vector<8x2x32xf32> to vector<1x2x32xf32>
    %458 = vector.shape_cast %457 : vector<1x2x32xf32> to vector<2x32xf32>
    %459 = tpu.concatenate %456, %458 in 0 : vector<2x32xf32>, vector<2x32xf32> -> vector<4x32xf32>
    %cst_87 = arith.constant dense<0.000000e+00> : vector<4x32xf32>
    %460 = tpu.matmul %444, %400, %cst_87 {dimension_numbers = #tpu.dot_dimension_numbers<[1], [0], [0], [1], [0, 0, 1, 1], [], []>} : vector<4x64xf32>, vector<64x32xf32>, vector<4x32xf32> -> vector<4x32xf32>
    %cst_88 = arith.constant dense<0.000000e+00> : vector<4x32xf32>
    %461 = tpu.matmul %444, %401, %cst_88 {dimension_numbers = #tpu.dot_dimension_numbers<[1], [0], [0], [1], [0, 0, 1, 1], [], []>} : vector<4x64xf32>, vector<64x32xf32>, vector<4x32xf32> -> vector<4x32xf32>
    %cst_89 = arith.constant dense<0.000000e+00> : vector<4x32xf32>
    %462 = tpu.matmul %444, %402, %cst_89 {dimension_numbers = #tpu.dot_dimension_numbers<[1], [0], [0], [1], [0, 0, 1, 1], [], []>} : vector<4x64xf32>, vector<64x32xf32>, vector<4x32xf32> -> vector<4x32xf32>
    %463 = arith.addf %449, %460 : vector<4x32xf32>
    %464 = arith.negf %463 : vector<4x32xf32>
    %465 = math.exp %464 : vector<4x32xf32>
    %cst_90 = arith.constant 1.000000e+00 : f32
    %466 = vector.broadcast %cst_90 : f32 to vector<4x32xf32>
    %467 = arith.addf %466, %465 : vector<4x32xf32>
    %468 = arith.divf %466, %467 : vector<4x32xf32>
    %469 = arith.addf %454, %461 : vector<4x32xf32>
    %470 = arith.negf %469 : vector<4x32xf32>
    %471 = math.exp %470 : vector<4x32xf32>
    %cst_91 = arith.constant 1.000000e+00 : f32
    %472 = vector.broadcast %cst_91 : f32 to vector<4x32xf32>
    %473 = arith.addf %472, %471 : vector<4x32xf32>
    %474 = arith.divf %472, %473 : vector<4x32xf32>
    %475 = arith.addf %462, %403 : vector<4x32xf32>
    %476 = arith.mulf %468, %475 : vector<4x32xf32>
    %477 = arith.addf %459, %476 : vector<4x32xf32>
    %478 = math.tanh %477 : vector<4x32xf32>
    %479 = arith.subf %442, %478 : vector<4x32xf32>
    %480 = arith.mulf %474, %479 : vector<4x32xf32>
    %481 = arith.addf %478, %480 : vector<4x32xf32>
    %482 = tpu.concatenate %481, %481 in 1 : vector<4x32xf32>, vector<4x32xf32> -> vector<4x64xf32>
    %483 = arith.mulf %482, %11 : vector<4x64xf32>
    %484 = vector.extract_strided_slice %394 {offsets = [2, 0, 0], sizes = [1, 2, 32], strides = [1, 1, 1]} : vector<8x2x32xf32> to vector<1x2x32xf32>
    %485 = vector.shape_cast %484 : vector<1x2x32xf32> to vector<2x32xf32>
    %486 = vector.extract_strided_slice %397 {offsets = [5, 0, 0], sizes = [1, 2, 32], strides = [1, 1, 1]} : vector<8x2x32xf32> to vector<1x2x32xf32>
    %487 = vector.shape_cast %486 : vector<1x2x32xf32> to vector<2x32xf32>
    %488 = tpu.concatenate %485, %487 in 0 : vector<2x32xf32>, vector<2x32xf32> -> vector<4x32xf32>
    %489 = vector.extract_strided_slice %395 {offsets = [2, 0, 0], sizes = [1, 2, 32], strides = [1, 1, 1]} : vector<8x2x32xf32> to vector<1x2x32xf32>
    %490 = vector.shape_cast %489 : vector<1x2x32xf32> to vector<2x32xf32>
    %491 = vector.extract_strided_slice %398 {offsets = [5, 0, 0], sizes = [1, 2, 32], strides = [1, 1, 1]} : vector<8x2x32xf32> to vector<1x2x32xf32>
    %492 = vector.shape_cast %491 : vector<1x2x32xf32> to vector<2x32xf32>
    %493 = tpu.concatenate %490, %492 in 0 : vector<2x32xf32>, vector<2x32xf32> -> vector<4x32xf32>
    %494 = vector.extract_strided_slice %396 {offsets = [2, 0, 0], sizes = [1, 2, 32], strides = [1, 1, 1]} : vector<8x2x32xf32> to vector<1x2x32xf32>
    %495 = vector.shape_cast %494 : vector<1x2x32xf32> to vector<2x32xf32>
    %496 = vector.extract_strided_slice %399 {offsets = [5, 0, 0], sizes = [1, 2, 32], strides = [1, 1, 1]} : vector<8x2x32xf32> to vector<1x2x32xf32>
    %497 = vector.shape_cast %496 : vector<1x2x32xf32> to vector<2x32xf32>
    %498 = tpu.concatenate %495, %497 in 0 : vector<2x32xf32>, vector<2x32xf32> -> vector<4x32xf32>
    %cst_92 = arith.constant dense<0.000000e+00> : vector<4x32xf32>
    %499 = tpu.matmul %483, %400, %cst_92 {dimension_numbers = #tpu.dot_dimension_numbers<[1], [0], [0], [1], [0, 0, 1, 1], [], []>} : vector<4x64xf32>, vector<64x32xf32>, vector<4x32xf32> -> vector<4x32xf32>
    %cst_93 = arith.constant dense<0.000000e+00> : vector<4x32xf32>
    %500 = tpu.matmul %483, %401, %cst_93 {dimension_numbers = #tpu.dot_dimension_numbers<[1], [0], [0], [1], [0, 0, 1, 1], [], []>} : vector<4x64xf32>, vector<64x32xf32>, vector<4x32xf32> -> vector<4x32xf32>
    %cst_94 = arith.constant dense<0.000000e+00> : vector<4x32xf32>
    %501 = tpu.matmul %483, %402, %cst_94 {dimension_numbers = #tpu.dot_dimension_numbers<[1], [0], [0], [1], [0, 0, 1, 1], [], []>} : vector<4x64xf32>, vector<64x32xf32>, vector<4x32xf32> -> vector<4x32xf32>
    %502 = arith.addf %488, %499 : vector<4x32xf32>
    %503 = arith.negf %502 : vector<4x32xf32>
    %504 = math.exp %503 : vector<4x32xf32>
    %cst_95 = arith.constant 1.000000e+00 : f32
    %505 = vector.broadcast %cst_95 : f32 to vector<4x32xf32>
    %506 = arith.addf %505, %504 : vector<4x32xf32>
    %507 = arith.divf %505, %506 : vector<4x32xf32>
    %508 = arith.addf %493, %500 : vector<4x32xf32>
    %509 = arith.negf %508 : vector<4x32xf32>
    %510 = math.exp %509 : vector<4x32xf32>
    %cst_96 = arith.constant 1.000000e+00 : f32
    %511 = vector.broadcast %cst_96 : f32 to vector<4x32xf32>
    %512 = arith.addf %511, %510 : vector<4x32xf32>
    %513 = arith.divf %511, %512 : vector<4x32xf32>
    %514 = arith.addf %501, %403 : vector<4x32xf32>
    %515 = arith.mulf %507, %514 : vector<4x32xf32>
    %516 = arith.addf %498, %515 : vector<4x32xf32>
    %517 = math.tanh %516 : vector<4x32xf32>
    %518 = arith.subf %481, %517 : vector<4x32xf32>
    %519 = arith.mulf %513, %518 : vector<4x32xf32>
    %520 = arith.addf %517, %519 : vector<4x32xf32>
    %521 = tpu.concatenate %520, %520 in 1 : vector<4x32xf32>, vector<4x32xf32> -> vector<4x64xf32>
    %522 = arith.mulf %521, %11 : vector<4x64xf32>
    %523 = vector.extract_strided_slice %394 {offsets = [3, 0, 0], sizes = [1, 2, 32], strides = [1, 1, 1]} : vector<8x2x32xf32> to vector<1x2x32xf32>
    %524 = vector.shape_cast %523 : vector<1x2x32xf32> to vector<2x32xf32>
    %525 = vector.extract_strided_slice %397 {offsets = [4, 0, 0], sizes = [1, 2, 32], strides = [1, 1, 1]} : vector<8x2x32xf32> to vector<1x2x32xf32>
    %526 = vector.shape_cast %525 : vector<1x2x32xf32> to vector<2x32xf32>
    %527 = tpu.concatenate %524, %526 in 0 : vector<2x32xf32>, vector<2x32xf32> -> vector<4x32xf32>
    %528 = vector.extract_strided_slice %395 {offsets = [3, 0, 0], sizes = [1, 2, 32], strides = [1, 1, 1]} : vector<8x2x32xf32> to vector<1x2x32xf32>
    %529 = vector.shape_cast %528 : vector<1x2x32xf32> to vector<2x32xf32>
    %530 = vector.extract_strided_slice %398 {offsets = [4, 0, 0], sizes = [1, 2, 32], strides = [1, 1, 1]} : vector<8x2x32xf32> to vector<1x2x32xf32>
    %531 = vector.shape_cast %530 : vector<1x2x32xf32> to vector<2x32xf32>
    %532 = tpu.concatenate %529, %531 in 0 : vector<2x32xf32>, vector<2x32xf32> -> vector<4x32xf32>
    %533 = vector.extract_strided_slice %396 {offsets = [3, 0, 0], sizes = [1, 2, 32], strides = [1, 1, 1]} : vector<8x2x32xf32> to vector<1x2x32xf32>
    %534 = vector.shape_cast %533 : vector<1x2x32xf32> to vector<2x32xf32>
    %535 = vector.extract_strided_slice %399 {offsets = [4, 0, 0], sizes = [1, 2, 32], strides = [1, 1, 1]} : vector<8x2x32xf32> to vector<1x2x32xf32>
    %536 = vector.shape_cast %535 : vector<1x2x32xf32> to vector<2x32xf32>
    %537 = tpu.concatenate %534, %536 in 0 : vector<2x32xf32>, vector<2x32xf32> -> vector<4x32xf32>
    %cst_97 = arith.constant dense<0.000000e+00> : vector<4x32xf32>
    %538 = tpu.matmul %522, %400, %cst_97 {dimension_numbers = #tpu.dot_dimension_numbers<[1], [0], [0], [1], [0, 0, 1, 1], [], []>} : vector<4x64xf32>, vector<64x32xf32>, vector<4x32xf32> -> vector<4x32xf32>
    %cst_98 = arith.constant dense<0.000000e+00> : vector<4x32xf32>
    %539 = tpu.matmul %522, %401, %cst_98 {dimension_numbers = #tpu.dot_dimension_numbers<[1], [0], [0], [1], [0, 0, 1, 1], [], []>} : vector<4x64xf32>, vector<64x32xf32>, vector<4x32xf32> -> vector<4x32xf32>
    %cst_99 = arith.constant dense<0.000000e+00> : vector<4x32xf32>
    %540 = tpu.matmul %522, %402, %cst_99 {dimension_numbers = #tpu.dot_dimension_numbers<[1], [0], [0], [1], [0, 0, 1, 1], [], []>} : vector<4x64xf32>, vector<64x32xf32>, vector<4x32xf32> -> vector<4x32xf32>
    %541 = arith.addf %527, %538 : vector<4x32xf32>
    %542 = arith.negf %541 : vector<4x32xf32>
    %543 = math.exp %542 : vector<4x32xf32>
    %cst_100 = arith.constant 1.000000e+00 : f32
    %544 = vector.broadcast %cst_100 : f32 to vector<4x32xf32>
    %545 = arith.addf %544, %543 : vector<4x32xf32>
    %546 = arith.divf %544, %545 : vector<4x32xf32>
    %547 = arith.addf %532, %539 : vector<4x32xf32>
    %548 = arith.negf %547 : vector<4x32xf32>
    %549 = math.exp %548 : vector<4x32xf32>
    %cst_101 = arith.constant 1.000000e+00 : f32
    %550 = vector.broadcast %cst_101 : f32 to vector<4x32xf32>
    %551 = arith.addf %550, %549 : vector<4x32xf32>
    %552 = arith.divf %550, %551 : vector<4x32xf32>
    %553 = arith.addf %540, %403 : vector<4x32xf32>
    %554 = arith.mulf %546, %553 : vector<4x32xf32>
    %555 = arith.addf %537, %554 : vector<4x32xf32>
    %556 = math.tanh %555 : vector<4x32xf32>
    %557 = arith.subf %520, %556 : vector<4x32xf32>
    %558 = arith.mulf %552, %557 : vector<4x32xf32>
    %559 = arith.addf %556, %558 : vector<4x32xf32>
    %560 = tpu.concatenate %559, %559 in 1 : vector<4x32xf32>, vector<4x32xf32> -> vector<4x64xf32>
    %561 = arith.mulf %560, %11 : vector<4x64xf32>
    %562 = vector.extract_strided_slice %394 {offsets = [4, 0, 0], sizes = [1, 2, 32], strides = [1, 1, 1]} : vector<8x2x32xf32> to vector<1x2x32xf32>
    %563 = vector.shape_cast %562 : vector<1x2x32xf32> to vector<2x32xf32>
    %564 = vector.extract_strided_slice %397 {offsets = [3, 0, 0], sizes = [1, 2, 32], strides = [1, 1, 1]} : vector<8x2x32xf32> to vector<1x2x32xf32>
    %565 = vector.shape_cast %564 : vector<1x2x32xf32> to vector<2x32xf32>
    %566 = tpu.concatenate %563, %565 in 0 : vector<2x32xf32>, vector<2x32xf32> -> vector<4x32xf32>
    %567 = vector.extract_strided_slice %395 {offsets = [4, 0, 0], sizes = [1, 2, 32], strides = [1, 1, 1]} : vector<8x2x32xf32> to vector<1x2x32xf32>
    %568 = vector.shape_cast %567 : vector<1x2x32xf32> to vector<2x32xf32>
    %569 = vector.extract_strided_slice %398 {offsets = [3, 0, 0], sizes = [1, 2, 32], strides = [1, 1, 1]} : vector<8x2x32xf32> to vector<1x2x32xf32>
    %570 = vector.shape_cast %569 : vector<1x2x32xf32> to vector<2x32xf32>
    %571 = tpu.concatenate %568, %570 in 0 : vector<2x32xf32>, vector<2x32xf32> -> vector<4x32xf32>
    %572 = vector.extract_strided_slice %396 {offsets = [4, 0, 0], sizes = [1, 2, 32], strides = [1, 1, 1]} : vector<8x2x32xf32> to vector<1x2x32xf32>
    %573 = vector.shape_cast %572 : vector<1x2x32xf32> to vector<2x32xf32>
    %574 = vector.extract_strided_slice %399 {offsets = [3, 0, 0], sizes = [1, 2, 32], strides = [1, 1, 1]} : vector<8x2x32xf32> to vector<1x2x32xf32>
    %575 = vector.shape_cast %574 : vector<1x2x32xf32> to vector<2x32xf32>
    %576 = tpu.concatenate %573, %575 in 0 : vector<2x32xf32>, vector<2x32xf32> -> vector<4x32xf32>
    %cst_102 = arith.constant dense<0.000000e+00> : vector<4x32xf32>
    %577 = tpu.matmul %561, %400, %cst_102 {dimension_numbers = #tpu.dot_dimension_numbers<[1], [0], [0], [1], [0, 0, 1, 1], [], []>} : vector<4x64xf32>, vector<64x32xf32>, vector<4x32xf32> -> vector<4x32xf32>
    %cst_103 = arith.constant dense<0.000000e+00> : vector<4x32xf32>
    %578 = tpu.matmul %561, %401, %cst_103 {dimension_numbers = #tpu.dot_dimension_numbers<[1], [0], [0], [1], [0, 0, 1, 1], [], []>} : vector<4x64xf32>, vector<64x32xf32>, vector<4x32xf32> -> vector<4x32xf32>
    %cst_104 = arith.constant dense<0.000000e+00> : vector<4x32xf32>
    %579 = tpu.matmul %561, %402, %cst_104 {dimension_numbers = #tpu.dot_dimension_numbers<[1], [0], [0], [1], [0, 0, 1, 1], [], []>} : vector<4x64xf32>, vector<64x32xf32>, vector<4x32xf32> -> vector<4x32xf32>
    %580 = arith.addf %566, %577 : vector<4x32xf32>
    %581 = arith.negf %580 : vector<4x32xf32>
    %582 = math.exp %581 : vector<4x32xf32>
    %cst_105 = arith.constant 1.000000e+00 : f32
    %583 = vector.broadcast %cst_105 : f32 to vector<4x32xf32>
    %584 = arith.addf %583, %582 : vector<4x32xf32>
    %585 = arith.divf %583, %584 : vector<4x32xf32>
    %586 = arith.addf %571, %578 : vector<4x32xf32>
    %587 = arith.negf %586 : vector<4x32xf32>
    %588 = math.exp %587 : vector<4x32xf32>
    %cst_106 = arith.constant 1.000000e+00 : f32
    %589 = vector.broadcast %cst_106 : f32 to vector<4x32xf32>
    %590 = arith.addf %589, %588 : vector<4x32xf32>
    %591 = arith.divf %589, %590 : vector<4x32xf32>
    %592 = arith.addf %579, %403 : vector<4x32xf32>
    %593 = arith.mulf %585, %592 : vector<4x32xf32>
    %594 = arith.addf %576, %593 : vector<4x32xf32>
    %595 = math.tanh %594 : vector<4x32xf32>
    %596 = arith.subf %559, %595 : vector<4x32xf32>
    %597 = arith.mulf %591, %596 : vector<4x32xf32>
    %598 = arith.addf %595, %597 : vector<4x32xf32>
    %599 = tpu.concatenate %598, %598 in 1 : vector<4x32xf32>, vector<4x32xf32> -> vector<4x64xf32>
    %600 = arith.mulf %599, %11 : vector<4x64xf32>
    %601 = vector.extract_strided_slice %394 {offsets = [5, 0, 0], sizes = [1, 2, 32], strides = [1, 1, 1]} : vector<8x2x32xf32> to vector<1x2x32xf32>
    %602 = vector.shape_cast %601 : vector<1x2x32xf32> to vector<2x32xf32>
    %603 = vector.extract_strided_slice %397 {offsets = [2, 0, 0], sizes = [1, 2, 32], strides = [1, 1, 1]} : vector<8x2x32xf32> to vector<1x2x32xf32>
    %604 = vector.shape_cast %603 : vector<1x2x32xf32> to vector<2x32xf32>
    %605 = tpu.concatenate %602, %604 in 0 : vector<2x32xf32>, vector<2x32xf32> -> vector<4x32xf32>
    %606 = vector.extract_strided_slice %395 {offsets = [5, 0, 0], sizes = [1, 2, 32], strides = [1, 1, 1]} : vector<8x2x32xf32> to vector<1x2x32xf32>
    %607 = vector.shape_cast %606 : vector<1x2x32xf32> to vector<2x32xf32>
    %608 = vector.extract_strided_slice %398 {offsets = [2, 0, 0], sizes = [1, 2, 32], strides = [1, 1, 1]} : vector<8x2x32xf32> to vector<1x2x32xf32>
    %609 = vector.shape_cast %608 : vector<1x2x32xf32> to vector<2x32xf32>
    %610 = tpu.concatenate %607, %609 in 0 : vector<2x32xf32>, vector<2x32xf32> -> vector<4x32xf32>
    %611 = vector.extract_strided_slice %396 {offsets = [5, 0, 0], sizes = [1, 2, 32], strides = [1, 1, 1]} : vector<8x2x32xf32> to vector<1x2x32xf32>
    %612 = vector.shape_cast %611 : vector<1x2x32xf32> to vector<2x32xf32>
    %613 = vector.extract_strided_slice %399 {offsets = [2, 0, 0], sizes = [1, 2, 32], strides = [1, 1, 1]} : vector<8x2x32xf32> to vector<1x2x32xf32>
    %614 = vector.shape_cast %613 : vector<1x2x32xf32> to vector<2x32xf32>
    %615 = tpu.concatenate %612, %614 in 0 : vector<2x32xf32>, vector<2x32xf32> -> vector<4x32xf32>
    %cst_107 = arith.constant dense<0.000000e+00> : vector<4x32xf32>
    %616 = tpu.matmul %600, %400, %cst_107 {dimension_numbers = #tpu.dot_dimension_numbers<[1], [0], [0], [1], [0, 0, 1, 1], [], []>} : vector<4x64xf32>, vector<64x32xf32>, vector<4x32xf32> -> vector<4x32xf32>
    %cst_108 = arith.constant dense<0.000000e+00> : vector<4x32xf32>
    %617 = tpu.matmul %600, %401, %cst_108 {dimension_numbers = #tpu.dot_dimension_numbers<[1], [0], [0], [1], [0, 0, 1, 1], [], []>} : vector<4x64xf32>, vector<64x32xf32>, vector<4x32xf32> -> vector<4x32xf32>
    %cst_109 = arith.constant dense<0.000000e+00> : vector<4x32xf32>
    %618 = tpu.matmul %600, %402, %cst_109 {dimension_numbers = #tpu.dot_dimension_numbers<[1], [0], [0], [1], [0, 0, 1, 1], [], []>} : vector<4x64xf32>, vector<64x32xf32>, vector<4x32xf32> -> vector<4x32xf32>
    %619 = arith.addf %605, %616 : vector<4x32xf32>
    %620 = arith.negf %619 : vector<4x32xf32>
    %621 = math.exp %620 : vector<4x32xf32>
    %cst_110 = arith.constant 1.000000e+00 : f32
    %622 = vector.broadcast %cst_110 : f32 to vector<4x32xf32>
    %623 = arith.addf %622, %621 : vector<4x32xf32>
    %624 = arith.divf %622, %623 : vector<4x32xf32>
    %625 = arith.addf %610, %617 : vector<4x32xf32>
    %626 = arith.negf %625 : vector<4x32xf32>
    %627 = math.exp %626 : vector<4x32xf32>
    %cst_111 = arith.constant 1.000000e+00 : f32
    %628 = vector.broadcast %cst_111 : f32 to vector<4x32xf32>
    %629 = arith.addf %628, %627 : vector<4x32xf32>
    %630 = arith.divf %628, %629 : vector<4x32xf32>
    %631 = arith.addf %618, %403 : vector<4x32xf32>
    %632 = arith.mulf %624, %631 : vector<4x32xf32>
    %633 = arith.addf %615, %632 : vector<4x32xf32>
    %634 = math.tanh %633 : vector<4x32xf32>
    %635 = arith.subf %598, %634 : vector<4x32xf32>
    %636 = arith.mulf %630, %635 : vector<4x32xf32>
    %637 = arith.addf %634, %636 : vector<4x32xf32>
    %638 = tpu.concatenate %637, %637 in 1 : vector<4x32xf32>, vector<4x32xf32> -> vector<4x64xf32>
    %639 = arith.mulf %638, %11 : vector<4x64xf32>
    %640 = vector.extract_strided_slice %394 {offsets = [6, 0, 0], sizes = [1, 2, 32], strides = [1, 1, 1]} : vector<8x2x32xf32> to vector<1x2x32xf32>
    %641 = vector.shape_cast %640 : vector<1x2x32xf32> to vector<2x32xf32>
    %642 = vector.extract_strided_slice %397 {offsets = [1, 0, 0], sizes = [1, 2, 32], strides = [1, 1, 1]} : vector<8x2x32xf32> to vector<1x2x32xf32>
    %643 = vector.shape_cast %642 : vector<1x2x32xf32> to vector<2x32xf32>
    %644 = tpu.concatenate %641, %643 in 0 : vector<2x32xf32>, vector<2x32xf32> -> vector<4x32xf32>
    %645 = vector.extract_strided_slice %395 {offsets = [6, 0, 0], sizes = [1, 2, 32], strides = [1, 1, 1]} : vector<8x2x32xf32> to vector<1x2x32xf32>
    %646 = vector.shape_cast %645 : vector<1x2x32xf32> to vector<2x32xf32>
    %647 = vector.extract_strided_slice %398 {offsets = [1, 0, 0], sizes = [1, 2, 32], strides = [1, 1, 1]} : vector<8x2x32xf32> to vector<1x2x32xf32>
    %648 = vector.shape_cast %647 : vector<1x2x32xf32> to vector<2x32xf32>
    %649 = tpu.concatenate %646, %648 in 0 : vector<2x32xf32>, vector<2x32xf32> -> vector<4x32xf32>
    %650 = vector.extract_strided_slice %396 {offsets = [6, 0, 0], sizes = [1, 2, 32], strides = [1, 1, 1]} : vector<8x2x32xf32> to vector<1x2x32xf32>
    %651 = vector.shape_cast %650 : vector<1x2x32xf32> to vector<2x32xf32>
    %652 = vector.extract_strided_slice %399 {offsets = [1, 0, 0], sizes = [1, 2, 32], strides = [1, 1, 1]} : vector<8x2x32xf32> to vector<1x2x32xf32>
    %653 = vector.shape_cast %652 : vector<1x2x32xf32> to vector<2x32xf32>
    %654 = tpu.concatenate %651, %653 in 0 : vector<2x32xf32>, vector<2x32xf32> -> vector<4x32xf32>
    %cst_112 = arith.constant dense<0.000000e+00> : vector<4x32xf32>
    %655 = tpu.matmul %639, %400, %cst_112 {dimension_numbers = #tpu.dot_dimension_numbers<[1], [0], [0], [1], [0, 0, 1, 1], [], []>} : vector<4x64xf32>, vector<64x32xf32>, vector<4x32xf32> -> vector<4x32xf32>
    %cst_113 = arith.constant dense<0.000000e+00> : vector<4x32xf32>
    %656 = tpu.matmul %639, %401, %cst_113 {dimension_numbers = #tpu.dot_dimension_numbers<[1], [0], [0], [1], [0, 0, 1, 1], [], []>} : vector<4x64xf32>, vector<64x32xf32>, vector<4x32xf32> -> vector<4x32xf32>
    %cst_114 = arith.constant dense<0.000000e+00> : vector<4x32xf32>
    %657 = tpu.matmul %639, %402, %cst_114 {dimension_numbers = #tpu.dot_dimension_numbers<[1], [0], [0], [1], [0, 0, 1, 1], [], []>} : vector<4x64xf32>, vector<64x32xf32>, vector<4x32xf32> -> vector<4x32xf32>
    %658 = arith.addf %644, %655 : vector<4x32xf32>
    %659 = arith.negf %658 : vector<4x32xf32>
    %660 = math.exp %659 : vector<4x32xf32>
    %cst_115 = arith.constant 1.000000e+00 : f32
    %661 = vector.broadcast %cst_115 : f32 to vector<4x32xf32>
    %662 = arith.addf %661, %660 : vector<4x32xf32>
    %663 = arith.divf %661, %662 : vector<4x32xf32>
    %664 = arith.addf %649, %656 : vector<4x32xf32>
    %665 = arith.negf %664 : vector<4x32xf32>
    %666 = math.exp %665 : vector<4x32xf32>
    %cst_116 = arith.constant 1.000000e+00 : f32
    %667 = vector.broadcast %cst_116 : f32 to vector<4x32xf32>
    %668 = arith.addf %667, %666 : vector<4x32xf32>
    %669 = arith.divf %667, %668 : vector<4x32xf32>
    %670 = arith.addf %657, %403 : vector<4x32xf32>
    %671 = arith.mulf %663, %670 : vector<4x32xf32>
    %672 = arith.addf %654, %671 : vector<4x32xf32>
    %673 = math.tanh %672 : vector<4x32xf32>
    %674 = arith.subf %637, %673 : vector<4x32xf32>
    %675 = arith.mulf %669, %674 : vector<4x32xf32>
    %676 = arith.addf %673, %675 : vector<4x32xf32>
    %677 = tpu.concatenate %676, %676 in 1 : vector<4x32xf32>, vector<4x32xf32> -> vector<4x64xf32>
    %678 = arith.mulf %677, %11 : vector<4x64xf32>
    %679 = vector.extract_strided_slice %394 {offsets = [7, 0, 0], sizes = [1, 2, 32], strides = [1, 1, 1]} : vector<8x2x32xf32> to vector<1x2x32xf32>
    %680 = vector.shape_cast %679 : vector<1x2x32xf32> to vector<2x32xf32>
    %681 = vector.extract_strided_slice %397 {offsets = [0, 0, 0], sizes = [1, 2, 32], strides = [1, 1, 1]} : vector<8x2x32xf32> to vector<1x2x32xf32>
    %682 = vector.shape_cast %681 : vector<1x2x32xf32> to vector<2x32xf32>
    %683 = tpu.concatenate %680, %682 in 0 : vector<2x32xf32>, vector<2x32xf32> -> vector<4x32xf32>
    %684 = vector.extract_strided_slice %395 {offsets = [7, 0, 0], sizes = [1, 2, 32], strides = [1, 1, 1]} : vector<8x2x32xf32> to vector<1x2x32xf32>
    %685 = vector.shape_cast %684 : vector<1x2x32xf32> to vector<2x32xf32>
    %686 = vector.extract_strided_slice %398 {offsets = [0, 0, 0], sizes = [1, 2, 32], strides = [1, 1, 1]} : vector<8x2x32xf32> to vector<1x2x32xf32>
    %687 = vector.shape_cast %686 : vector<1x2x32xf32> to vector<2x32xf32>
    %688 = tpu.concatenate %685, %687 in 0 : vector<2x32xf32>, vector<2x32xf32> -> vector<4x32xf32>
    %689 = vector.extract_strided_slice %396 {offsets = [7, 0, 0], sizes = [1, 2, 32], strides = [1, 1, 1]} : vector<8x2x32xf32> to vector<1x2x32xf32>
    %690 = vector.shape_cast %689 : vector<1x2x32xf32> to vector<2x32xf32>
    %691 = vector.extract_strided_slice %399 {offsets = [0, 0, 0], sizes = [1, 2, 32], strides = [1, 1, 1]} : vector<8x2x32xf32> to vector<1x2x32xf32>
    %692 = vector.shape_cast %691 : vector<1x2x32xf32> to vector<2x32xf32>
    %693 = tpu.concatenate %690, %692 in 0 : vector<2x32xf32>, vector<2x32xf32> -> vector<4x32xf32>
    %cst_117 = arith.constant dense<0.000000e+00> : vector<4x32xf32>
    %694 = tpu.matmul %678, %400, %cst_117 {dimension_numbers = #tpu.dot_dimension_numbers<[1], [0], [0], [1], [0, 0, 1, 1], [], []>} : vector<4x64xf32>, vector<64x32xf32>, vector<4x32xf32> -> vector<4x32xf32>
    %cst_118 = arith.constant dense<0.000000e+00> : vector<4x32xf32>
    %695 = tpu.matmul %678, %401, %cst_118 {dimension_numbers = #tpu.dot_dimension_numbers<[1], [0], [0], [1], [0, 0, 1, 1], [], []>} : vector<4x64xf32>, vector<64x32xf32>, vector<4x32xf32> -> vector<4x32xf32>
    %cst_119 = arith.constant dense<0.000000e+00> : vector<4x32xf32>
    %696 = tpu.matmul %678, %402, %cst_119 {dimension_numbers = #tpu.dot_dimension_numbers<[1], [0], [0], [1], [0, 0, 1, 1], [], []>} : vector<4x64xf32>, vector<64x32xf32>, vector<4x32xf32> -> vector<4x32xf32>
    %697 = arith.addf %683, %694 : vector<4x32xf32>
    %698 = arith.negf %697 : vector<4x32xf32>
    %699 = math.exp %698 : vector<4x32xf32>
    %cst_120 = arith.constant 1.000000e+00 : f32
    %700 = vector.broadcast %cst_120 : f32 to vector<4x32xf32>
    %701 = arith.addf %700, %699 : vector<4x32xf32>
    %702 = arith.divf %700, %701 : vector<4x32xf32>
    %703 = arith.addf %688, %695 : vector<4x32xf32>
    %704 = arith.negf %703 : vector<4x32xf32>
    %705 = math.exp %704 : vector<4x32xf32>
    %cst_121 = arith.constant 1.000000e+00 : f32
    %706 = vector.broadcast %cst_121 : f32 to vector<4x32xf32>
    %707 = arith.addf %706, %705 : vector<4x32xf32>
    %708 = arith.divf %706, %707 : vector<4x32xf32>
    %709 = arith.addf %696, %403 : vector<4x32xf32>
    %710 = arith.mulf %702, %709 : vector<4x32xf32>
    %711 = arith.addf %693, %710 : vector<4x32xf32>
    %712 = math.tanh %711 : vector<4x32xf32>
    %713 = arith.subf %676, %712 : vector<4x32xf32>
    %714 = arith.mulf %708, %713 : vector<4x32xf32>
    %715 = arith.addf %712, %714 : vector<4x32xf32>
    %716 = vector.extract_strided_slice %442 {offsets = [0, 0], sizes = [2, 32], strides = [1, 1]} : vector<4x32xf32> to vector<2x32xf32>
    %717 = vector.extract_strided_slice %481 {offsets = [0, 0], sizes = [2, 32], strides = [1, 1]} : vector<4x32xf32> to vector<2x32xf32>
    %718 = vector.extract_strided_slice %520 {offsets = [0, 0], sizes = [2, 32], strides = [1, 1]} : vector<4x32xf32> to vector<2x32xf32>
    %719 = vector.extract_strided_slice %559 {offsets = [0, 0], sizes = [2, 32], strides = [1, 1]} : vector<4x32xf32> to vector<2x32xf32>
    %720 = vector.extract_strided_slice %598 {offsets = [0, 0], sizes = [2, 32], strides = [1, 1]} : vector<4x32xf32> to vector<2x32xf32>
    %721 = vector.extract_strided_slice %637 {offsets = [0, 0], sizes = [2, 32], strides = [1, 1]} : vector<4x32xf32> to vector<2x32xf32>
    %722 = vector.extract_strided_slice %676 {offsets = [0, 0], sizes = [2, 32], strides = [1, 1]} : vector<4x32xf32> to vector<2x32xf32>
    %723 = vector.extract_strided_slice %715 {offsets = [0, 0], sizes = [2, 32], strides = [1, 1]} : vector<4x32xf32> to vector<2x32xf32>
    %724 = vector.shape_cast %716 : vector<2x32xf32> to vector<2x1x32xf32>
    %725 = vector.shape_cast %717 : vector<2x32xf32> to vector<2x1x32xf32>
    %726 = vector.shape_cast %718 : vector<2x32xf32> to vector<2x1x32xf32>
    %727 = vector.shape_cast %719 : vector<2x32xf32> to vector<2x1x32xf32>
    %728 = vector.shape_cast %720 : vector<2x32xf32> to vector<2x1x32xf32>
    %729 = vector.shape_cast %721 : vector<2x32xf32> to vector<2x1x32xf32>
    %730 = vector.shape_cast %722 : vector<2x32xf32> to vector<2x1x32xf32>
    %731 = vector.shape_cast %723 : vector<2x32xf32> to vector<2x1x32xf32>
    %732 = tpu.concatenate %724, %725, %726, %727, %728, %729, %730, %731 in 1 : vector<2x1x32xf32>, vector<2x1x32xf32>, vector<2x1x32xf32>, vector<2x1x32xf32>, vector<2x1x32xf32>, vector<2x1x32xf32>, vector<2x1x32xf32>, vector<2x1x32xf32> -> vector<2x8x32xf32>
    %733 = vector.extract_strided_slice %715 {offsets = [2, 0], sizes = [2, 32], strides = [1, 1]} : vector<4x32xf32> to vector<2x32xf32>
    %734 = vector.extract_strided_slice %676 {offsets = [2, 0], sizes = [2, 32], strides = [1, 1]} : vector<4x32xf32> to vector<2x32xf32>
    %735 = vector.extract_strided_slice %637 {offsets = [2, 0], sizes = [2, 32], strides = [1, 1]} : vector<4x32xf32> to vector<2x32xf32>
    %736 = vector.extract_strided_slice %598 {offsets = [2, 0], sizes = [2, 32], strides = [1, 1]} : vector<4x32xf32> to vector<2x32xf32>
    %737 = vector.extract_strided_slice %559 {offsets = [2, 0], sizes = [2, 32], strides = [1, 1]} : vector<4x32xf32> to vector<2x32xf32>
    %738 = vector.extract_strided_slice %520 {offsets = [2, 0], sizes = [2, 32], strides = [1, 1]} : vector<4x32xf32> to vector<2x32xf32>
    %739 = vector.extract_strided_slice %481 {offsets = [2, 0], sizes = [2, 32], strides = [1, 1]} : vector<4x32xf32> to vector<2x32xf32>
    %740 = vector.extract_strided_slice %442 {offsets = [2, 0], sizes = [2, 32], strides = [1, 1]} : vector<4x32xf32> to vector<2x32xf32>
    %741 = vector.shape_cast %733 : vector<2x32xf32> to vector<2x1x32xf32>
    %742 = vector.shape_cast %734 : vector<2x32xf32> to vector<2x1x32xf32>
    %743 = vector.shape_cast %735 : vector<2x32xf32> to vector<2x1x32xf32>
    %744 = vector.shape_cast %736 : vector<2x32xf32> to vector<2x1x32xf32>
    %745 = vector.shape_cast %737 : vector<2x32xf32> to vector<2x1x32xf32>
    %746 = vector.shape_cast %738 : vector<2x32xf32> to vector<2x1x32xf32>
    %747 = vector.shape_cast %739 : vector<2x32xf32> to vector<2x1x32xf32>
    %748 = vector.shape_cast %740 : vector<2x32xf32> to vector<2x1x32xf32>
    %749 = tpu.concatenate %741, %742, %743, %744, %745, %746, %747, %748 in 1 : vector<2x1x32xf32>, vector<2x1x32xf32>, vector<2x1x32xf32>, vector<2x1x32xf32>, vector<2x1x32xf32>, vector<2x1x32xf32>, vector<2x1x32xf32>, vector<2x1x32xf32> -> vector<2x8x32xf32>
    %750 = tpu.concatenate %732, %749 in 2 : vector<2x8x32xf32>, vector<2x8x32xf32> -> vector<2x8x64xf32>
    %751 = vector.extract_strided_slice %715 {offsets = [0, 0], sizes = [2, 32], strides = [1, 1]} : vector<4x32xf32> to vector<2x32xf32>
    %752 = vector.extract_strided_slice %442 {offsets = [2, 0], sizes = [2, 32], strides = [1, 1]} : vector<4x32xf32> to vector<2x32xf32>
    %753 = tpu.concatenate %751, %752 in 1 : vector<2x32xf32>, vector<2x32xf32> -> vector<2x64xf32>
    %754 = vector.shape_cast %753 : vector<2x64xf32> to vector<2x1x64xf32>
    "tpu.trace_start"() <{level = 10 : i32, message = "bqd,bkd->bqk"}> : () -> ()
    %cst_122 = arith.constant dense<0.000000e+00> : vector<2x1x8xf32>
    %755 = tpu.matmul %754, %750, %cst_122 {dimension_numbers = #tpu.dot_dimension_numbers<[2], [2], [1], [1], [0, 0, 0, 1, 1, 1], [0], [0]>} : vector<2x1x64xf32>, vector<2x8x64xf32>, vector<2x1x8xf32> -> vector<2x1x8xf32>
    "tpu.trace_stop"() : () -> ()
    %756 = vector.shape_cast %755 : vector<2x1x8xf32> to vector<2x8xf32>
    %cst_123 = arith.constant dense<0xFF800000> : vector<2xf32>
    %757 = vector.multi_reduction <maximumf>, %756, %cst_123 [1] : vector<2x8xf32> to vector<2xf32>
    %758 = vector.shape_cast %757 : vector<2xf32> to vector<2x1xf32>
    %759 = vector.broadcast %758 : vector<2x1xf32> to vector<2x8xf32>
    %760 = arith.subf %756, %759 : vector<2x8xf32>
    %761 = math.exp %760 : vector<2x8xf32>
    %cst_124 = arith.constant dense<0.000000e+00> : vector<2xf32>
    %762 = vector.multi_reduction <add>, %761, %cst_124 [1] : vector<2x8xf32> to vector<2xf32>
    %763 = vector.shape_cast %762 : vector<2xf32> to vector<2x1xf32>
    %764 = tpu.reciprocal %763 {approx = true} : vector<2x1xf32> -> vector<2x1xf32>
    %765 = vector.broadcast %764 : vector<2x1xf32> to vector<2x8xf32>
    %766 = arith.mulf %761, %765 : vector<2x8xf32>
    %767 = vector.shape_cast %766 : vector<2x8xf32> to vector<2x1x8xf32>
    "tpu.trace_start"() <{level = 10 : i32, message = "bqk,bkd->bqd"}> : () -> ()
    %cst_125 = arith.constant dense<0.000000e+00> : vector<2x1x64xf32>
    %768 = tpu.matmul %767, %750, %cst_125 {dimension_numbers = #tpu.dot_dimension_numbers<[2], [1], [1], [2], [0, 0, 0, 1, 1, 2], [0], [0]>} : vector<2x1x8xf32>, vector<2x8x64xf32>, vector<2x1x64xf32> -> vector<2x1x64xf32>
    "tpu.trace_stop"() : () -> ()
    %769 = vector.shape_cast %768 : vector<2x1x64xf32> to vector<2x64xf32>
    %cst_126 = arith.constant 0.000000e+00 : f32
    %770 = vector.broadcast %cst_126 : f32 to vector<2x64xf32>
    %771 = tpu.concatenate %769, %770 in 1 : vector<2x64xf32>, vector<2x64xf32> -> vector<2x128xf32>
    %c0_127 = arith.constant 0 : index
    %c0_128 = arith.constant 0 : index
    %772 = vector.load %arg17[%c0_127, %c0_128] : memref<2x128xf32, #tpu.memory_space<vmem>>, vector<2x128xf32>
    tpu.vector_store %arg17[%c0_127, %c0_128], %771 {strides = array<i32>} : memref<2x128xf32, #tpu.memory_space<vmem>>, vector<2x128xf32>,
    return
  }
}

</mosaic_0001>

<bundles_post_ra>
// kernel: tpu_custom_call.1
= control target key start
LH: loop header
LB: loop body
LE: loop exit
PB: predicated region body
PF: predicated region fallthrough
CT: control target
= control target key end

     0   :  { %s9838_s0 = inlined_call_operand.vmem [shape: f32[8,2,32], index: 0, kind: input, shape index: {}]   ;;  %s9839_s1 = inlined_call_operand.vmem [shape: f32[32,96], index: 1, kind: input, shape index: {}]   ;;  %s9840_s2 = inlined_call_operand.vmem [shape: f32[32,96], index: 2, kind: input, shape index: {}]   ;;  %s9841_s3 = inlined_call_operand.vmem [shape: f32[1,96], index: 3, kind: input, shape index: {}]   ;;  %s9842_s4 = inlined_call_operand.vmem [shape: f32[1,96], index: 4, kind: input, shape index: {}]   ;;  %s9843_s5 = inlined_call_operand.vmem [shape: f32[4,32], index: 5, kind: input, shape index: {}]   ;;  %s9844_s6 = inlined_call_operand.vmem [shape: f32[64,32], index: 6, kind: input, shape index: {}]   ;;  %s9845_s7 = inlined_call_operand.vmem [shape: f32[64,32], index: 7, kind: input, shape index: {}]   ;;  %s9846_s8 = inlined_call_operand.vmem [shape: f32[64,32], index: 8, kind: input, shape index: {}]   ;;  %s9847_s9 = inlined_call_operand.vmem [shape: f32[64,96], index: 9, kind: input, shape index: {}]   ;;  %s9848_s10 = inlined_call_operand.vmem [shape: f32[64,96], index: 10, kind: input, shape index: {}]   ;;  %s9849_s11 = inlined_call_operand.vmem [shape: f32[1,96], index: 11, kind: input, shape index: {}]   ;;  %s9850_s12 = inlined_call_operand.vmem [shape: f32[1,96], index: 12, kind: input, shape index: {}]   ;;  %s9851_s13 = inlined_call_operand.vmem [shape: f32[4,32], index: 13, kind: input, shape index: {}]   ;;  %s9852_s14 = inlined_call_operand.vmem [shape: f32[64,32], index: 14, kind: input, shape index: {}]   ;;  %s9853_s15 = inlined_call_operand.vmem [shape: f32[64,32], index: 15, kind: input, shape index: {}]   ;;  %s9854_s16 = inlined_call_operand.vmem [shape: f32[64,32], index: 16, kind: input, shape index: {}]   ;;  %s9855_s17 = inlined_call_operand.hbm [shape: f32[2,128], index: 17, kind: output, shape index: {}]  }
   0x1   :  { %9858 = sst [smem:[#allocation5_spill]] %s9838_s0 }
   0x2   :  { %9859 = sst [smem:[#allocation6_spill]] %s9839_s1 }
   0x3   :  { %s9860_s26 = sld [smem:[#allocation6_spill]]  ;;  %v255_v1 = vld [vmem:[%s9840_s2 + $0x18] sm:$0xff]  ;;  %v65_v3 = vlaneseq  ;;  %v254_v4 = vld [vmem:[%s9840_s2 + $0x10] sm:$0xff]  ;;  %v253_v6 = vld [vmem:[%s9840_s2 + $0x8] sm:$0xff]  ;;  %v7628_v7 = vmov 1983009808  }
   0x4   :  { %6400 = vmatprep.subr.mxu1 %v255_v1  ;;  %v97_v8 = vunpack.c.l.s4 %v7628_v7  ;;  %v252_v10 = vld [vmem:[%s9840_s2] sm:$0xff]  ;;  %s9861_s29 = sld [smem:[#allocation5_spill]]  ;;  %vm128_vm0 = vcmask 261120   ;;  %v7629_v31 = vmov 0.0   ;;  %v7790_v33 = vld [vmem:[%s9844_s6 + $0x38] sm:$0xff]  ;;  %v7804_v35 = vld [vmem:[%s9844_s6 + $0x30] sm:$0xff] }
   0x5   :  { %6401 = vmatpush3.msra.mxu1 %v255_v1  ;;  %v7755_v12 = vshrl.u32 %v65_v3, 7  ;;  %v7797_v34 = vld [vmem:[%s9845_s7 + $0x38] sm:$0xff]  ;;  %vm7630_vm1 = vmmov 0   ;;  %v7812_v36 = vld [vmem:[%s9845_s7 + $0x30] sm:$0xff] }
   0x6   :  { %6402 = vmatprep.subr.mxu1 %v254_v4  ;;  %v98_v16 = vunpack.c.0.s8 %v97_v8 }
   0x7   :  { %6403 = vmatpush3.msra.mxu1 %v254_v4 }
   0x8   :  { %6404 = vmatprep.subr.mxu1 %v253_v6  ;;  %v7776_v22 = vsub.s32 %v98_v16, %v7755_v12 }
   0x9   :  { %v78_v0 = vld [vmem:[%s9860_s26 + $0x18] sm:$0xff]  ;;  %v77_v2 = vld [vmem:[%s9860_s26 + $0x10] sm:$0xff]  ;;  %v76_v5 = vld [vmem:[%s9860_s26 + $0x8] sm:$0xff]  ;;  %6405 = vmatpush3.msra.mxu1 %v253_v6 }
   0xa   :  { %6389 = vmatprep.subr.mxu0 %v78_v0  ;;  %v75_v9 = vld [vmem:[%s9860_s26] sm:$0xff]  ;;  %v61_v19 = vld [vmem:[%s9861_s29 + $0x8] sm:$0x3]  ;;  %v62_v20 = vld [vmem:[%s9861_s29 + $0xa] sm:$0x3]  ;;  %6406 = vmatprep.subr.mxu1 %v252_v10 }
   0xb   :  { %6390 = vmatpush3.msra.mxu0 %v78_v0  ;;  %v57_v11 = vld [vmem:[%s9861_s29] sm:$0x3]  ;;  %v58_v13 = vld [vmem:[%s9861_s29 + $0x2] sm:$0x3]  ;;  %v59_v14 = vld [vmem:[%s9861_s29 + $0x4] sm:$0x3]  ;;  %v111_v24 = vcombine.low %v61_v19, %v62_v20  ;;  %6407 = vmatpush3.msra.mxu1 %v252_v10 }
   0xc   :  { %6391 = vmatprep.subr.mxu0 %v77_v2  ;;  %v60_v15 = vld [vmem:[%s9861_s29 + $0x6] sm:$0x3]  ;;  %v94_v17 = vcombine.low %v57_v11, %v58_v13  ;;  %v63_v21 = vld [vmem:[%s9861_s29 + $0xc] sm:$0x3]  ;;  %v64_v23 = vld [vmem:[%s9861_s29 + $0xe] sm:$0x3]  ;;  %6430 = vmatprep.subr.mxu1 %v7629_v31 }
   0xd   :  { %6392 = vmatpush3.msra.mxu0 %v77_v2  ;;  %v95_v18 = vcombine.low %v59_v14, %v60_v15  ;;  %v112_v25 = vcombine.low %v63_v21, %v64_v23  ;;  %v119_v28 = vrot.slane %v111_v24, %v7776_v22 }
   0xe   :  { %6393 = vmatprep.subr.mxu0 %v76_v5  ;;  %v102_v26 = vrot.slane %v94_v17, %v7776_v22 }
   0xf   :  { %6394 = vmatpush3.msra.mxu0 %v76_v5  ;;  %v109_v27 = vrot.slane %v95_v18, %v7776_v22  ;;  %v126_v29 = vrot.slane %v112_v25, %v7776_v22 }
  0x10   :  { %6395 = vmatprep.subr.mxu0 %v75_v9 }
  0x11   :  { %6396 = vmatpush3.msra.mxu0 %v75_v9  ;;  %v110_v30 = vcombine.low %v102_v26, %v109_v27  ;;  %v127_v32 = vcombine.low %v119_v28, %v126_v29 }
  0x12   :  { %6411 = vmatprep.subr.mxu0 %v7629_v31 }
  0x13   :  { %6397 = vmatprep.mubr.msk.f32.mxu0 %vm128_vm0, %v110_v30  ;;  %6408 = vmatprep.mubr.msk.f32.mxu1 %vm128_vm0, %v110_v30 }
  0x14   :  { %6398 = vmatmul.mubr.msk.f32.vlgmr.msra.gmra.mxu0 %vm128_vm0, %v127_v32  ;;  %6409 = vmatmul.mubr.msk.f32.vlgmr.msra.gmra.mxu1 %vm128_vm0, %v127_v32 }
  0x15   :  { %6412 = vmatpush3.msra.mxu0 %v7790_v33  ;;  %6427 = vmatprep.mubr.msk.f32.mxu0 %vm7630_vm1, %v7629_v31 }
  0x16   :  { %22 = vsyncpa [#allocation3], 0  ;;  %6413 = vmatprep.subr.mxu0 %v7629_v31  ;;  %v7818_v37 = vld [vmem:[%s9844_s6 + $0x28] sm:$0xff]  ;;  %6431 = vmatpush3.msra.mxu1 %v7797_v34  ;;  %v7832_v39 = vld [vmem:[%s9844_s6 + $0x20] sm:$0xff]  ;;  %vm408_vm2 = vcmask 1041408   ;;  %s7631_s18 = smov 64  }
  0x17   :  { %6414 = vmatpush3.msra.mxu0 %v7804_v35  ;;  %6432 = vmatprep.subr.mxu1 %v7629_v31  ;;  %v7826_v38 = vld [vmem:[%s9845_s7 + $0x28] sm:$0xff]  ;;  %v7840_v40 = vld [vmem:[%s9845_s7 + $0x20] sm:$0xff]  ;;  %v7846_v41 = vld [vmem:[%s9844_s6 + $0x18] sm:$0xff]  ;;  %s7632_s19 = smov 32   ;;  %s7633_s26 = smov 96   ;;  %vm69_vm3 = vcmp.lt.s32.totalorder %v7755_v12, 2 }
  0x18   :  { %6415 = vmatprep.subr.mxu0 %v7629_v31  ;;  %6433 = vmatpush3.msra.mxu1 %v7812_v36  ;;  %v7854_v42 = vld [vmem:[%s9845_s7 + $0x18] sm:$0xff]  ;;  %v7860_v43 = vld [vmem:[%s9844_s6 + $0x10] sm:$0xff]  ;;  %v7874_v45 = vld [vmem:[%s9844_s6 + $0x8] sm:$0xff]  ;;  %vm7634_vm6 = vmmov 1   ;;  %vm410_vm8 = vcmask 523264   ;;  %vm5292_vm9 = vcmask 1040384  }
  0x19   :  { %6416 = vmatpush3.msra.mxu0 %v7818_v37  ;;  %6434 = vmatprep.subr.mxu1 %v7629_v31  ;;  %v7868_v44 = vld [vmem:[%s9845_s7 + $0x10] sm:$0xff]  ;;  %v7882_v46 = vld [vmem:[%s9845_s7 + $0x8] sm:$0xff]  ;;  %v7888_v47 = vld [vmem:[%s9844_s6] sm:$0xff]  ;;  %vm5297_vm10 = vcmask 1042432   ;;  %vm5300_vm11 = vcmask 1043456   ;;  %vm5303_vm12 = vcmask 1044480  }
  0x1a   :  { %6417 = vmatprep.subr.mxu0 %v7629_v31  ;;  %6435 = vmatpush3.msra.mxu1 %v7826_v38  ;;  %v7897_v48 = vld [vmem:[%s9846_s8 + $0x38] sm:$0xff]  ;;  %v7905_v49 = vld [vmem:[%s9845_s7] sm:$0xff]  ;;  %v7912_v50 = vld [vmem:[%s9846_s8 + $0x30] sm:$0xff]  ;;  %vm5306_vm13 = vcmask 1045504   ;;  %vm5309_vm14 = vcmask 1046528   ;;  %vm5616_vm15 = vcmask 1041409  }
  0x1b   :  { %6418 = vmatpush3.msra.mxu0 %v7832_v39  ;;  %6436 = vmatprep.subr.mxu1 %v7629_v31  ;;  %v7921_v51 = vld [vmem:[%s9846_s8 + $0x28] sm:$0xff]  ;;  %v7931_v52 = vld [vmem:[%s9846_s8 + $0x20] sm:$0xff]  ;;  %v7940_v53 = vld [vmem:[%s9846_s8 + $0x18] sm:$0xff] }
  0x1c   :  { %6419 = vmatprep.subr.mxu0 %v7629_v31  ;;  %6437 = vmatpush3.msra.mxu1 %v7840_v40  ;;  %v7949_v54 = vld [vmem:[%s9846_s8 + $0x10] sm:$0xff]  ;;  %v7958_v55 = vld [vmem:[%s9846_s8 + $0x8] sm:$0xff]  ;;  %v7967_v56 = vld [vmem:[%s9846_s8] sm:$0xff] }
  0x1d   :  { %6420 = vmatpush3.msra.mxu0 %v7846_v41  ;;  %6438 = vmatprep.subr.mxu1 %v7629_v31  ;;  %v5817_v57 = vld [vmem:[%s9841_s3] ss:$0 sm:$0xff] }
  0x1e   :  { %6421 = vmatprep.subr.mxu0 %v7629_v31  ;;  %6439 = vmatpush3.msra.mxu1 %v7854_v42  ;;  %v5820_v58 = vld [vmem:[%s9842_s4] ss:$0 sm:$0xff] }
  0x1f   :  { %6422 = vmatpush3.msra.mxu0 %v7860_v43  ;;  %6440 = vmatprep.subr.mxu1 %v7629_v31 }
  0x20   :  { %6423 = vmatprep.subr.mxu0 %v7629_v31  ;;  %6441 = vmatpush3.msra.mxu1 %v7868_v44 }
  0x21   :  { %6424 = vmatpush3.msra.mxu0 %v7874_v45  ;;  %6442 = vmatprep.subr.mxu1 %v7629_v31 }
  0x22   :  { %6425 = vmatprep.subr.mxu0 %v7629_v31  ;;  %6443 = vmatpush3.msra.mxu1 %v7882_v46 }
  0x23   :  { %6426 = vmatpush3.msra.mxu0 %v7888_v47  ;;  %6444 = vmatprep.subr.mxu1 %v7629_v31 }
  0x24   :  { %6428 = vmatmul.mubr.f32.vlgmr.msra.gmra.mxu0 %v7629_v31  ;;  %6449 = vmatprep.subr.mxu0 %v7629_v31 }
  0x25   :  { %6450 = vmatpush3.msra.mxu0 %v7897_v48  ;;  %6465 = vmatprep.mubr.msk.f32.mxu0 %vm7630_vm1, %v7629_v31 }
  0x26   :  { %6451 = vmatprep.subr.mxu0 %v7629_v31  ;;  %6445 = vmatpush3.msra.mxu1 %v7905_v49 }
  0x27   :  { %6452 = vmatpush3.msra.mxu0 %v7912_v50  ;;  %6446 = vmatprep.mubr.msk.f32.mxu1 %vm7630_vm1, %v7629_v31 }
  0x28   :  { %6453 = vmatprep.subr.mxu0 %v7629_v31  ;;  %6447 = vmatmul.mubr.f32.vlgmr.msra.gmra.mxu1 %v7629_v31 }
  0x29   :  { %6454 = vmatpush3.msra.mxu0 %v7921_v51  ;;  %6468 = vmatprep.subr.mxu1 %v7629_v31 }
  0x2a   :  { %6455 = vmatprep.subr.mxu0 %v7629_v31  ;;  %6469 = vmatpush3.msra.mxu1 %v7790_v33 }
  0x2b   :  { %6456 = vmatpush3.msra.mxu0 %v7931_v52  ;;  %6470 = vmatprep.subr.mxu1 %v7629_v31 }
  0x2c   :  { %6457 = vmatprep.subr.mxu0 %v7629_v31  ;;  %6471 = vmatpush3.msra.mxu1 %v7804_v35 }
  0x2d   :  { %6458 = vmatpush3.msra.mxu0 %v7940_v53  ;;  %6472 = vmatprep.subr.mxu1 %v7629_v31 }
  0x2e   :  { %6459 = vmatprep.subr.mxu0 %v7629_v31  ;;  %6473 = vmatpush3.msra.mxu1 %v7818_v37 }
  0x2f   :  { %6460 = vmatpush3.msra.mxu0 %v7949_v54  ;;  %6474 = vmatprep.subr.mxu1 %v7629_v31 }
  0x30   :  { %6461 = vmatprep.subr.mxu0 %v7629_v31  ;;  %6475 = vmatpush3.msra.mxu1 %v7832_v39 }
  0x31   :  { %6462 = vmatpush3.msra.mxu0 %v7958_v55  ;;  %6476 = vmatprep.subr.mxu1 %v7629_v31 }
  0x32   :  { %6463 = vmatprep.subr.mxu0 %v7629_v31  ;;  %6477 = vmatpush3.msra.mxu1 %v7846_v41 }
  0x33   :  { %6464 = vmatpush3.msra.mxu0 %v7967_v56  ;;  %6478 = vmatprep.subr.mxu1 %v7629_v31 }
  0x34   :  { %6466 = vmatmul.mubr.f32.vlgmr.msra.gmra.mxu0 %v7629_v31  ;;  %6487 = vmatprep.subr.mxu0 %v7629_v31 }
  0x35   :  { %6488 = vmatpush3.msra.mxu0 %v7797_v34  ;;  %6479 = vmatpush3.msra.mxu1 %v7860_v43 }
  0x36   :  { %6489 = vmatprep.subr.mxu0 %v7629_v31  ;;  %6480 = vmatprep.subr.mxu1 %v7629_v31 }
  0x37   :  { %6490 = vmatpush3.msra.mxu0 %v7812_v36  ;;  %6481 = vmatpush3.msra.mxu1 %v7874_v45 }
  0x38   :  { %6491 = vmatprep.subr.mxu0 %v7629_v31  ;;  %6482 = vmatprep.subr.mxu1 %v7629_v31 }
  0x39   :  { %6492 = vmatpush3.msra.mxu0 %v7826_v38  ;;  %6483 = vmatpush3.msra.mxu1 %v7888_v47 }
  0x3a   :  { %6493 = vmatprep.subr.mxu0 %v7629_v31  ;;  %6484 = vmatprep.mubr.msk.f32.mxu1 %vm7630_vm1, %v7629_v31 }
  0x3b   :  { %6494 = vmatpush3.msra.mxu0 %v7840_v40  ;;  %6503 = vmatprep.mubr.msk.f32.mxu0 %vm7630_vm1, %v7629_v31 }
  0x3c   :  { %6495 = vmatprep.subr.mxu0 %v7629_v31  ;;  %6506 = vmatprep.subr.mxu1 %v7629_v31 }
  0x3d   :  { %6496 = vmatpush3.msra.mxu0 %v7854_v42 }
  0x3e   :  { %6497 = vmatprep.subr.mxu0 %v7629_v31 }
  0x3f   :  { %6498 = vmatpush3.msra.mxu0 %v7868_v44 }
  0x40   :  { %6499 = vmatprep.subr.mxu0 %v7629_v31 }
  0x41   :  { %6500 = vmatpush3.msra.mxu0 %v7882_v46 }
  0x42   :  { %6501 = vmatprep.subr.mxu0 %v7629_v31 }
  0x43   :  { %6502 = vmatpush3.msra.mxu0 %v7905_v49 }
  0x44   :  { %6525 = vmatprep.subr.mxu0 %v7629_v31 }
  0xd4   :  { %v6399_v59 = vpop.f32.mrf.mxu0  ;;  %v6410_v60 = vpop.f32.mrf.mxu1 }
  0xd5   :  { %v205_v61 = vadd.f32 %v6399_v59, %v5817_v57  ;;  %v335_v62 = vadd.f32 %v6410_v60, %v5820_v58 }
  0xd6   :  { %v199_v63 = vpop.f32.mrf.mxu0  ;;  %v329_v0 = vpop.f32.mrf.mxu1 }
  0xd7   :  { %v227_v1 = vcombine.high %v205_v61, %v205_v61  ;;  %v357_v2 = vcombine.high %v335_v62, %v335_v62  ;;  %v364_v4 = vrot.slane %v335_v62, %v7776_v22  ;;  %v200_v5 = vadd.f32 %v5817_v57, %v199_v63 }
  0xd8   :  { %v330_v6 = vadd.f32 %v5820_v58, %v329_v0  ;;  %v234_v21 = vrot.slane %v205_v61, %v7776_v22 }
  0xd9   :  { %v371_v7 = vrot.slane %v357_v2, %v7776_v22  ;;  %v5831_v8 = vcombine.high %v364_v4, %v364_v4  ;;  %v1205_v9 = vcombine.low %v364_v4, %v364_v4  ;;  %v210_v10 = vcombine.high %v200_v5, %v200_v5 }
  0xda   :  { %v217_v11 = vrot.slane %v200_v5, %v7776_v22  ;;  %v340_v13 = vcombine.high %v330_v6, %v330_v6  ;;  %v241_v14 = vrot.slane %v227_v1, %v7776_v22  ;;  %v347_v20 = vrot.slane %v330_v6, %v7776_v22 }
  0xdb   :  { %v669_v15 = vcombine.low %v371_v7, %v371_v7  ;;  %v944_v16 = vrot.slane %v5831_v8, %v7776_v22  ;;  %v5823_v17 = vcombine.high %v371_v7, %v371_v7  ;;  %v1212_v18 = vrot.slane %v1205_v9, %v7776_v22 }
  0xdc   :  { %v224_v19 = vrot.slane %v210_v10, %v7776_v22  ;;  %v225_v23 = vcombine.high %v217_v11, %v217_v11  ;;  %v354_v24 = vrot.slane %v340_v13, %v7776_v22  ;;  %v5853_v27 = vcombine.high %v347_v20, %v347_v20 }
  0xdd   :  { %v676_v25 = vrot.slane %v669_v15, %v7776_v22  ;;  %v2277_v28 = vcombine.low %v347_v20, %v347_v20  ;;  %v243_v30 = vcombine.high %v241_v14, %v241_v14  ;;  %v406_v61 = vrot.slane %v5823_v17, %v7776_v22  ;;  %v8051_v20 = vld [vmem:[%s9843_s5] sm:$0xf] }
  0xde   :  { %v226_v26 = vcombine.high %v224_v19, %v224_v19  ;;  %v8022_v29 = vsel %vm408_vm2, %v224_v19, %v944_v16  ;;  %v5842_v32 = vcombine.high %v354_v24, %v354_v24  ;;  %v1741_v57 = vcombine.low %v354_v24, %v354_v24 }
  0xdf   :  { %v8025_v58 = vsel %vm408_vm2, %v225_v23, %v676_v25  ;;  %v2016_v59 = vrot.slane %v5853_v27, %v7776_v22  ;;  %v2284_v60 = vrot.slane %v2277_v28, %v7776_v22  ;;  %v242_v63 = vcombine.high %v234_v21, %v234_v21 }
  0xe0   :  { %v8031_v62 = vsel %vm408_vm2, %v226_v26, %v1212_v18  ;;  %v1480_v0 = vrot.slane %v5842_v32, %v7776_v22  ;;  %v1748_v1 = vrot.slane %v1741_v57, %v7776_v22  ;;  %v409_v7 = vsel %vm408_vm2, %v217_v11, %v406_v61 }
  0xe1   :  { %v8036_v2 = vsel %vm408_vm2, %v241_v14, %v2016_v59  ;;  %v8039_v4 = vsel %vm408_vm2, %v243_v30, %v2284_v60 }
  0xe2   :  { %v8042_v5 = vsel %vm408_vm2, %v234_v21, %v1480_v0  ;;  %v8045_v6 = vsel %vm408_vm2, %v242_v63, %v1748_v1 }
  0xe4   :  { %v480_v8 = vpop.f32.mrf.mxu0 }
  0xe5   :  { %v554_v9 = vadd.f32 %v480_v8, %v409_v7 }
  0xe6   :  { %v6429_v10 = vpop.f32.mrf.mxu0 }
  0xe7   :  { %v5824_v13 = vmul.f32 -1.442695, %v554_v9 }
  0xe8   :  { %v550_v15 = vpop.f32.mrf.mxu1 }
  0xe9   :  { %7390 = vpow2.f32 %v5824_v13 }
  0xea   :  { %v6448_v16 = vpop.f32.mrf.mxu1 }
  0xf4   :  { %v638_v14 = vpop.f32.mrf.mxu0 }
  0xf5   :  { %v639_v21 = vadd.f32 %v638_v14, %v8051_v20 }
  0xf6   :  { %v7391_v17 = vpop.eup %7390  ;;  %v6467_v18 = vpop.f32.mrf.mxu0 }
  0xf7   :  { %v558_v19 = vadd.f32 1.0, %v7391_v17 }
  0xf9   :  { %7392 = vrcp.f32 %v558_v19 }
 0x106   :  { %v7393_v11 = vpop.eup %7392 }
 0x107   :  { %v642_v23 = vmul.f32 %v7393_v11, %v639_v21 }
 0x109   :  { %644 = vrot.lane.b32.xlu0 %v642_v23, %s7631_s18 }
 0x10d   :  { %562 = vrot.lane.b32.xlu0 %v550_v15, %s7632_s19 }
 0x17b   :  { %v645_v24 = vpop.permute.xlu0 %644 }
 0x17c   :  { %v647_v25 = vadd.f32 %v645_v24, %v409_v7 }
 0x17e   :  { %7394 = vtanh.f32 %v647_v25 }
 0x17f   :  { %v563_v28 = vpop.permute.xlu0 %562 }
 0x180   :  { %v565_v30 = vadd.f32 %v563_v28, %v409_v7  ;;  %v68_v7 = vand.u32 127, %v65_v3 }
 0x182   :  { %v5825_v32 = vmul.f32 -1.442695, %v565_v30  ;;  %vm70_vm4 = vcmp.lt.s32.totalorder %v68_v7, 32 }
 0x183   :  { %vm71_vm5 = vmxor %vm69_vm3, %vm70_vm4 }
 0x184   :  { %7396 = vpow2.f32 %v5825_v32  ;;  %vm72_vm7 = vmxor %vm71_vm5, %vm7634_vm6 }
 0x185   :  { %v8067_v8 = vsel %vm72_vm7, 1.0, %v7629_v31 }
 0x18b   :  { %v7395_v26 = vpop.eup %7394 }
 0x18c   :  { %v649_v27 = vsub.f32 0.0, %v7395_v26 }
 0x18e   :  { %651 = vrot.lane.b32.xlu1 %v649_v27, %s7633_s26 }
 0x191   :  { %v7397_v57 = vpop.eup %7396 }
 0x192   :  { %v569_v59 = vadd.f32 1.0, %v7397_v57 }
 0x194   :  { %7398 = vrcp.f32 %v569_v59 }
 0x1a1   :  { %v7399_v60 = vpop.eup %7398 }
 0x200   :  { %v652_v61 = vpop.permute.xlu1 %651 }
 0x201   :  { %v654_v63 = vmul.f32 %v7399_v60, %v652_v61 }
 0x203   :  { %656 = vrot.lane.b32.xlu1 %v654_v63, %s7632_s19 }
 0x275   :  { %v657_v0 = vpop.permute.xlu1 %656 }
 0x276   :  { %v8058_v1 = vadd.f32 %v7395_v26, %v657_v0 }
 0x278   :  { %664 = vrot.lane.b32.xlu1 %v8058_v1, %s7633_s26  ;;  %661 = vrot.lane.b32.xlu0 %v8058_v1, %s7631_s18 }
 0x2ea   :  { %v665_v9 = vpop.permute.xlu1 %664  ;;  %v8069_v10 = vpop.permute.xlu0 %661 }
 0x2eb   :  { %v667_v13 = vsel %vm128_vm0, %v8069_v10, %v665_v9 }
 0x2ec   :  { %v668_v15 = vmul.f32 %v8067_v8, %v667_v13 }
 0x2ee   :  { %6485 = vmatmul.mubr.msk.f32.vlgmr.msra.gmra.mxu1 %vm410_vm8, %v668_v15  ;;  %6504 = vmatmul.mubr.msk.f32.vlgmr.msra.gmra.mxu0 %vm410_vm8, %v668_v15 }
 0x2ef   :  { %6507 = vmatpush3.msra.mxu1 %v7897_v48  ;;  %6522 = vmatprep.mubr.msk.f32.mxu1 %vm7630_vm1, %v7629_v31 }
 0x2f0   :  { %6508 = vmatprep.subr.mxu1 %v7629_v31  ;;  %6526 = vmatpush3.msra.mxu0 %v7790_v33 }
 0x2f1   :  { %6509 = vmatpush3.msra.mxu1 %v7912_v50  ;;  %6527 = vmatprep.subr.mxu0 %v7629_v31 }
 0x2f2   :  { %6510 = vmatprep.subr.mxu1 %v7629_v31  ;;  %6528 = vmatpush3.msra.mxu0 %v7804_v35 }
 0x2f3   :  { %6511 = vmatpush3.msra.mxu1 %v7921_v51  ;;  %6529 = vmatprep.subr.mxu0 %v7629_v31 }
 0x2f4   :  { %6512 = vmatprep.subr.mxu1 %v7629_v31  ;;  %6530 = vmatpush3.msra.mxu0 %v7818_v37 }
 0x2f5   :  { %6513 = vmatpush3.msra.mxu1 %v7931_v52  ;;  %6531 = vmatprep.subr.mxu0 %v7629_v31 }
 0x2f6   :  { %6514 = vmatprep.subr.mxu1 %v7629_v31  ;;  %6532 = vmatpush3.msra.mxu0 %v7832_v39 }
 0x2f7   :  { %6515 = vmatpush3.msra.mxu1 %v7940_v53  ;;  %6533 = vmatprep.subr.mxu0 %v7629_v31 }
 0x2f8   :  { %6516 = vmatprep.subr.mxu1 %v7629_v31  ;;  %6534 = vmatpush3.msra.mxu0 %v7846_v41 }
 0x2f9   :  { %6517 = vmatpush3.msra.mxu1 %v7949_v54  ;;  %6535 = vmatprep.subr.mxu0 %v7629_v31 }
 0x2fa   :  { %6518 = vmatprep.subr.mxu1 %v7629_v31  ;;  %6536 = vmatpush3.msra.mxu0 %v7860_v43 }
 0x2fb   :  { %6519 = vmatpush3.msra.mxu1 %v7958_v55  ;;  %6537 = vmatprep.subr.mxu0 %v7629_v31 }
 0x2fc   :  { %6520 = vmatprep.subr.mxu1 %v7629_v31  ;;  %6538 = vmatpush3.msra.mxu0 %v7874_v45 }
 0x2fd   :  { %6521 = vmatpush3.msra.mxu1 %v7967_v56  ;;  %6539 = vmatprep.subr.mxu0 %v7629_v31 }
 0x2fe   :  { %6523 = vmatmul.mubr.msk.f32.vlgmr.msra.gmra.mxu1 %vm410_vm8, %v668_v15  ;;  %6544 = vmatprep.subr.mxu1 %v7629_v31 }
 0x2ff   :  { %6545 = vmatpush3.msra.mxu1 %v7797_v34  ;;  %6540 = vmatpush3.msra.mxu0 %v7888_v47 }
 0x300   :  { %6546 = vmatprep.subr.mxu1 %v7629_v31  ;;  %6541 = vmatprep.mubr.msk.f32.mxu0 %vm7630_vm1, %v7629_v31 }
 0x301   :  { %6547 = vmatpush3.msra.mxu1 %v7812_v36  ;;  %6560 = vmatprep.mubr.msk.f32.mxu1 %vm7630_vm1, %v7629_v31 }
 0x302   :  { %6548 = vmatprep.subr.mxu1 %v7629_v31  ;;  %6563 = vmatprep.subr.mxu0 %v7629_v31 }
 0x303   :  { %6549 = vmatpush3.msra.mxu1 %v7826_v38 }
 0x304   :  { %6550 = vmatprep.subr.mxu1 %v7629_v31 }
 0x305   :  { %6551 = vmatpush3.msra.mxu1 %v7840_v40 }
 0x306   :  { %6552 = vmatprep.subr.mxu1 %v7629_v31 }
 0x307   :  { %6553 = vmatpush3.msra.mxu1 %v7854_v42 }
 0x308   :  { %6554 = vmatprep.subr.mxu1 %v7629_v31 }
 0x309   :  { %6555 = vmatpush3.msra.mxu1 %v7868_v44 }
 0x30a   :  { %6556 = vmatprep.subr.mxu1 %v7629_v31 }
 0x30b   :  { %6557 = vmatpush3.msra.mxu1 %v7882_v46 }
 0x30c   :  { %6558 = vmatprep.subr.mxu1 %v7629_v31 }
 0x30d   :  { %6559 = vmatpush3.msra.mxu1 %v7905_v49 }
 0x30e   :  { %6582 = vmatprep.subr.mxu1 %v7629_v31 }
 0x3ae   :  { %v748_v3 = vpop.f32.mrf.mxu1  ;;  %v818_v16 = vpop.f32.mrf.mxu0 }
 0x3af   :  { %v822_v14 = vadd.f32 %v748_v3, %v8025_v58  ;;  %830 = vrot.lane.b32.xlu1 %v818_v16, %s7632_s19 }
 0x3b0   :  { %v6486_v17 = vpop.f32.mrf.mxu1  ;;  %v6505_v18 = vpop.f32.mrf.mxu0 }
 0x3b1   :  { %v5828_v19 = vmul.f32 -1.442695, %v822_v14 }
 0x3b3   :  { %7400 = vpow2.f32 %v5828_v19 }
 0x3be   :  { %v906_v21 = vpop.f32.mrf.mxu1 }
 0x3bf   :  { %v907_v25 = vadd.f32 %v906_v21, %v8051_v20 }
 0x3c0   :  { %v7401_v11 = vpop.eup %7400  ;;  %v6524_v23 = vpop.f32.mrf.mxu1 }
 0x3c1   :  { %v826_v24 = vadd.f32 1.0, %v7401_v11 }
 0x3c3   :  { %7402 = vrcp.f32 %v826_v24 }
 0x3d0   :  { %v7403_v26 = vpop.eup %7402 }
 0x3d1   :  { %v910_v27 = vmul.f32 %v7403_v26, %v907_v25 }
 0x3d3   :  { %912 = vrot.lane.b32.xlu0 %v910_v27, %s7631_s18 }
 0x421   :  { %v831_v59 = vpop.permute.xlu1 %830 }
 0x422   :  { %v833_v60 = vadd.f32 %v831_v59, %v8025_v58 }
 0x424   :  { %v5829_v61 = vmul.f32 -1.442695, %v833_v60 }
 0x445   :  { %v913_v28 = vpop.permute.xlu0 %912 }
 0x446   :  { %v915_v30 = vadd.f32 %v913_v28, %v8025_v58 }
 0x448   :  { %7404 = vtanh.f32 %v915_v30 }
 0x449   :  { %7406 = vpow2.f32 %v5829_v61 }
 0x455   :  { %v7405_v32 = vpop.eup %7404 }
 0x456   :  { %v917_v57 = vsub.f32 %v8058_v1, %v7405_v32  ;;  %v7407_v63 = vpop.eup %7406 }
 0x457   :  { %v837_v0 = vadd.f32 1.0, %v7407_v63 }
 0x458   :  { %919 = vrot.lane.b32.xlu0 %v917_v57, %s7633_s26 }
 0x459   :  { %7408 = vrcp.f32 %v837_v0 }
 0x466   :  { %v7409_v7 = vpop.eup %7408 }
 0x4ca   :  { %v920_v9 = vpop.permute.xlu0 %919 }
 0x4cb   :  { %v922_v13 = vmul.f32 %v7409_v7, %v920_v9 }
 0x4cd   :  { %924 = vrot.lane.b32.xlu1 %v922_v13, %s7632_s19 }
 0x53f   :  { %v925_v15 = vpop.permute.xlu1 %924 }
 0x540   :  { %v8140_v3 = vadd.f32 %v7405_v32, %v925_v15 }
 0x542   :  { %932 = vrot.lane.b32.xlu1 %v8140_v3, %s7633_s26  ;;  %929 = vrot.lane.b32.xlu0 %v8140_v3, %s7631_s18 }
 0x5b4   :  { %v933_v58 = vpop.permute.xlu1 %932  ;;  %v8146_v16 = vpop.permute.xlu0 %929 }
 0x5b5   :  { %v935_v14 = vsel %vm128_vm0, %v8146_v16, %v933_v58 }
 0x5b6   :  { %v936_v17 = vmul.f32 %v8067_v8, %v935_v14 }
 0x5b8   :  { %6542 = vmatmul.mubr.msk.f32.vlgmr.msra.gmra.mxu0 %vm410_vm8, %v936_v17  ;;  %6561 = vmatmul.mubr.msk.f32.vlgmr.msra.gmra.mxu1 %vm410_vm8, %v936_v17 }
 0x5b9   :  { %6564 = vmatpush3.msra.mxu0 %v7897_v48  ;;  %6579 = vmatprep.mubr.msk.f32.mxu0 %vm7630_vm1, %v7629_v31 }
 0x5ba   :  { %6565 = vmatprep.subr.mxu0 %v7629_v31  ;;  %6583 = vmatpush3.msra.mxu1 %v7790_v33 }
 0x5bb   :  { %6566 = vmatpush3.msra.mxu0 %v7912_v50  ;;  %6584 = vmatprep.subr.mxu1 %v7629_v31 }
 0x5bc   :  { %6567 = vmatprep.subr.mxu0 %v7629_v31  ;;  %6585 = vmatpush3.msra.mxu1 %v7804_v35 }
 0x5bd   :  { %6568 = vmatpush3.msra.mxu0 %v7921_v51  ;;  %6586 = vmatprep.subr.mxu1 %v7629_v31 }
 0x5be   :  { %6569 = vmatprep.subr.mxu0 %v7629_v31  ;;  %6587 = vmatpush3.msra.mxu1 %v7818_v37 }
 0x5bf   :  { %6570 = vmatpush3.msra.mxu0 %v7931_v52  ;;  %6588 = vmatprep.subr.mxu1 %v7629_v31 }
 0x5c0   :  { %6571 = vmatprep.subr.mxu0 %v7629_v31  ;;  %6589 = vmatpush3.msra.mxu1 %v7832_v39 }
 0x5c1   :  { %6572 = vmatpush3.msra.mxu0 %v7940_v53  ;;  %6590 = vmatprep.subr.mxu1 %v7629_v31 }
 0x5c2   :  { %6573 = vmatprep.subr.mxu0 %v7629_v31  ;;  %6591 = vmatpush3.msra.mxu1 %v7846_v41 }
 0x5c3   :  { %6574 = vmatpush3.msra.mxu0 %v7949_v54  ;;  %6592 = vmatprep.subr.mxu1 %v7629_v31 }
 0x5c4   :  { %6575 = vmatprep.subr.mxu0 %v7629_v31  ;;  %6593 = vmatpush3.msra.mxu1 %v7860_v43 }
 0x5c5   :  { %6576 = vmatpush3.msra.mxu0 %v7958_v55  ;;  %6594 = vmatprep.subr.mxu1 %v7629_v31 }
 0x5c6   :  { %6577 = vmatprep.subr.mxu0 %v7629_v31  ;;  %6595 = vmatpush3.msra.mxu1 %v7874_v45 }
 0x5c7   :  { %6578 = vmatpush3.msra.mxu0 %v7967_v56  ;;  %6596 = vmatprep.subr.mxu1 %v7629_v31 }
 0x5c8   :  { %6580 = vmatmul.mubr.msk.f32.vlgmr.msra.gmra.mxu0 %vm410_vm8, %v936_v17  ;;  %6601 = vmatprep.subr.mxu0 %v7629_v31 }
 0x5c9   :  { %6602 = vmatpush3.msra.mxu0 %v7797_v34  ;;  %6597 = vmatpush3.msra.mxu1 %v7888_v47 }
 0x5ca   :  { %6603 = vmatprep.subr.mxu0 %v7629_v31  ;;  %6598 = vmatprep.mubr.msk.f32.mxu1 %vm7630_vm1, %v7629_v31 }
 0x5cb   :  { %6604 = vmatpush3.msra.mxu0 %v7812_v36  ;;  %6617 = vmatprep.mubr.msk.f32.mxu0 %vm7630_vm1, %v7629_v31 }
 0x5cc   :  { %6605 = vmatprep.subr.mxu0 %v7629_v31  ;;  %6620 = vmatprep.subr.mxu1 %v7629_v31 }
 0x5cd   :  { %6606 = vmatpush3.msra.mxu0 %v7826_v38 }
 0x5ce   :  { %6607 = vmatprep.subr.mxu0 %v7629_v31 }
 0x5cf   :  { %6608 = vmatpush3.msra.mxu0 %v7840_v40 }
 0x5d0   :  { %6609 = vmatprep.subr.mxu0 %v7629_v31 }
 0x5d1   :  { %6610 = vmatpush3.msra.mxu0 %v7854_v42 }
 0x5d2   :  { %6611 = vmatprep.subr.mxu0 %v7629_v31 }
 0x5d3   :  { %6612 = vmatpush3.msra.mxu0 %v7868_v44 }
 0x5d4   :  { %6613 = vmatprep.subr.mxu0 %v7629_v31 }
 0x5d5   :  { %6614 = vmatpush3.msra.mxu0 %v7882_v46 }
 0x5d6   :  { %6615 = vmatprep.subr.mxu0 %v7629_v31 }
 0x5d7   :  { %6616 = vmatpush3.msra.mxu0 %v7905_v49 }
 0x5d8   :  { %6639 = vmatprep.subr.mxu0 %v7629_v31 }
 0x678   :  { %v1016_v18 = vpop.f32.mrf.mxu0  ;;  %v1086_v19 = vpop.f32.mrf.mxu1 }
 0x679   :  { %v1090_v21 = vadd.f32 %v1016_v18, %v8022_v29  ;;  %1098 = vrot.lane.b32.xlu1 %v1086_v19, %s7632_s19 }
 0x67a   :  { %v6543_v11 = vpop.f32.mrf.mxu0  ;;  %v6562_v23 = vpop.f32.mrf.mxu1 }
 0x67b   :  { %v5834_v24 = vmul.f32 -1.442695, %v1090_v21 }
 0x67d   :  { %7410 = vpow2.f32 %v5834_v24 }
 0x688   :  { %v1174_v25 = vpop.f32.mrf.mxu0 }
 0x689   :  { %v1175_v30 = vadd.f32 %v1174_v25, %v8051_v20 }
 0x68a   :  { %v7411_v26 = vpop.eup %7410  ;;  %v6581_v27 = vpop.f32.mrf.mxu0 }
 0x68b   :  { %v1094_v28 = vadd.f32 1.0, %v7411_v26 }
 0x68d   :  { %7412 = vrcp.f32 %v1094_v28 }
 0x69a   :  { %v7413_v32 = vpop.eup %7412 }
 0x69b   :  { %v1178_v57 = vmul.f32 %v7413_v32, %v1175_v30 }
 0x69d   :  { %1180 = vrot.lane.b32.xlu0 %v1178_v57, %s7631_s18 }
 0x6eb   :  { %v1099_v0 = vpop.permute.xlu1 %1098 }
 0x6ec   :  { %v1101_v7 = vadd.f32 %v1099_v0, %v8022_v29 }
 0x6ee   :  { %v5835_v9 = vmul.f32 -1.442695, %v1101_v7 }
 0x70f   :  { %v1181_v59 = vpop.permute.xlu0 %1180 }
 0x710   :  { %v1183_v60 = vadd.f32 %v1181_v59, %v8022_v29 }
 0x712   :  { %7414 = vtanh.f32 %v1183_v60 }
 0x713   :  { %7416 = vpow2.f32 %v5835_v9 }
 0x71f   :  { %v7415_v61 = vpop.eup %7414 }
 0x720   :  { %v1185_v63 = vsub.f32 %v8140_v3, %v7415_v61  ;;  %v7417_v13 = vpop.eup %7416 }
 0x721   :  { %v1105_v15 = vadd.f32 1.0, %v7417_v13 }
 0x722   :  { %1187 = vrot.lane.b32.xlu0 %v1185_v63, %s7633_s26 }
 0x723   :  { %7418 = vrcp.f32 %v1105_v15 }
 0x730   :  { %v7419_v58 = vpop.eup %7418 }
 0x794   :  { %v1188_v14 = vpop.permute.xlu0 %1187 }
 0x795   :  { %v1190_v17 = vmul.f32 %v7419_v58, %v1188_v14 }
 0x797   :  { %1192 = vrot.lane.b32.xlu1 %v1190_v17, %s7632_s19 }
 0x809   :  { %v1193_v18 = vpop.permute.xlu1 %1192 }
 0x80a   :  { %v8217_v19 = vadd.f32 %v7415_v61, %v1193_v18 }
 0x80c   :  { %1200 = vrot.lane.b32.xlu1 %v8217_v19, %s7633_s26  ;;  %1197 = vrot.lane.b32.xlu0 %v8217_v19, %s7631_s18 }
 0x87e   :  { %v1201_v29 = vpop.permute.xlu1 %1200  ;;  %v8223_v21 = vpop.permute.xlu0 %1197 }
 0x87f   :  { %v1203_v11 = vsel %vm128_vm0, %v8223_v21, %v1201_v29  ;;  %v8314_v29 = vld [vmem:[%s9844_s6 + $0x38] sm:$0xff] }
 0x880   :  { %v1204_v23 = vmul.f32 %v8067_v8, %v1203_v11 }
 0x882   :  { %6599 = vmatmul.mubr.msk.f32.vlgmr.msra.gmra.mxu1 %vm410_vm8, %v1204_v23  ;;  %6618 = vmatmul.mubr.msk.f32.vlgmr.msra.gmra.mxu0 %vm410_vm8, %v1204_v23 }
 0x883   :  { %6621 = vmatpush3.msra.mxu1 %v7897_v48  ;;  %6636 = vmatprep.mubr.msk.f32.mxu1 %vm7630_vm1, %v7629_v31 }
 0x884   :  { %6622 = vmatprep.subr.mxu1 %v7629_v31  ;;  %6640 = vmatpush3.msra.mxu0 %v7790_v33 }
 0x885   :  { %6623 = vmatpush3.msra.mxu1 %v7912_v50  ;;  %6641 = vmatprep.subr.mxu0 %v7629_v31 }
 0x886   :  { %6624 = vmatprep.subr.mxu1 %v7629_v31  ;;  %6642 = vmatpush3.msra.mxu0 %v7804_v35 }
 0x887   :  { %6625 = vmatpush3.msra.mxu1 %v7921_v51  ;;  %6643 = vmatprep.subr.mxu0 %v7629_v31 }
 0x888   :  { %6626 = vmatprep.subr.mxu1 %v7629_v31  ;;  %6644 = vmatpush3.msra.mxu0 %v7818_v37 }
 0x889   :  { %6627 = vmatpush3.msra.mxu1 %v7931_v52  ;;  %6645 = vmatprep.subr.mxu0 %v7629_v31 }
 0x88a   :  { %6628 = vmatprep.subr.mxu1 %v7629_v31  ;;  %6646 = vmatpush3.msra.mxu0 %v7832_v39 }
 0x88b   :  { %6629 = vmatpush3.msra.mxu1 %v7940_v53  ;;  %6647 = vmatprep.subr.mxu0 %v7629_v31 }
 0x88c   :  { %6630 = vmatprep.subr.mxu1 %v7629_v31  ;;  %6648 = vmatpush3.msra.mxu0 %v7846_v41 }
 0x88d   :  { %6631 = vmatpush3.msra.mxu1 %v7949_v54  ;;  %6649 = vmatprep.subr.mxu0 %v7629_v31 }
 0x88e   :  { %6632 = vmatprep.subr.mxu1 %v7629_v31  ;;  %6650 = vmatpush3.msra.mxu0 %v7860_v43 }
 0x88f   :  { %6633 = vmatpush3.msra.mxu1 %v7958_v55  ;;  %6651 = vmatprep.subr.mxu0 %v7629_v31 }
 0x890   :  { %6634 = vmatprep.subr.mxu1 %v7629_v31  ;;  %6652 = vmatpush3.msra.mxu0 %v7874_v45 }
 0x891   :  { %6635 = vmatpush3.msra.mxu1 %v7967_v56  ;;  %6653 = vmatprep.subr.mxu0 %v7629_v31 }
 0x892   :  { %6637 = vmatmul.mubr.msk.f32.vlgmr.msra.gmra.mxu1 %vm410_vm8, %v1204_v23  ;;  %6658 = vmatprep.subr.mxu1 %v7629_v31 }
 0x893   :  { %6659 = vmatpush3.msra.mxu1 %v7797_v34  ;;  %6654 = vmatpush3.msra.mxu0 %v7888_v47 }
 0x894   :  { %6660 = vmatprep.subr.mxu1 %v7629_v31  ;;  %6655 = vmatprep.mubr.msk.f32.mxu0 %vm7630_vm1, %v7629_v31 }
 0x895   :  { %6661 = vmatpush3.msra.mxu1 %v7812_v36  ;;  %6674 = vmatprep.mubr.msk.f32.mxu1 %vm7630_vm1, %v7629_v31 }
 0x896   :  { %6662 = vmatprep.subr.mxu1 %v7629_v31  ;;  %6677 = vmatprep.subr.mxu0 %v7629_v31 }
 0x897   :  { %6663 = vmatpush3.msra.mxu1 %v7826_v38 }
 0x898   :  { %6664 = vmatprep.subr.mxu1 %v7629_v31 }
 0x899   :  { %6665 = vmatpush3.msra.mxu1 %v7840_v40 }
 0x89a   :  { %6666 = vmatprep.subr.mxu1 %v7629_v31 }
 0x89b   :  { %6667 = vmatpush3.msra.mxu1 %v7854_v42 }
 0x89c   :  { %6668 = vmatprep.subr.mxu1 %v7629_v31 }
 0x89d   :  { %6669 = vmatpush3.msra.mxu1 %v7868_v44 }
 0x89e   :  { %6670 = vmatprep.subr.mxu1 %v7629_v31 }
 0x89f   :  { %6671 = vmatpush3.msra.mxu1 %v7882_v46 }
 0x8a0   :  { %6672 = vmatprep.subr.mxu1 %v7629_v31 }
 0x8a1   :  { %6673 = vmatpush3.msra.mxu1 %v7905_v49 }
 0x8a2   :  { %6696 = vmatprep.subr.mxu1 %v7629_v31 }
 0x942   :  { %v1284_v33 = vpop.f32.mrf.mxu1  ;;  %v1354_v34 = vpop.f32.mrf.mxu0 }
 0x943   :  { %v1358_v35 = vadd.f32 %v1284_v33, %v8031_v62  ;;  %1366 = vrot.lane.b32.xlu1 %v1354_v34, %s7632_s19 }
 0x944   :  { %v6600_v36 = vpop.f32.mrf.mxu1  ;;  %v6619_v38 = vpop.f32.mrf.mxu0 }
 0x945   :  { %v5839_v40 = vmul.f32 -1.442695, %v1358_v35 }
 0x947   :  { %7420 = vpow2.f32 %v5839_v40 }
 0x952   :  { %v1442_v42 = vpop.f32.mrf.mxu1 }
 0x953   :  { %v1443_v25 = vadd.f32 %v1442_v42, %v8051_v20 }
 0x954   :  { %v7421_v44 = vpop.eup %7420  ;;  %v6638_v24 = vpop.f32.mrf.mxu1 }
 0x955   :  { %v1362_v46 = vadd.f32 1.0, %v7421_v44 }
 0x957   :  { %7422 = vrcp.f32 %v1362_v46 }
 0x964   :  { %v7423_v26 = vpop.eup %7422 }
 0x965   :  { %v1446_v27 = vmul.f32 %v7423_v26, %v1443_v25 }
 0x967   :  { %1448 = vrot.lane.b32.xlu0 %v1446_v27, %s7631_s18 }
 0x9b5   :  { %v1367_v59 = vpop.permute.xlu1 %1366 }
 0x9b6   :  { %v1369_v60 = vadd.f32 %v1367_v59, %v8031_v62 }
 0x9b8   :  { %v5840_v61 = vmul.f32 -1.442695, %v1369_v60 }
 0x9d9   :  { %v1449_v28 = vpop.permute.xlu0 %1448 }
 0x9da   :  { %v1451_v30 = vadd.f32 %v1449_v28, %v8031_v62 }
 0x9dc   :  { %7424 = vtanh.f32 %v1451_v30 }
 0x9dd   :  { %7426 = vpow2.f32 %v5840_v61 }
 0x9e9   :  { %v7425_v32 = vpop.eup %7424 }
 0x9ea   :  { %v1453_v57 = vsub.f32 %v8217_v19, %v7425_v32  ;;  %v7427_v63 = vpop.eup %7426 }
 0x9eb   :  { %v1373_v0 = vadd.f32 1.0, %v7427_v63 }
 0x9ec   :  { %1455 = vrot.lane.b32.xlu0 %v1453_v57, %s7633_s26 }
 0x9ed   :  { %7428 = vrcp.f32 %v1373_v0  ;;  %v8432_v0 = vld [vmem:[%s9846_s8 + $0x38] sm:$0xff] }
 0x9fa   :  { %v7429_v7 = vpop.eup %7428 }
 0xa5e   :  { %v1456_v9 = vpop.permute.xlu0 %1455 }
 0xa5f   :  { %v1458_v13 = vmul.f32 %v7429_v7, %v1456_v9  ;;  %v8442_v7 = vld [vmem:[%s9846_s8 + $0x30] sm:$0xff]  ;;  %v8451_v9 = vld [vmem:[%s9846_s8 + $0x28] sm:$0xff] }
 0xa61   :  { %1460 = vrot.lane.b32.xlu1 %v1458_v13, %s7632_s19  ;;  %v8459_v13 = vld [vmem:[%s9844_s6 + $0x28] sm:$0xff] }
 0xad3   :  { %v1461_v15 = vpop.permute.xlu1 %1460 }
 0xad4   :  { %v8294_v58 = vadd.f32 %v7425_v32, %v1461_v15  ;;  %v8465_v15 = vld [vmem:[%s9846_s8 + $0x20] sm:$0xff] }
 0xad6   :  { %1468 = vrot.lane.b32.xlu1 %v8294_v58, %s7633_s26  ;;  %1465 = vrot.lane.b32.xlu0 %v8294_v58, %s7631_s18 }
 0xb48   :  { %v1469_v62 = vpop.permute.xlu1 %1468  ;;  %v8300_v14 = vpop.permute.xlu0 %1465 }
 0xb49   :  { %v1471_v17 = vsel %vm128_vm0, %v8300_v14, %v1469_v62  ;;  %v8473_v62 = vld [vmem:[%s9844_s6 + $0x20] sm:$0xff] }
 0xb4a   :  { %v1472_v18 = vmul.f32 %v8067_v8, %v1471_v17  ;;  %v8479_v17 = vld [vmem:[%s9846_s8 + $0x18] sm:$0xff] }
 0xb4c   :  { %6656 = vmatmul.mubr.msk.f32.vlgmr.msra.gmra.mxu0 %vm410_vm8, %v1472_v18  ;;  %6675 = vmatmul.mubr.msk.f32.vlgmr.msra.gmra.mxu1 %vm410_vm8, %v1472_v18 }
 0xb4d   :  { %6678 = vmatpush3.msra.mxu0 %v7897_v48  ;;  %6693 = vmatprep.mubr.msk.f32.mxu0 %vm7630_vm1, %v7629_v31  ;;  %v8323_v48 = vld [vmem:[%s9844_s6 + $0x30] sm:$0xff] }
 0xb4e   :  { %6679 = vmatprep.subr.mxu0 %v7629_v31  ;;  %6697 = vmatpush3.msra.mxu1 %v8314_v29 }
 0xb4f   :  { %6680 = vmatpush3.msra.mxu0 %v7912_v50  ;;  %6698 = vmatprep.subr.mxu1 %v7629_v31  ;;  %v8401_v50 = vld [vmem:[%s9845_s7 + $0x8] sm:$0xff] }
 0xb50   :  { %6681 = vmatprep.subr.mxu0 %v7629_v31  ;;  %6699 = vmatpush3.msra.mxu1 %v8323_v48 }
 0xb51   :  { %6682 = vmatpush3.msra.mxu0 %v7921_v51  ;;  %6700 = vmatprep.subr.mxu1 %v7629_v31 }
 0xb52   :  { %6683 = vmatprep.subr.mxu0 %v7629_v31  ;;  %6701 = vmatpush3.msra.mxu1 %v7818_v37  ;;  %v8353_v37 = vld [vmem:[%s9845_s7 + $0x38] sm:$0xff] }
 0xb53   :  { %6684 = vmatpush3.msra.mxu0 %v7931_v52  ;;  %6702 = vmatprep.subr.mxu1 %v7629_v31 }
 0xb54   :  { %6685 = vmatprep.subr.mxu0 %v7629_v31  ;;  %6703 = vmatpush3.msra.mxu1 %v7832_v39  ;;  %v8363_v39 = vld [vmem:[%s9845_s7 + $0x30] sm:$0xff] }
 0xb55   :  { %6686 = vmatpush3.msra.mxu0 %v7940_v53  ;;  %6704 = vmatprep.subr.mxu1 %v7629_v31 }
 0xb56   :  { %6687 = vmatprep.subr.mxu0 %v7629_v31  ;;  %6705 = vmatpush3.msra.mxu1 %v7846_v41  ;;  %v8373_v41 = vld [vmem:[%s9845_s7 + $0x28] sm:$0xff] }
 0xb57   :  { %6688 = vmatpush3.msra.mxu0 %v7949_v54  ;;  %6706 = vmatprep.subr.mxu1 %v7629_v31 }
 0xb58   :  { %6689 = vmatprep.subr.mxu0 %v7629_v31  ;;  %6707 = vmatpush3.msra.mxu1 %v7860_v43  ;;  %v8380_v43 = vld [vmem:[%s9845_s7 + $0x20] sm:$0xff] }
 0xb59   :  { %6690 = vmatpush3.msra.mxu0 %v7958_v55  ;;  %6708 = vmatprep.subr.mxu1 %v7629_v31 }
 0xb5a   :  { %6691 = vmatprep.subr.mxu0 %v7629_v31  ;;  %6709 = vmatpush3.msra.mxu1 %v7874_v45  ;;  %v8387_v45 = vld [vmem:[%s9845_s7 + $0x18] sm:$0xff] }
 0xb5b   :  { %6692 = vmatpush3.msra.mxu0 %v7967_v56  ;;  %6710 = vmatprep.subr.mxu1 %v7629_v31 }
 0xb5c   :  { %6694 = vmatmul.mubr.msk.f32.vlgmr.msra.gmra.mxu0 %vm410_vm8, %v1472_v18  ;;  %6715 = vmatprep.subr.mxu0 %v7629_v31  ;;  %v8487_v18 = vld [vmem:[%s9844_s6 + $0x18] sm:$0xff] }
 0xb5d   :  { %6716 = vmatpush3.msra.mxu0 %v8353_v37  ;;  %6711 = vmatpush3.msra.mxu1 %v7888_v47  ;;  %v8394_v47 = vld [vmem:[%s9845_s7 + $0x10] sm:$0xff] }
 0xb5e   :  { %6717 = vmatprep.subr.mxu0 %v7629_v31  ;;  %6712 = vmatprep.mubr.msk.f32.mxu1 %vm7630_vm1, %v7629_v31 }
 0xb5f   :  { %6718 = vmatpush3.msra.mxu0 %v8363_v39  ;;  %6731 = vmatprep.mubr.msk.f32.mxu0 %vm7630_vm1, %v7629_v31 }
 0xb60   :  { %6719 = vmatprep.subr.mxu0 %v7629_v31  ;;  %6734 = vmatprep.subr.mxu1 %v7629_v31 }
 0xb61   :  { %6720 = vmatpush3.msra.mxu0 %v8373_v41 }
 0xb62   :  { %6721 = vmatprep.subr.mxu0 %v7629_v31 }
 0xb63   :  { %6722 = vmatpush3.msra.mxu0 %v8380_v43 }
 0xb64   :  { %6723 = vmatprep.subr.mxu0 %v7629_v31 }
 0xb65   :  { %6724 = vmatpush3.msra.mxu0 %v8387_v45 }
 0xb66   :  { %6725 = vmatprep.subr.mxu0 %v7629_v31 }
 0xb67   :  { %6726 = vmatpush3.msra.mxu0 %v8394_v47 }
 0xb68   :  { %6727 = vmatprep.subr.mxu0 %v7629_v31 }
 0xb69   :  { %6728 = vmatpush3.msra.mxu0 %v8401_v50 }
 0xb6a   :  { %6729 = vmatprep.subr.mxu0 %v7629_v31 }
 0xb6b   :  { %6730 = vmatpush3.msra.mxu0 %v7905_v49 }
 0xb6c   :  { %6753 = vmatprep.subr.mxu0 %v7629_v31 }
 0xc0c   :  { %v1552_v51 = vpop.f32.mrf.mxu0  ;;  %v1622_v52 = vpop.f32.mrf.mxu1 }
 0xc0d   :  { %v1626_v53 = vadd.f32 %v1552_v51, %v8042_v5  ;;  %1634 = vrot.lane.b32.xlu1 %v1622_v52, %s7632_s19  ;;  %v8493_v51 = vld [vmem:[%s9846_s8 + $0x10] sm:$0xff] }
 0xc0e   :  { %v6657_v54 = vpop.f32.mrf.mxu0  ;;  %v6676_v55 = vpop.f32.mrf.mxu1  ;;  %v8501_v52 = vld [vmem:[%s9844_s6 + $0x10] sm:$0xff] }
 0xc0f   :  { %v5845_v56 = vmul.f32 -1.442695, %v1626_v53  ;;  %v8507_v53 = vld [vmem:[%s9846_s8 + $0x8] sm:$0xff]  ;;  %v8521_v55 = vld [vmem:[%s9846_s8] sm:$0xff] }
 0xc10   :  { %v8515_v54 = vld [vmem:[%s9844_s6 + $0x8] sm:$0xff] }
 0xc11   :  { %7430 = vpow2.f32 %v5845_v56  ;;  %v8531_v56 = vld [vmem:[%s9844_s6] sm:$0xff] }
 0xc1c   :  { %v1710_v11 = vpop.f32.mrf.mxu0 }
 0xc1d   :  { %v1711_v35 = vadd.f32 %v1710_v11, %v8051_v20  ;;  %v8555_v11 = vld [vmem:[%s9845_s7] sm:$0xff] }
 0xc1e   :  { %v7431_v23 = vpop.eup %7430  ;;  %v6695_v33 = vpop.f32.mrf.mxu0 }
 0xc1f   :  { %v1630_v34 = vadd.f32 1.0, %v7431_v23 }
 0xc21   :  { %7432 = vrcp.f32 %v1630_v34 }
 0xc2e   :  { %v7433_v49 = vpop.eup %7432 }
 0xc2f   :  { %v1714_v36 = vmul.f32 %v7433_v49, %v1711_v35 }
 0xc31   :  { %1716 = vrot.lane.b32.xlu0 %v1714_v36, %s7631_s18 }
 0xc7f   :  { %v1635_v24 = vpop.permute.xlu1 %1634 }
 0xc80   :  { %v1637_v46 = vadd.f32 %v1635_v24, %v8042_v5 }
 0xc82   :  { %v5846_v25 = vmul.f32 -1.442695, %v1637_v46 }
 0xca3   :  { %v1717_v38 = vpop.permute.xlu0 %1716 }
 0xca4   :  { %v1719_v40 = vadd.f32 %v1717_v38, %v8042_v5 }
 0xca6   :  { %7434 = vtanh.f32 %v1719_v40 }
 0xca7   :  { %7436 = vpow2.f32 %v5846_v25 }
 0xcb3   :  { %v7435_v42 = vpop.eup %7434 }
 0xcb4   :  { %v1721_v44 = vsub.f32 %v8294_v58, %v7435_v42  ;;  %v7437_v26 = vpop.eup %7436 }
 0xcb5   :  { %v1641_v27 = vadd.f32 1.0, %v7437_v26 }
 0xcb6   :  { %1723 = vrot.lane.b32.xlu0 %v1721_v44, %s7633_s26 }
 0xcb7   :  { %7438 = vrcp.f32 %v1641_v27 }
 0xcc4   :  { %v7439_v28 = vpop.eup %7438 }
 0xd28   :  { %v1724_v30 = vpop.permute.xlu0 %1723 }
 0xd29   :  { %v1726_v32 = vmul.f32 %v7439_v28, %v1724_v30 }
 0xd2b   :  { %1728 = vrot.lane.b32.xlu1 %v1726_v32, %s7632_s19 }
 0xd9d   :  { %v1729_v57 = vpop.permute.xlu1 %1728 }
 0xd9e   :  { %v8416_v59 = vadd.f32 %v7435_v42, %v1729_v57 }
 0xda0   :  { %1736 = vrot.lane.b32.xlu1 %v8416_v59, %s7633_s26  ;;  %1733 = vrot.lane.b32.xlu0 %v8416_v59, %s7631_s18 }
 0xe12   :  { %v1737_v5 = vpop.permute.xlu1 %1736  ;;  %v8422_v60 = vpop.permute.xlu0 %1733 }
 0xe13   :  { %v1739_v61 = vsel %vm128_vm0, %v8422_v60, %v1737_v5 }
 0xe14   :  { %v1740_v63 = vmul.f32 %v8067_v8, %v1739_v61 }
 0xe16   :  { %6713 = vmatmul.mubr.msk.f32.vlgmr.msra.gmra.mxu1 %vm410_vm8, %v1740_v63  ;;  %6732 = vmatmul.mubr.msk.f32.vlgmr.msra.gmra.mxu0 %vm410_vm8, %v1740_v63 }
 0xe17   :  { %6735 = vmatpush3.msra.mxu1 %v8432_v0  ;;  %6750 = vmatprep.mubr.msk.f32.mxu1 %vm7630_vm1, %v7629_v31 }
 0xe18   :  { %6736 = vmatprep.subr.mxu1 %v7629_v31  ;;  %6754 = vmatpush3.msra.mxu0 %v8314_v29 }
 0xe19   :  { %6737 = vmatpush3.msra.mxu1 %v8442_v7  ;;  %6755 = vmatprep.subr.mxu0 %v7629_v31 }
 0xe1a   :  { %6738 = vmatprep.subr.mxu1 %v7629_v31  ;;  %6756 = vmatpush3.msra.mxu0 %v8323_v48 }
 0xe1b   :  { %6739 = vmatpush3.msra.mxu1 %v8451_v9  ;;  %6757 = vmatprep.subr.mxu0 %v7629_v31 }
 0xe1c   :  { %6740 = vmatprep.subr.mxu1 %v7629_v31  ;;  %6758 = vmatpush3.msra.mxu0 %v8459_v13 }
 0xe1d   :  { %6741 = vmatpush3.msra.mxu1 %v8465_v15  ;;  %6759 = vmatprep.subr.mxu0 %v7629_v31 }
 0xe1e   :  { %6742 = vmatprep.subr.mxu1 %v7629_v31  ;;  %6760 = vmatpush3.msra.mxu0 %v8473_v62 }
 0xe1f   :  { %6743 = vmatpush3.msra.mxu1 %v8479_v17  ;;  %6761 = vmatprep.subr.mxu0 %v7629_v31 }
 0xe20   :  { %6744 = vmatprep.subr.mxu1 %v7629_v31  ;;  %6762 = vmatpush3.msra.mxu0 %v8487_v18 }
 0xe21   :  { %6745 = vmatpush3.msra.mxu1 %v8493_v51  ;;  %6763 = vmatprep.subr.mxu0 %v7629_v31 }
 0xe22   :  { %6746 = vmatprep.subr.mxu1 %v7629_v31  ;;  %6764 = vmatpush3.msra.mxu0 %v8501_v52 }
 0xe23   :  { %6747 = vmatpush3.msra.mxu1 %v8507_v53  ;;  %6765 = vmatprep.subr.mxu0 %v7629_v31 }
 0xe24   :  { %6748 = vmatprep.subr.mxu1 %v7629_v31  ;;  %6766 = vmatpush3.msra.mxu0 %v8515_v54 }
 0xe25   :  { %6749 = vmatpush3.msra.mxu1 %v8521_v55  ;;  %6767 = vmatprep.subr.mxu0 %v7629_v31 }
 0xe26   :  { %6751 = vmatmul.mubr.msk.f32.vlgmr.msra.gmra.mxu1 %vm410_vm8, %v1740_v63  ;;  %6772 = vmatprep.subr.mxu1 %v7629_v31 }
 0xe27   :  { %6773 = vmatpush3.msra.mxu1 %v8353_v37  ;;  %6768 = vmatpush3.msra.mxu0 %v8531_v56 }
 0xe28   :  { %6774 = vmatprep.subr.mxu1 %v7629_v31  ;;  %6769 = vmatprep.mubr.msk.f32.mxu0 %vm7630_vm1, %v7629_v31 }
 0xe29   :  { %6775 = vmatpush3.msra.mxu1 %v8363_v39  ;;  %6788 = vmatprep.mubr.msk.f32.mxu1 %vm7630_vm1, %v7629_v31 }
 0xe2a   :  { %6776 = vmatprep.subr.mxu1 %v7629_v31  ;;  %6791 = vmatprep.subr.mxu0 %v7629_v31 }
 0xe2b   :  { %6777 = vmatpush3.msra.mxu1 %v8373_v41 }
 0xe2c   :  { %6778 = vmatprep.subr.mxu1 %v7629_v31 }
 0xe2d   :  { %6779 = vmatpush3.msra.mxu1 %v8380_v43 }
 0xe2e   :  { %6780 = vmatprep.subr.mxu1 %v7629_v31 }
 0xe2f   :  { %6781 = vmatpush3.msra.mxu1 %v8387_v45 }
 0xe30   :  { %6782 = vmatprep.subr.mxu1 %v7629_v31 }
 0xe31   :  { %6783 = vmatpush3.msra.mxu1 %v8394_v47 }
 0xe32   :  { %6784 = vmatprep.subr.mxu1 %v7629_v31 }
 0xe33   :  { %6785 = vmatpush3.msra.mxu1 %v8401_v50 }
 0xe34   :  { %6786 = vmatprep.subr.mxu1 %v7629_v31 }
 0xe35   :  { %6787 = vmatpush3.msra.mxu1 %v8555_v11 }
 0xe36   :  { %6810 = vmatprep.subr.mxu1 %v7629_v31 }
 0xed6   :  { %v1820_v23 = vpop.f32.mrf.mxu1  ;;  %v1890_v33 = vpop.f32.mrf.mxu0 }
 0xed7   :  { %v1894_v34 = vadd.f32 %v1820_v23, %v8045_v6  ;;  %1902 = vrot.lane.b32.xlu1 %v1890_v33, %s7632_s19 }
 0xed8   :  { %v6714_v35 = vpop.f32.mrf.mxu1  ;;  %v6733_v49 = vpop.f32.mrf.mxu0 }
 0xed9   :  { %v5850_v36 = vmul.f32 -1.442695, %v1894_v34 }
 0xedb   :  { %7440 = vpow2.f32 %v5850_v36 }
 0xee6   :  { %v1978_v38 = vpop.f32.mrf.mxu1 }
 0xee7   :  { %v1979_v24 = vadd.f32 %v1978_v38, %v8051_v20 }
 0xee8   :  { %v7441_v40 = vpop.eup %7440  ;;  %v6752_v42 = vpop.f32.mrf.mxu1 }
 0xee9   :  { %v1898_v44 = vadd.f32 1.0, %v7441_v40 }
 0xeeb   :  { %7442 = vrcp.f32 %v1898_v44 }
 0xef8   :  { %v7443_v46 = vpop.eup %7442 }
 0xef9   :  { %v1982_v25 = vmul.f32 %v7443_v46, %v1979_v24 }
 0xefb   :  { %1984 = vrot.lane.b32.xlu0 %v1982_v25, %s7631_s18 }
 0xf49   :  { %v1903_v32 = vpop.permute.xlu1 %1902 }
 0xf4a   :  { %v1905_v57 = vadd.f32 %v1903_v32, %v8045_v6 }
 0xf4c   :  { %v5851_v5 = vmul.f32 -1.442695, %v1905_v57 }
 0xf6d   :  { %v1985_v26 = vpop.permute.xlu0 %1984 }
 0xf6e   :  { %v1987_v27 = vadd.f32 %v1985_v26, %v8045_v6 }
 0xf70   :  { %7444 = vtanh.f32 %v1987_v27 }
 0xf71   :  { %7446 = vpow2.f32 %v5851_v5 }
 0xf7d   :  { %v7445_v28 = vpop.eup %7444 }
 0xf7e   :  { %v1989_v30 = vsub.f32 %v8416_v59, %v7445_v28  ;;  %v7447_v61 = vpop.eup %7446 }
 0xf7f   :  { %v1909_v20 = vadd.f32 1.0, %v7447_v61 }
 0xf80   :  { %1991 = vrot.lane.b32.xlu0 %v1989_v30, %s7633_s26 }
 0xf81   :  { %7448 = vrcp.f32 %v1909_v20 }
 0xf8e   :  { %v7449_v63 = vpop.eup %7448 }
 0xff2   :  { %v1992_v23 = vpop.permute.xlu0 %1991 }
 0xff3   :  { %v1994_v33 = vmul.f32 %v7449_v63, %v1992_v23 }
 0xff5   :  { %1996 = vrot.lane.b32.xlu1 %v1994_v33, %s7632_s19 }
0x1067   :  { %v1997_v34 = vpop.permute.xlu1 %1996 }
0x1068   :  { %v8568_v35 = vadd.f32 %v7445_v28, %v1997_v34 }
0x106a   :  { %2004 = vrot.lane.b32.xlu1 %v8568_v35, %s7633_s26  ;;  %2001 = vrot.lane.b32.xlu0 %v8568_v35, %s7631_s18 }
0x10dc   :  { %v2005_v6 = vpop.permute.xlu1 %2004  ;;  %v8574_v49 = vpop.permute.xlu0 %2001 }
0x10dd   :  { %v2007_v36 = vsel %vm128_vm0, %v8574_v49, %v2005_v6 }
0x10de   :  { %v2008_v38 = vmul.f32 %v8067_v8, %v2007_v36 }
0x10e0   :  { %6770 = vmatmul.mubr.msk.f32.vlgmr.msra.gmra.mxu0 %vm410_vm8, %v2008_v38  ;;  %6789 = vmatmul.mubr.msk.f32.vlgmr.msra.gmra.mxu1 %vm410_vm8, %v2008_v38 }
0x10e1   :  { %6792 = vmatpush3.msra.mxu0 %v8432_v0  ;;  %6807 = vmatprep.mubr.msk.f32.mxu0 %vm7630_vm1, %v7629_v31 }
0x10e2   :  { %6793 = vmatprep.subr.mxu0 %v7629_v31  ;;  %6811 = vmatpush3.msra.mxu1 %v8314_v29 }
0x10e3   :  { %6794 = vmatpush3.msra.mxu0 %v8442_v7  ;;  %6812 = vmatprep.subr.mxu1 %v7629_v31 }
0x10e4   :  { %6795 = vmatprep.subr.mxu0 %v7629_v31  ;;  %6813 = vmatpush3.msra.mxu1 %v8323_v48 }
0x10e5   :  { %6796 = vmatpush3.msra.mxu0 %v8451_v9  ;;  %6814 = vmatprep.subr.mxu1 %v7629_v31 }
0x10e6   :  { %6797 = vmatprep.subr.mxu0 %v7629_v31  ;;  %6815 = vmatpush3.msra.mxu1 %v8459_v13 }
0x10e7   :  { %6798 = vmatpush3.msra.mxu0 %v8465_v15  ;;  %6816 = vmatprep.subr.mxu1 %v7629_v31 }
0x10e8   :  { %6799 = vmatprep.subr.mxu0 %v7629_v31  ;;  %6817 = vmatpush3.msra.mxu1 %v8473_v62 }
0x10e9   :  { %6800 = vmatpush3.msra.mxu0 %v8479_v17  ;;  %6818 = vmatprep.subr.mxu1 %v7629_v31 }
0x10ea   :  { %6801 = vmatprep.subr.mxu0 %v7629_v31  ;;  %6819 = vmatpush3.msra.mxu1 %v8487_v18 }
0x10eb   :  { %6802 = vmatpush3.msra.mxu0 %v8493_v51  ;;  %6820 = vmatprep.subr.mxu1 %v7629_v31 }
0x10ec   :  { %6803 = vmatprep.subr.mxu0 %v7629_v31  ;;  %6821 = vmatpush3.msra.mxu1 %v8501_v52 }
0x10ed   :  { %6804 = vmatpush3.msra.mxu0 %v8507_v53  ;;  %6822 = vmatprep.subr.mxu1 %v7629_v31 }
0x10ee   :  { %6805 = vmatprep.subr.mxu0 %v7629_v31  ;;  %6823 = vmatpush3.msra.mxu1 %v8515_v54 }
0x10ef   :  { %6806 = vmatpush3.msra.mxu0 %v8521_v55  ;;  %6824 = vmatprep.subr.mxu1 %v7629_v31 }
0x10f0   :  { %6808 = vmatmul.mubr.msk.f32.vlgmr.msra.gmra.mxu0 %vm410_vm8, %v2008_v38  ;;  %6829 = vmatprep.subr.mxu0 %v7629_v31 }
0x10f1   :  { %6830 = vmatpush3.msra.mxu0 %v8353_v37  ;;  %6825 = vmatpush3.msra.mxu1 %v8531_v56 }
0x10f2   :  { %6831 = vmatprep.subr.mxu0 %v7629_v31  ;;  %6826 = vmatprep.mubr.msk.f32.mxu1 %vm7630_vm1, %v7629_v31 }
0x10f3   :  { %6832 = vmatpush3.msra.mxu0 %v8363_v39  ;;  %6845 = vmatprep.mubr.msk.f32.mxu0 %vm7630_vm1, %v7629_v31 }
0x10f4   :  { %6833 = vmatprep.subr.mxu0 %v7629_v31  ;;  %6848 = vmatprep.subr.mxu1 %v7629_v31 }
0x10f5   :  { %6834 = vmatpush3.msra.mxu0 %v8373_v41 }
0x10f6   :  { %6835 = vmatprep.subr.mxu0 %v7629_v31 }
0x10f7   :  { %6836 = vmatpush3.msra.mxu0 %v8380_v43 }
0x10f8   :  { %6837 = vmatprep.subr.mxu0 %v7629_v31 }
0x10f9   :  { %6838 = vmatpush3.msra.mxu0 %v8387_v45 }
0x10fa   :  { %6839 = vmatprep.subr.mxu0 %v7629_v31 }
0x10fb   :  { %6840 = vmatpush3.msra.mxu0 %v8394_v47 }
0x10fc   :  { %6841 = vmatprep.subr.mxu0 %v7629_v31 }
0x10fd   :  { %6842 = vmatpush3.msra.mxu0 %v8401_v50  ;;  %v7580_v50 = vld [vmem:[%s9843_s5] sm:$0xf] }
0x10fe   :  { %6843 = vmatprep.subr.mxu0 %v7629_v31 }
0x10ff   :  { %6844 = vmatpush3.msra.mxu0 %v8555_v11 }
0x11a0   :  { %v2088_v29 = vpop.f32.mrf.mxu0  ;;  %v2158_v48 = vpop.f32.mrf.mxu1 }
0x11a1   :  { %v2162_v37 = vadd.f32 %v2088_v29, %v8036_v2  ;;  %2170 = vrot.lane.b32.xlu1 %v2158_v48, %s7632_s19 }
0x11a2   :  { %v6771_v39 = vpop.f32.mrf.mxu0  ;;  %v6790_v41 = vpop.f32.mrf.mxu1 }
0x11a3   :  { %v5856_v43 = vmul.f32 -1.442695, %v2162_v37  ;;  %v2542_v37 = vrot.slane %v8568_v35, 2  ;;  %v2545_v39 = vrot.slane %v8217_v19, 2  ;;  %v2587_v19 = vld [vmem:[%s9847_s9 + $0x38] sm:$0xff] }
0x11a4   :  { %6867 = vmatprep.subr.mxu0 %v2587_v19 }
0x11a5   :  { %7450 = vpow2.f32 %v5856_v43 }
0x11b0   :  { %v2246_v45 = vpop.f32.mrf.mxu0 }
0x11b1   :  { %v2247_v18 = vadd.f32 %v7580_v50, %v2246_v45 }
0x11b2   :  { %v7451_v47 = vpop.eup %7450  ;;  %v6809_v13 = vpop.f32.mrf.mxu0 }
0x11b3   :  { %v2166_v62 = vadd.f32 1.0, %v7451_v47 }
0x11b5   :  { %7452 = vrcp.f32 %v2166_v62 }
0x11c2   :  { %v7453_v52 = vpop.eup %7452 }
0x11c3   :  { %v2250_v54 = vmul.f32 %v7453_v52, %v2247_v18  ;;  %v2543_v52 = vrot.slane %v8416_v59, 2  ;;  %v2585_v59 = vld [vmem:[%s9847_s9 + $0x28] sm:$0xff] }
0x11c5   :  { %2252 = vrot.lane.b32.xlu0 %v2250_v54, %s7631_s18  ;;  %v2544_v54 = vrot.slane %v8294_v58, 2  ;;  %v2584_v58 = vld [vmem:[%s9847_s9 + $0x20] sm:$0xff] }
0x1213   :  { %v2171_v44 = vpop.permute.xlu1 %2170 }
0x1214   :  { %v2173_v24 = vadd.f32 %v2171_v44, %v8036_v2  ;;  %v2583_v44 = vld [vmem:[%s9847_s9 + $0x18] sm:$0xff] }
0x1216   :  { %v5857_v46 = vmul.f32 -1.442695, %v2173_v24  ;;  %v2763_v24 = vld [vmem:[%s9848_s10 + $0x18] sm:$0xff] }
0x1237   :  { %v2253_v56 = vpop.permute.xlu0 %2252 }
0x1238   :  { %v2255_v11 = vadd.f32 %v2253_v56, %v8036_v2  ;;  %v2546_v56 = vrot.slane %v8140_v3, 2  ;;  %v2765_v3 = vld [vmem:[%s9848_s10 + $0x28] sm:$0xff] }
0x123a   :  { %7454 = vtanh.f32 %v2255_v11  ;;  %v2586_v11 = vld [vmem:[%s9847_s9 + $0x30] sm:$0xff] }
0x123b   :  { %7456 = vpow2.f32 %v5857_v46  ;;  %v2582_v46 = vld [vmem:[%s9847_s9 + $0x10] sm:$0xff] }
0x1247   :  { %v7455_v40 = vpop.eup %7454 }
0x1248   :  { %v2257_v42 = vsub.f32 %v8568_v35, %v7455_v40  ;;  %v7457_v25 = vpop.eup %7456 }
0x1249   :  { %v2177_v26 = vadd.f32 1.0, %v7457_v25  ;;  %v2762_v25 = vld [vmem:[%s9848_s10 + $0x10] sm:$0xff] }
0x124a   :  { %2259 = vrot.lane.b32.xlu0 %v2257_v42, %s7633_s26  ;;  %v2764_v42 = vld [vmem:[%s9848_s10 + $0x20] sm:$0xff] }
0x124b   :  { %7458 = vrcp.f32 %v2177_v26 }
0x1258   :  { %v7459_v27 = vpop.eup %7458 }
0x12bc   :  { %v2260_v28 = vpop.permute.xlu0 %2259 }
0x12bd   :  { %v2262_v30 = vmul.f32 %v7459_v27, %v2260_v28  ;;  %v2581_v28 = vld [vmem:[%s9847_s9 + $0x8] sm:$0xff] }
0x12bf   :  { %2264 = vrot.lane.b32.xlu1 %v2262_v30, %s7632_s19  ;;  %v2761_v30 = vld [vmem:[%s9848_s10 + $0x8] sm:$0xff] }
0x1331   :  { %v2265_v32 = vpop.permute.xlu1 %2264 }
0x1332   :  { %v8646_v57 = vadd.f32 %v7455_v40, %v2265_v32  ;;  %v2766_v40 = vld [vmem:[%s9848_s10 + $0x30] sm:$0xff]  ;;  %v2580_v32 = vld [vmem:[%s9847_s9] sm:$0xff] }
0x1334   :  { %2272 = vrot.lane.b32.xlu1 %v8646_v57, %s7633_s26  ;;  %2269 = vrot.lane.b32.xlu0 %v8646_v57, %s7631_s18  ;;  %v2541_v35 = vrot.slane %v8646_v57, 2 }
0x13a6   :  { %v2273_v2 = vpop.permute.xlu1 %2272  ;;  %v8652_v5 = vpop.permute.xlu0 %2269 }
0x13a7   :  { %v2275_v61 = vsel %vm128_vm0, %v8652_v5, %v2273_v2 }
0x13a8   :  { %v2276_v20 = vmul.f32 %v8067_v8, %v2275_v61  ;;  %v2547_v61 = vrot.slane %v8058_v1, 2 }
0x13aa   :  { %6827 = vmatmul.mubr.msk.f32.vlgmr.msra.gmra.mxu1 %vm410_vm8, %v2276_v20  ;;  %6846 = vmatmul.mubr.msk.f32.vlgmr.msra.gmra.mxu0 %vm410_vm8, %v2276_v20 }
0x13ab   :  { %6849 = vmatpush3.msra.mxu1 %v8432_v0  ;;  %6864 = vmatprep.mubr.msk.f32.mxu1 %vm7630_vm1, %v7629_v31 }
0x13ac   :  { %6850 = vmatprep.subr.mxu1 %v7629_v31  ;;  %6868 = vmatpush3.msra.mxu0 %v2587_v19  ;;  %v8843_v19 = vld [vmem:[%s9852_s14 + $0x10] sm:$0xff] }
0x13ad   :  { %6851 = vmatpush3.msra.mxu1 %v8442_v7  ;;  %6869 = vmatprep.subr.mxu0 %v2586_v11 }
0x13ae   :  { %6852 = vmatprep.subr.mxu1 %v7629_v31  ;;  %6870 = vmatpush3.msra.mxu0 %v2586_v11  ;;  %v8878_v11 = vld [vmem:[%s9853_s15] sm:$0xff] }
0x13af   :  { %6853 = vmatpush3.msra.mxu1 %v8451_v9  ;;  %6871 = vmatprep.subr.mxu0 %v2585_v59 }
0x13b0   :  { %6854 = vmatprep.subr.mxu1 %v7629_v31  ;;  %6872 = vmatpush3.msra.mxu0 %v2585_v59  ;;  %v8899_v59 = vld [vmem:[%s9854_s16 + $0x30] sm:$0xff] }
0x13b1   :  { %6855 = vmatpush3.msra.mxu1 %v8465_v15  ;;  %6873 = vmatprep.subr.mxu0 %v2584_v58 }
0x13b2   :  { %6856 = vmatprep.subr.mxu1 %v7629_v31  ;;  %6874 = vmatpush3.msra.mxu0 %v2584_v58  ;;  %v8918_v58 = vld [vmem:[%s9854_s16 + $0x20] sm:$0xff] }
0x13b3   :  { %6857 = vmatpush3.msra.mxu1 %v8479_v17  ;;  %6875 = vmatprep.subr.mxu0 %v2583_v44 }
0x13b4   :  { %6858 = vmatprep.subr.mxu1 %v7629_v31  ;;  %6876 = vmatpush3.msra.mxu0 %v2583_v44  ;;  %v8936_v44 = vld [vmem:[%s9854_s16 + $0x10] sm:$0xff] }
0x13b5   :  { %6859 = vmatpush3.msra.mxu1 %v8493_v51  ;;  %6877 = vmatprep.subr.mxu0 %v2582_v46 }
0x13b6   :  { %6860 = vmatprep.subr.mxu1 %v7629_v31  ;;  %6878 = vmatpush3.msra.mxu0 %v2582_v46  ;;  %v8954_v46 = vld [vmem:[%s9854_s16] sm:$0xff] }
0x13b7   :  { %6861 = vmatpush3.msra.mxu1 %v8507_v53  ;;  %6879 = vmatprep.subr.mxu0 %v2581_v28 }
0x13b8   :  { %6862 = vmatprep.subr.mxu1 %v7629_v31  ;;  %6880 = vmatpush3.msra.mxu0 %v2581_v28 }
0x13b9   :  { %6863 = vmatpush3.msra.mxu1 %v8521_v55  ;;  %6881 = vmatprep.subr.mxu0 %v2580_v32 }
0x13ba   :  { %6865 = vmatmul.mubr.msk.f32.vlgmr.msra.gmra.mxu1 %vm410_vm8, %v2276_v20  ;;  %6882 = vmatpush3.msra.mxu0 %v2580_v32 }
0x13bb   :  { %6905 = vmatprep.subr.mxu0 %v7629_v31 }
0x146a   :  { %v2356_v0 = vpop.f32.mrf.mxu1  ;;  %v2426_v7 = vpop.f32.mrf.mxu0 }
0x146b   :  { %v2430_v9 = vadd.f32 %v2356_v0, %v8039_v4  ;;  %2438 = vrot.lane.b32.xlu1 %v2426_v7, %s7632_s19 }
0x146c   :  { %v6828_v15 = vpop.f32.mrf.mxu1  ;;  %v6847_v17 = vpop.f32.mrf.mxu0 }
0x146d   :  { %v5861_v63 = vmul.f32 -1.442695, %v2430_v9 }
0x146f   :  { %7460 = vpow2.f32 %v5861_v63 }
0x147a   :  { %v2514_v51 = vpop.f32.mrf.mxu1 }
0x147b   :  { %v2515_v34 = vadd.f32 %v7580_v50, %v2514_v51 }
0x147c   :  { %v7461_v23 = vpop.eup %7460  ;;  %v6866_v33 = vpop.f32.mrf.mxu1 }
0x147d   :  { %v2434_v53 = vadd.f32 1.0, %v7461_v23 }
0x147f   :  { %7462 = vrcp.f32 %v2434_v53 }
0x148c   :  { %v7463_v6 = vpop.eup %7462 }
0x148d   :  { %v2518_v55 = vmul.f32 %v7463_v6, %v2515_v34 }
0x148f   :  { %2520 = vrot.lane.b32.xlu0 %v2518_v55, %s7631_s18 }
0x14dd   :  { %v2439_v41 = vpop.permute.xlu1 %2438 }
0x14de   :  { %v2441_v43 = vadd.f32 %v2439_v41, %v8039_v4  ;;  %v8775_v41 = vld [vmem:[%s9852_s14 + $0x38] sm:$0xff] }
0x14e0   :  { %v5862_v45 = vmul.f32 -1.442695, %v2441_v43  ;;  %v8787_v43 = vld [vmem:[%s9852_s14 + $0x30] sm:$0xff] }
0x1501   :  { %v2521_v36 = vpop.permute.xlu0 %2520 }
0x1502   :  { %v2523_v38 = vadd.f32 %v2521_v36, %v8039_v4  ;;  %v2767_v4 = vld [vmem:[%s9848_s10 + $0x38] sm:$0xff] }
0x1503   :  { %6886 = vmatprep.subr.mxu1 %v2767_v4 }
0x1504   :  { %7464 = vtanh.f32 %v2523_v38  ;;  %6887 = vmatpush3.msra.mxu1 %v2767_v4  ;;  %v8848_v4 = vld [vmem:[%s9853_s15 + $0x10] sm:$0xff] }
0x1505   :  { %7466 = vpow2.f32 %v5862_v45  ;;  %6888 = vmatprep.subr.mxu1 %v2766_v40  ;;  %v8792_v45 = vld [vmem:[%s9853_s15 + $0x30] sm:$0xff] }
0x1506   :  { %6889 = vmatpush3.msra.mxu1 %v2766_v40  ;;  %v8891_v40 = vld [vmem:[%s9854_s16 + $0x38] sm:$0xff] }
0x1507   :  { %6890 = vmatprep.subr.mxu1 %v2765_v3 }
0x1508   :  { %6891 = vmatpush3.msra.mxu1 %v2765_v3  ;;  %v8909_v3 = vld [vmem:[%s9854_s16 + $0x28] sm:$0xff] }
0x1509   :  { %6892 = vmatprep.subr.mxu1 %v2764_v42 }
0x150a   :  { %6893 = vmatpush3.msra.mxu1 %v2764_v42  ;;  %v8927_v42 = vld [vmem:[%s9854_s16 + $0x18] sm:$0xff] }
0x150b   :  { %6894 = vmatprep.subr.mxu1 %v2763_v24 }
0x150c   :  { %6895 = vmatpush3.msra.mxu1 %v2763_v24  ;;  %v8945_v24 = vld [vmem:[%s9854_s16 + $0x8] sm:$0xff] }
0x150d   :  { %6896 = vmatprep.subr.mxu1 %v2762_v25 }
0x150e   :  { %6897 = vmatpush3.msra.mxu1 %v2762_v25  ;;  %v5864_v25 = vld [vmem:[%s9849_s11] ss:$0 sm:$0xff] }
0x150f   :  { %6898 = vmatprep.subr.mxu1 %v2761_v30 }
0x1510   :  { %6899 = vmatpush3.msra.mxu1 %v2761_v30 }
0x1511   :  { %v7465_v29 = vpop.eup %7464 }
0x1512   :  { %v2525_v48 = vsub.f32 %v8646_v57, %v7465_v29  ;;  %v7467_v47 = vpop.eup %7466  ;;  %v2760_v57 = vld [vmem:[%s9848_s10] sm:$0xff] }
0x1513   :  { %v2445_v13 = vadd.f32 1.0, %v7467_v47  ;;  %6900 = vmatprep.subr.mxu1 %v2760_v57  ;;  %v8801_v47 = vld [vmem:[%s9852_s14 + $0x28] sm:$0xff] }
0x1514   :  { %2527 = vrot.lane.b32.xlu0 %v2525_v48, %s7633_s26  ;;  %6901 = vmatpush3.msra.mxu1 %v2760_v57 }
0x1515   :  { %7468 = vrcp.f32 %v2445_v13  ;;  %6924 = vmatprep.subr.mxu1 %v7629_v31  ;;  %v8806_v13 = vld [vmem:[%s9853_s15 + $0x28] sm:$0xff] }
0x1518   :  { %2552 = vrot.lane.b32.xlu0 %v2542_v37, %s7633_s26 }
0x151c   :  { %2558 = vrot.lane.b32.xlu0 %v2545_v39, %s7633_s26 }
0x1522   :  { %v7469_v62 = vpop.eup %7468 }
0x1586   :  { %v2528_v50 = vpop.permute.xlu0 %2527 }
0x1587   :  { %v2530_v18 = vmul.f32 %v7469_v62, %v2528_v50  ;;  %v8815_v62 = vld [vmem:[%s9852_s14 + $0x20] sm:$0xff] }
0x1588   :  { %v8820_v50 = vld [vmem:[%s9853_s15 + $0x20] sm:$0xff] }
0x1589   :  { %2532 = vrot.lane.b32.xlu1 %v2530_v18, %s7632_s19  ;;  %v8829_v18 = vld [vmem:[%s9852_s14 + $0x18] sm:$0xff] }
0x158a   :  { %v2553_v0 = vpop.permute.xlu0 %2552 }
0x158b   :  { %v2574_v51 = vsel %vm128_vm0, %v8223_v21, %v2553_v0 }
0x158d   :  { %2550 = vrot.lane.b32.xlu1 %v2541_v35, %s7633_s26  ;;  %v8834_v35 = vld [vmem:[%s9853_s15 + $0x18] sm:$0xff] }
0x158e   :  { %v2559_v9 = vpop.permute.xlu0 %2558 }
0x158f   :  { %v2577_v36 = vsel %vm128_vm0, %v8574_v49, %v2559_v9 }
0x1591   :  { %2554 = vrot.lane.b32.xlu1 %v2543_v52, %s7633_s26  ;;  %v8857_v52 = vld [vmem:[%s9852_s14 + $0x8] sm:$0xff] }
0x1595   :  { %2556 = vrot.lane.b32.xlu1 %v2544_v54, %s7633_s26  ;;  %v8862_v54 = vld [vmem:[%s9853_s15 + $0x8] sm:$0xff] }
0x1599   :  { %2560 = vrot.lane.b32.xlu1 %v2546_v56, %s7633_s26  ;;  %v8871_v56 = vld [vmem:[%s9852_s14] sm:$0xff] }
0x15fb   :  { %v2533_v26 = vpop.permute.xlu1 %2532 }
0x15fc   :  { %v2535_v27 = vadd.f32 %v7465_v29, %v2533_v26  ;;  %v5867_v26 = vld [vmem:[%s9850_s12] ss:$0 sm:$0xff] }
0x15fe   :  { %2537 = vrot.lane.b32.xlu0 %v2535_v27, %s7631_s18  ;;  %v2540_v2 = vrot.slane %v2535_v27, 2 }
0x15ff   :  { %v2551_v20 = vpop.permute.xlu1 %2550 }
0x1600   :  { %v2573_v53 = vsel %vm128_vm0, %v8146_v16, %v2551_v20 }
0x1602   :  { %2548 = vrot.lane.b32.xlu0 %v2540_v2, %s7633_s26 }
0x1603   :  { %v2555_v7 = vpop.permute.xlu1 %2554 }
0x1604   :  { %v2575_v63 = vsel %vm128_vm0, %v8300_v14, %v2555_v7 }
0x1605   :  { %v2604_v23 = vcombine.low %v2574_v51, %v2575_v63 }
0x1606   :  { %2562 = vrot.lane.b32.xlu0 %v2547_v61, %s7633_s26 }
0x1607   :  { %v2557_v15 = vpop.permute.xlu1 %2556  ;;  %v2618_v14 = vrot.slane %v2604_v23, %v7776_v22 }
0x1608   :  { %v2576_v1 = vsel %vm128_vm0, %v8422_v60, %v2557_v15 }
0x1609   :  { %v2620_v38 = vcombine.low %v2576_v1, %v2577_v36 }
0x160b   :  { %v2561_v6 = vpop.permute.xlu1 %2560 }
0x160c   :  { %v2578_v16 = vsel %vm128_vm0, %v8652_v5, %v2561_v6  ;;  %v8780_v5 = vld [vmem:[%s9853_s15 + $0x38] sm:$0xff] }
0x1670   :  { %v2538_v17 = vpop.permute.xlu0 %2537 }
0x1674   :  { %v2549_v33 = vpop.permute.xlu0 %2548 }
0x1675   :  { %v2572_v34 = vsel %vm128_vm0, %v8069_v10, %v2549_v33  ;;  %v2628_v10 = vrot.slane %v2620_v38, %v7776_v22 }
0x1676   :  { %v2603_v55 = vcombine.low %v2572_v34, %v2573_v53 }
0x1678   :  { %v2611_v21 = vrot.slane %v2603_v55, %v7776_v22  ;;  %v2563_v29 = vpop.permute.xlu0 %2562 }
0x1679   :  { %v2579_v48 = vsel %vm128_vm0, %v2538_v17, %v2563_v29 }
0x167a   :  { %v2619_v60 = vcombine.low %v2611_v21, %v2618_v14  ;;  %v2621_v37 = vcombine.low %v2578_v16, %v2579_v48 }
0x167c   :  { %v2635_v39 = vrot.slane %v2621_v37, %v7776_v22  ;;  %6883 = vmatprep.mubr.msk.f32.mxu0 %vm410_vm8, %v2619_v60  ;;  %6902 = vmatprep.mubr.msk.f32.mxu1 %vm410_vm8, %v2619_v60 }
0x167e   :  { %v2636_v49 = vcombine.low %v2628_v10, %v2635_v39 }
0x1680   :  { %6884 = vmatmul.mubr.msk.f32.vlgmr.msra.gmra.mxu0 %vm410_vm8, %v2636_v49  ;;  %6903 = vmatmul.mubr.msk.f32.vlgmr.msra.gmra.mxu1 %vm410_vm8, %v2636_v49 }
0x1681   :  { %6906 = vmatpush3.msra.mxu0 %v8775_v41  ;;  %6925 = vmatpush3.msra.mxu1 %v8780_v5 }
0x1682   :  { %6907 = vmatprep.subr.mxu0 %v7629_v31  ;;  %6926 = vmatprep.subr.mxu1 %v7629_v31 }
0x1683   :  { %6908 = vmatpush3.msra.mxu0 %v8787_v43  ;;  %6927 = vmatpush3.msra.mxu1 %v8792_v45 }
0x1684   :  { %6909 = vmatprep.subr.mxu0 %v7629_v31  ;;  %6928 = vmatprep.subr.mxu1 %v7629_v31 }
0x1685   :  { %6910 = vmatpush3.msra.mxu0 %v8801_v47  ;;  %6929 = vmatpush3.msra.mxu1 %v8806_v13 }
0x1686   :  { %6911 = vmatprep.subr.mxu0 %v7629_v31  ;;  %6930 = vmatprep.subr.mxu1 %v7629_v31 }
0x1687   :  { %6912 = vmatpush3.msra.mxu0 %v8815_v62  ;;  %6931 = vmatpush3.msra.mxu1 %v8820_v50 }
0x1688   :  { %6913 = vmatprep.subr.mxu0 %v7629_v31  ;;  %6932 = vmatprep.subr.mxu1 %v7629_v31 }
0x1689   :  { %6914 = vmatpush3.msra.mxu0 %v8829_v18  ;;  %6933 = vmatpush3.msra.mxu1 %v8834_v35 }
0x168a   :  { %6915 = vmatprep.subr.mxu0 %v7629_v31  ;;  %6934 = vmatprep.subr.mxu1 %v7629_v31 }
0x168b   :  { %6916 = vmatpush3.msra.mxu0 %v8843_v19  ;;  %6935 = vmatpush3.msra.mxu1 %v8848_v4 }
0x168c   :  { %6917 = vmatprep.subr.mxu0 %v7629_v31  ;;  %6936 = vmatprep.subr.mxu1 %v7629_v31 }
0x168d   :  { %6918 = vmatpush3.msra.mxu0 %v8857_v52  ;;  %6937 = vmatpush3.msra.mxu1 %v8862_v54 }
0x168e   :  { %6919 = vmatprep.subr.mxu0 %v7629_v31  ;;  %6938 = vmatprep.subr.mxu1 %v7629_v31 }
0x168f   :  { %6920 = vmatpush3.msra.mxu0 %v8871_v56  ;;  %6921 = vmatprep.mubr.msk.f32.mxu0 %vm7630_vm1, %v7629_v31 }
0x1690   :  { %6939 = vmatpush3.msra.mxu1 %v8878_v11  ;;  %6940 = vmatprep.mubr.msk.f32.mxu1 %vm7630_vm1, %v7629_v31 }
0x1691   :  { %6922 = vmatmul.mubr.f32.vlgmr.msra.gmra.mxu0 %v7629_v31  ;;  %6941 = vmatmul.mubr.f32.vlgmr.msra.gmra.mxu1 %v7629_v31 }
0x1692   :  { %6943 = vmatprep.subr.mxu0 %v7629_v31  ;;  %6959 = vmatprep.mubr.msk.f32.mxu0 %vm7630_vm1, %v7629_v31 }
0x1693   :  { %6944 = vmatpush3.msra.mxu0 %v8891_v40  ;;  %6962 = vmatprep.subr.mxu1 %v7629_v31 }
0x1694   :  { %6945 = vmatprep.subr.mxu0 %v7629_v31  ;;  %6963 = vmatpush3.msra.mxu1 %v8775_v41 }
0x1695   :  { %6946 = vmatpush3.msra.mxu0 %v8899_v59  ;;  %6964 = vmatprep.subr.mxu1 %v7629_v31 }
0x1696   :  { %6947 = vmatprep.subr.mxu0 %v7629_v31  ;;  %6965 = vmatpush3.msra.mxu1 %v8787_v43 }
0x1697   :  { %6948 = vmatpush3.msra.mxu0 %v8909_v3  ;;  %6966 = vmatprep.subr.mxu1 %v7629_v31 }
0x1698   :  { %6949 = vmatprep.subr.mxu0 %v7629_v31  ;;  %6967 = vmatpush3.msra.mxu1 %v8801_v47 }
0x1699   :  { %6950 = vmatpush3.msra.mxu0 %v8918_v58  ;;  %6968 = vmatprep.subr.mxu1 %v7629_v31 }
0x169a   :  { %6951 = vmatprep.subr.mxu0 %v7629_v31  ;;  %6969 = vmatpush3.msra.mxu1 %v8815_v62 }
0x169b   :  { %6952 = vmatpush3.msra.mxu0 %v8927_v42  ;;  %6970 = vmatprep.subr.mxu1 %v7629_v31 }
0x169c   :  { %6953 = vmatprep.subr.mxu0 %v7629_v31  ;;  %6971 = vmatpush3.msra.mxu1 %v8829_v18 }
0x169d   :  { %6954 = vmatpush3.msra.mxu0 %v8936_v44  ;;  %6972 = vmatprep.subr.mxu1 %v7629_v31 }
0x169e   :  { %6955 = vmatprep.subr.mxu0 %v7629_v31  ;;  %6973 = vmatpush3.msra.mxu1 %v8843_v19 }
0x169f   :  { %6956 = vmatpush3.msra.mxu0 %v8945_v24  ;;  %6974 = vmatprep.subr.mxu1 %v7629_v31 }
0x16a0   :  { %6957 = vmatprep.subr.mxu0 %v7629_v31  ;;  %6975 = vmatpush3.msra.mxu1 %v8857_v52 }
0x16a1   :  { %6958 = vmatpush3.msra.mxu0 %v8954_v46  ;;  %6976 = vmatprep.subr.mxu1 %v7629_v31 }
0x16a2   :  { %6960 = vmatmul.mubr.f32.vlgmr.msra.gmra.mxu0 %v7629_v31  ;;  %6981 = vmatprep.subr.mxu0 %v7629_v31 }
0x16a3   :  { %6982 = vmatpush3.msra.mxu0 %v8780_v5  ;;  %6977 = vmatpush3.msra.mxu1 %v8871_v56 }
0x16a4   :  { %6983 = vmatprep.subr.mxu0 %v7629_v31  ;;  %6978 = vmatprep.mubr.msk.f32.mxu1 %vm7630_vm1, %v7629_v31 }
0x16a5   :  { %6984 = vmatpush3.msra.mxu0 %v8792_v45  ;;  %6997 = vmatprep.mubr.msk.f32.mxu0 %vm7630_vm1, %v7629_v31 }
0x16a6   :  { %6985 = vmatprep.subr.mxu0 %v7629_v31  ;;  %7000 = vmatprep.subr.mxu1 %v7629_v31 }
0x16a7   :  { %6986 = vmatpush3.msra.mxu0 %v8806_v13 }
0x16a8   :  { %6987 = vmatprep.subr.mxu0 %v7629_v31 }
0x16a9   :  { %6988 = vmatpush3.msra.mxu0 %v8820_v50 }
0x16aa   :  { %6989 = vmatprep.subr.mxu0 %v7629_v31 }
0x16ab   :  { %6990 = vmatpush3.msra.mxu0 %v8834_v35 }
0x16ac   :  { %6991 = vmatprep.subr.mxu0 %v7629_v31 }
0x16ad   :  { %6992 = vmatpush3.msra.mxu0 %v8848_v4 }
0x16ae   :  { %6993 = vmatprep.subr.mxu0 %v7629_v31 }
0x16af   :  { %6994 = vmatpush3.msra.mxu0 %v8862_v54 }
0x16b0   :  { %6995 = vmatprep.subr.mxu0 %v7629_v31 }
0x16b1   :  { %6996 = vmatpush3.msra.mxu0 %v8878_v11 }
0x16b2   :  { %7019 = vmatprep.subr.mxu0 %v7629_v31 }
0x1740   :  { %v6885_v27 = vpop.f32.mrf.mxu0  ;;  %v6904_v28 = vpop.f32.mrf.mxu1 }
0x1741   :  { %v2713_v30 = vadd.f32 %v6885_v27, %v5864_v25  ;;  %v2847_v32 = vadd.f32 %v6904_v28, %v5867_v26 }
0x1742   :  { %v2707_v57 = vpop.f32.mrf.mxu0  ;;  %v2841_v2 = vpop.f32.mrf.mxu1 }
0x1743   :  { %v2869_v61 = vcombine.high %v2847_v32, %v2847_v32  ;;  %v2876_v20 = vrot.slane %v2847_v32, %v7776_v22  ;;  %v2735_v0 = vcombine.high %v2713_v30, %v2713_v30  ;;  %v2708_v7 = vadd.f32 %v5864_v25, %v2707_v57 }
0x1744   :  { %v2842_v9 = vadd.f32 %v5867_v26, %v2841_v2  ;;  %v2742_v53 = vrot.slane %v2713_v30, %v7776_v22 }
0x1745   :  { %v2883_v15 = vrot.slane %v2869_v61, %v7776_v22  ;;  %v5878_v17 = vcombine.high %v2876_v20, %v2876_v20  ;;  %v3712_v63 = vcombine.low %v2876_v20, %v2876_v20  ;;  %v2718_v51 = vcombine.high %v2708_v7, %v2708_v7 }
0x1746   :  { %v2725_v23 = vrot.slane %v2708_v7, %v7776_v22  ;;  %v2852_v33 = vcombine.high %v2842_v9, %v2842_v9  ;;  %v2749_v6 = vrot.slane %v2735_v0, %v7776_v22  ;;  %v2859_v14 = vrot.slane %v2842_v9, %v7776_v22 }
0x1747   :  { %v3176_v1 = vcombine.low %v2883_v15, %v2883_v15  ;;  %v3451_v34 = vrot.slane %v5878_v17, %v7776_v22  ;;  %v5870_v55 = vcombine.high %v2883_v15, %v2883_v15  ;;  %v2732_v36 = vrot.slane %v2718_v51, %v7776_v22 }
0x1748   :  { %v3719_v38 = vrot.slane %v3712_v63, %v7776_v22  ;;  %v2733_v21 = vcombine.high %v2725_v23, %v2725_v23  ;;  %v2866_v29 = vrot.slane %v2852_v33, %v7776_v22  ;;  %v5900_v60 = vcombine.high %v2859_v14, %v2859_v14 }
0x1749   :  { %v3183_v16 = vrot.slane %v3176_v1, %v7776_v22  ;;  %v2734_v48 = vcombine.high %v2732_v36, %v2732_v36  ;;  %v4784_v37 = vcombine.low %v2859_v14, %v2859_v14  ;;  %v9005_v10 = vsel %vm408_vm2, %v2732_v36, %v3451_v34 }
0x174a   :  { %v5889_v39 = vcombine.high %v2866_v29, %v2866_v29  ;;  %v4248_v49 = vcombine.low %v2866_v29, %v2866_v29  ;;  %v2751_v26 = vcombine.high %v2749_v6, %v2749_v6  ;;  %v4523_v27 = vrot.slane %v5900_v60, %v7776_v22 }
0x174b   :  { %v9008_v25 = vsel %vm408_vm2, %v2733_v21, %v3183_v16  ;;  %v4791_v28 = vrot.slane %v4784_v37, %v7776_v22  ;;  %v9013_v30 = vsel %vm408_vm2, %v2734_v48, %v3719_v38  ;;  %v2750_v32 = vcombine.high %v2742_v53, %v2742_v53 }
0x174c   :  { %v2918_v57 = vrot.slane %v5870_v55, %v7776_v22  ;;  %v3987_v2 = vrot.slane %v5889_v39, %v7776_v22  ;;  %v4255_v61 = vrot.slane %v4248_v49, %v7776_v22  ;;  %v9019_v20 = vsel %vm408_vm2, %v2749_v6, %v4523_v27 }
0x174d   :  { %v9022_v0 = vsel %vm408_vm2, %v2751_v26, %v4791_v28 }
0x174e   :  { %v9025_v7 = vsel %vm408_vm2, %v2742_v53, %v3987_v2  ;;  %v9028_v9 = vsel %vm408_vm2, %v2750_v32, %v4255_v61  ;;  %v2920_v15 = vsel %vm408_vm2, %v2725_v23, %v2918_v57  ;;  %v9035_v53 = vld [vmem:[%s9851_s13] sm:$0xf] }
0x1751   :  { %v2987_v17 = vpop.f32.mrf.mxu0  ;;  %v3057_v63 = vpop.f32.mrf.mxu1 }
0x1752   :  { %v3061_v51 = vadd.f32 %v2987_v17, %v2920_v15  ;;  %3069 = vrot.lane.b32.xlu0 %v3057_v63, %s7632_s19 }
0x1753   :  { %v6923_v22 = vpop.f32.mrf.mxu0  ;;  %v6942_v33 = vpop.f32.mrf.mxu1 }
0x1754   :  { %v5871_v1 = vmul.f32 -1.442695, %v3061_v51 }
0x1756   :  { %7470 = vpow2.f32 %v5871_v1 }
0x1762   :  { %v3145_v34 = vpop.f32.mrf.mxu0 }
0x1763   :  { %v7471_v6 = vpop.eup %7470  ;;  %v3146_v23 = vadd.f32 %v3145_v34, %v9035_v53 }
0x1764   :  { %v3065_v55 = vadd.f32 1.0, %v7471_v6  ;;  %v6961_v36 = vpop.f32.mrf.mxu0 }
0x1766   :  { %7472 = vrcp.f32 %v3065_v55 }
0x1773   :  { %v7473_v14 = vpop.eup %7472 }
0x1774   :  { %v3149_v38 = vmul.f32 %v7473_v14, %v3146_v23 }
0x1776   :  { %3151 = vrot.lane.b32.xlu1 %v3149_v38, %s7631_s18 }
0x17c4   :  { %v3070_v60 = vpop.permute.xlu0 %3069 }
0x17c5   :  { %v3072_v37 = vadd.f32 %v3070_v60, %v2920_v15 }
0x17c7   :  { %v5872_v39 = vmul.f32 -1.442695, %v3072_v37 }
0x17e8   :  { %v3152_v21 = vpop.permute.xlu1 %3151 }
0x17e9   :  { %v3154_v29 = vadd.f32 %v3152_v21, %v2920_v15 }
0x17eb   :  { %7474 = vtanh.f32 %v3154_v29 }
0x17ec   :  { %7476 = vpow2.f32 %v5872_v39 }
0x17f8   :  { %v7475_v16 = vpop.eup %7474 }
0x17f9   :  { %v3156_v48 = vsub.f32 0.0, %v7475_v16  ;;  %v7477_v49 = vpop.eup %7476 }
0x17fa   :  { %v3076_v26 = vadd.f32 1.0, %v7477_v49 }
0x17fb   :  { %3158 = vrot.lane.b32.xlu1 %v3156_v48, %s7633_s26 }
0x17fc   :  { %7478 = vrcp.f32 %v3076_v26 }
0x1809   :  { %v7479_v27 = vpop.eup %7478 }
0x186d   :  { %v3159_v28 = vpop.permute.xlu1 %3158 }
0x186e   :  { %v3161_v32 = vmul.f32 %v7479_v27, %v3159_v28 }
0x1870   :  { %3163 = vrot.lane.b32.xlu0 %v3161_v32, %s7632_s19 }
0x18e2   :  { %v3164_v57 = vpop.permute.xlu0 %3163 }
0x18e3   :  { %v9041_v2 = vadd.f32 %v7475_v16, %v3164_v57 }
0x18e5   :  { %3171 = vrot.lane.b32.xlu0 %v9041_v2, %s7633_s26  ;;  %3168 = vrot.lane.b32.xlu1 %v9041_v2, %s7631_s18 }
0x1957   :  { %v3172_v61 = vpop.permute.xlu0 %3171  ;;  %v3169_v15 = vpop.permute.xlu1 %3168 }
0x1958   :  { %v3174_v17 = vsel %vm128_vm0, %v3169_v15, %v3172_v61 }
0x1959   :  { %v3175_v63 = vmul.f32 %v8067_v8, %v3174_v17 }
0x195b   :  { %6979 = vmatmul.mubr.msk.f32.vlgmr.msra.gmra.mxu1 %vm410_vm8, %v3175_v63  ;;  %6998 = vmatmul.mubr.msk.f32.vlgmr.msra.gmra.mxu0 %vm410_vm8, %v3175_v63 }
0x195c   :  { %7001 = vmatpush3.msra.mxu1 %v8891_v40  ;;  %7016 = vmatprep.mubr.msk.f32.mxu1 %vm7630_vm1, %v7629_v31 }
0x195d   :  { %7002 = vmatprep.subr.mxu1 %v7629_v31  ;;  %7020 = vmatpush3.msra.mxu0 %v8775_v41 }
0x195e   :  { %7003 = vmatpush3.msra.mxu1 %v8899_v59  ;;  %7021 = vmatprep.subr.mxu0 %v7629_v31 }
0x195f   :  { %7004 = vmatprep.subr.mxu1 %v7629_v31  ;;  %7022 = vmatpush3.msra.mxu0 %v8787_v43 }
0x1960   :  { %7005 = vmatpush3.msra.mxu1 %v8909_v3  ;;  %7023 = vmatprep.subr.mxu0 %v7629_v31 }
0x1961   :  { %7006 = vmatprep.subr.mxu1 %v7629_v31  ;;  %7024 = vmatpush3.msra.mxu0 %v8801_v47 }
0x1962   :  { %7007 = vmatpush3.msra.mxu1 %v8918_v58  ;;  %7025 = vmatprep.subr.mxu0 %v7629_v31 }
0x1963   :  { %7008 = vmatprep.subr.mxu1 %v7629_v31  ;;  %7026 = vmatpush3.msra.mxu0 %v8815_v62 }
0x1964   :  { %7009 = vmatpush3.msra.mxu1 %v8927_v42  ;;  %7027 = vmatprep.subr.mxu0 %v7629_v31 }
0x1965   :  { %7010 = vmatprep.subr.mxu1 %v7629_v31  ;;  %7028 = vmatpush3.msra.mxu0 %v8829_v18 }
0x1966   :  { %7011 = vmatpush3.msra.mxu1 %v8936_v44  ;;  %7029 = vmatprep.subr.mxu0 %v7629_v31 }
0x1967   :  { %7012 = vmatprep.subr.mxu1 %v7629_v31  ;;  %7030 = vmatpush3.msra.mxu0 %v8843_v19 }
0x1968   :  { %7013 = vmatpush3.msra.mxu1 %v8945_v24  ;;  %7031 = vmatprep.subr.mxu0 %v7629_v31 }
0x1969   :  { %7014 = vmatprep.subr.mxu1 %v7629_v31  ;;  %7032 = vmatpush3.msra.mxu0 %v8857_v52 }
0x196a   :  { %7015 = vmatpush3.msra.mxu1 %v8954_v46  ;;  %7033 = vmatprep.subr.mxu0 %v7629_v31 }
0x196b   :  { %7017 = vmatmul.mubr.msk.f32.vlgmr.msra.gmra.mxu1 %vm410_vm8, %v3175_v63  ;;  %7038 = vmatprep.subr.mxu1 %v7629_v31 }
0x196c   :  { %7039 = vmatpush3.msra.mxu1 %v8780_v5  ;;  %7034 = vmatpush3.msra.mxu0 %v8871_v56 }
0x196d   :  { %7040 = vmatprep.subr.mxu1 %v7629_v31  ;;  %7035 = vmatprep.mubr.msk.f32.mxu0 %vm7630_vm1, %v7629_v31 }
0x196e   :  { %7041 = vmatpush3.msra.mxu1 %v8792_v45  ;;  %7054 = vmatprep.mubr.msk.f32.mxu1 %vm7630_vm1, %v7629_v31 }
0x196f   :  { %7042 = vmatprep.subr.mxu1 %v7629_v31  ;;  %7057 = vmatprep.subr.mxu0 %v7629_v31 }
0x1970   :  { %7043 = vmatpush3.msra.mxu1 %v8806_v13 }
0x1971   :  { %7044 = vmatprep.subr.mxu1 %v7629_v31 }
0x1972   :  { %7045 = vmatpush3.msra.mxu1 %v8820_v50 }
0x1973   :  { %7046 = vmatprep.subr.mxu1 %v7629_v31 }
0x1974   :  { %7047 = vmatpush3.msra.mxu1 %v8834_v35 }
0x1975   :  { %7048 = vmatprep.subr.mxu1 %v7629_v31 }
0x1976   :  { %7049 = vmatpush3.msra.mxu1 %v8848_v4 }
0x1977   :  { %7050 = vmatprep.subr.mxu1 %v7629_v31 }
0x1978   :  { %7051 = vmatpush3.msra.mxu1 %v8862_v54 }
0x1979   :  { %7052 = vmatprep.subr.mxu1 %v7629_v31 }
0x197a   :  { %7053 = vmatpush3.msra.mxu1 %v8878_v11 }
0x197b   :  { %7076 = vmatprep.subr.mxu1 %v7629_v31 }
0x1a1b   :  { %v3255_v51 = vpop.f32.mrf.mxu1  ;;  %v3325_v22 = vpop.f32.mrf.mxu0 }
0x1a1c   :  { %v3329_v33 = vadd.f32 %v3255_v51, %v9008_v25  ;;  %3337 = vrot.lane.b32.xlu0 %v3325_v22, %s7632_s19 }
0x1a1d   :  { %v6980_v1 = vpop.f32.mrf.mxu1  ;;  %v6999_v34 = vpop.f32.mrf.mxu0 }
0x1a1e   :  { %v5875_v6 = vmul.f32 -1.442695, %v3329_v33 }
0x1a20   :  { %7480 = vpow2.f32 %v5875_v6 }
0x1a2b   :  { %v3413_v55 = vpop.f32.mrf.mxu1 }
0x1a2c   :  { %v3414_v38 = vadd.f32 %v3413_v55, %v9035_v53 }
0x1a2d   :  { %v7481_v36 = vpop.eup %7480  ;;  %v7018_v23 = vpop.f32.mrf.mxu1 }
0x1a2e   :  { %v3333_v14 = vadd.f32 1.0, %v7481_v36 }
0x1a30   :  { %7482 = vrcp.f32 %v3333_v14 }
0x1a3d   :  { %v7483_v21 = vpop.eup %7482 }
0x1a3e   :  { %v3417_v29 = vmul.f32 %v7483_v21, %v3414_v38 }
0x1a40   :  { %3419 = vrot.lane.b32.xlu1 %v3417_v29, %s7631_s18 }
0x1a8e   :  { %v3338_v39 = vpop.permute.xlu0 %3337 }
0x1a8f   :  { %v3340_v49 = vadd.f32 %v3338_v39, %v9008_v25 }
0x1a91   :  { %v5876_v26 = vmul.f32 -1.442695, %v3340_v49 }
0x1ab2   :  { %v3420_v16 = vpop.permute.xlu1 %3419 }
0x1ab3   :  { %v3422_v48 = vadd.f32 %v3420_v16, %v9008_v25 }
0x1ab5   :  { %7484 = vtanh.f32 %v3422_v48 }
0x1ab6   :  { %7486 = vpow2.f32 %v5876_v26 }
0x1ac2   :  { %v7485_v60 = vpop.eup %7484 }
0x1ac3   :  { %v3424_v37 = vsub.f32 %v9041_v2, %v7485_v60  ;;  %v7487_v27 = vpop.eup %7486 }
0x1ac4   :  { %v3344_v28 = vadd.f32 1.0, %v7487_v27 }
0x1ac5   :  { %3426 = vrot.lane.b32.xlu1 %v3424_v37, %s7633_s26 }
0x1ac6   :  { %7488 = vrcp.f32 %v3344_v28 }
0x1ad3   :  { %v7489_v32 = vpop.eup %7488 }
0x1b37   :  { %v3427_v57 = vpop.permute.xlu1 %3426 }
0x1b38   :  { %v3429_v61 = vmul.f32 %v7489_v32, %v3427_v57 }
0x1b3a   :  { %3431 = vrot.lane.b32.xlu0 %v3429_v61, %s7632_s19 }
0x1bac   :  { %v3432_v15 = vpop.permute.xlu0 %3431 }
0x1bad   :  { %v9115_v17 = vadd.f32 %v7485_v60, %v3432_v15 }
0x1baf   :  { %3439 = vrot.lane.b32.xlu0 %v9115_v17, %s7633_s26  ;;  %3436 = vrot.lane.b32.xlu1 %v9115_v17, %s7631_s18 }
0x1c21   :  { %v3440_v25 = vpop.permute.xlu0 %3439  ;;  %v3437_v63 = vpop.permute.xlu1 %3436 }
0x1c22   :  { %v3442_v51 = vsel %vm128_vm0, %v3437_v63, %v3440_v25 }
0x1c23   :  { %v3443_v22 = vmul.f32 %v8067_v8, %v3442_v51 }
0x1c25   :  { %7036 = vmatmul.mubr.msk.f32.vlgmr.msra.gmra.mxu0 %vm410_vm8, %v3443_v22  ;;  %7055 = vmatmul.mubr.msk.f32.vlgmr.msra.gmra.mxu1 %vm410_vm8, %v3443_v22 }
0x1c26   :  { %7058 = vmatpush3.msra.mxu0 %v8891_v40  ;;  %7073 = vmatprep.mubr.msk.f32.mxu0 %vm7630_vm1, %v7629_v31 }
0x1c27   :  { %7059 = vmatprep.subr.mxu0 %v7629_v31  ;;  %7077 = vmatpush3.msra.mxu1 %v8775_v41 }
0x1c28   :  { %7060 = vmatpush3.msra.mxu0 %v8899_v59  ;;  %7078 = vmatprep.subr.mxu1 %v7629_v31 }
0x1c29   :  { %7061 = vmatprep.subr.mxu0 %v7629_v31  ;;  %7079 = vmatpush3.msra.mxu1 %v8787_v43 }
0x1c2a   :  { %7062 = vmatpush3.msra.mxu0 %v8909_v3  ;;  %7080 = vmatprep.subr.mxu1 %v7629_v31 }
0x1c2b   :  { %7063 = vmatprep.subr.mxu0 %v7629_v31  ;;  %7081 = vmatpush3.msra.mxu1 %v8801_v47 }
0x1c2c   :  { %7064 = vmatpush3.msra.mxu0 %v8918_v58  ;;  %7082 = vmatprep.subr.mxu1 %v7629_v31 }
0x1c2d   :  { %7065 = vmatprep.subr.mxu0 %v7629_v31  ;;  %7083 = vmatpush3.msra.mxu1 %v8815_v62 }
0x1c2e   :  { %7066 = vmatpush3.msra.mxu0 %v8927_v42  ;;  %7084 = vmatprep.subr.mxu1 %v7629_v31 }
0x1c2f   :  { %7067 = vmatprep.subr.mxu0 %v7629_v31  ;;  %7085 = vmatpush3.msra.mxu1 %v8829_v18 }
0x1c30   :  { %7068 = vmatpush3.msra.mxu0 %v8936_v44  ;;  %7086 = vmatprep.subr.mxu1 %v7629_v31 }
0x1c31   :  { %7069 = vmatprep.subr.mxu0 %v7629_v31  ;;  %7087 = vmatpush3.msra.mxu1 %v8843_v19 }
0x1c32   :  { %7070 = vmatpush3.msra.mxu0 %v8945_v24  ;;  %7088 = vmatprep.subr.mxu1 %v7629_v31 }
0x1c33   :  { %7071 = vmatprep.subr.mxu0 %v7629_v31  ;;  %7089 = vmatpush3.msra.mxu1 %v8857_v52 }
0x1c34   :  { %7072 = vmatpush3.msra.mxu0 %v8954_v46  ;;  %7090 = vmatprep.subr.mxu1 %v7629_v31 }
0x1c35   :  { %7074 = vmatmul.mubr.msk.f32.vlgmr.msra.gmra.mxu0 %vm410_vm8, %v3443_v22  ;;  %7095 = vmatprep.subr.mxu0 %v7629_v31 }
0x1c36   :  { %7096 = vmatpush3.msra.mxu0 %v8780_v5  ;;  %7091 = vmatpush3.msra.mxu1 %v8871_v56 }
0x1c37   :  { %7097 = vmatprep.subr.mxu0 %v7629_v31  ;;  %7092 = vmatprep.mubr.msk.f32.mxu1 %vm7630_vm1, %v7629_v31 }
0x1c38   :  { %7098 = vmatpush3.msra.mxu0 %v8792_v45  ;;  %7111 = vmatprep.mubr.msk.f32.mxu0 %vm7630_vm1, %v7629_v31 }
0x1c39   :  { %7099 = vmatprep.subr.mxu0 %v7629_v31  ;;  %7114 = vmatprep.subr.mxu1 %v7629_v31 }
0x1c3a   :  { %7100 = vmatpush3.msra.mxu0 %v8806_v13 }
0x1c3b   :  { %7101 = vmatprep.subr.mxu0 %v7629_v31 }
0x1c3c   :  { %7102 = vmatpush3.msra.mxu0 %v8820_v50 }
0x1c3d   :  { %7103 = vmatprep.subr.mxu0 %v7629_v31 }
0x1c3e   :  { %7104 = vmatpush3.msra.mxu0 %v8834_v35 }
0x1c3f   :  { %7105 = vmatprep.subr.mxu0 %v7629_v31 }
0x1c40   :  { %7106 = vmatpush3.msra.mxu0 %v8848_v4 }
0x1c41   :  { %7107 = vmatprep.subr.mxu0 %v7629_v31 }
0x1c42   :  { %7108 = vmatpush3.msra.mxu0 %v8862_v54 }
0x1c43   :  { %7109 = vmatprep.subr.mxu0 %v7629_v31 }
0x1c44   :  { %7110 = vmatpush3.msra.mxu0 %v8878_v11 }
0x1c45   :  { %7133 = vmatprep.subr.mxu0 %v7629_v31 }
0x1ce5   :  { %v3523_v33 = vpop.f32.mrf.mxu0  ;;  %v3593_v1 = vpop.f32.mrf.mxu1 }
0x1ce6   :  { %v3597_v34 = vadd.f32 %v3523_v33, %v9005_v10  ;;  %3605 = vrot.lane.b32.xlu0 %v3593_v1, %s7632_s19 }
0x1ce7   :  { %v7037_v6 = vpop.f32.mrf.mxu0  ;;  %v7056_v55 = vpop.f32.mrf.mxu1 }
0x1ce8   :  { %v5881_v36 = vmul.f32 -1.442695, %v3597_v34 }
0x1cea   :  { %7490 = vpow2.f32 %v5881_v36 }
0x1cf5   :  { %v3681_v23 = vpop.f32.mrf.mxu0 }
0x1cf6   :  { %v3682_v29 = vadd.f32 %v3681_v23, %v9035_v53 }
0x1cf7   :  { %v7491_v14 = vpop.eup %7490  ;;  %v7075_v38 = vpop.f32.mrf.mxu0 }
0x1cf8   :  { %v3601_v21 = vadd.f32 1.0, %v7491_v14 }
0x1cfa   :  { %7492 = vrcp.f32 %v3601_v21 }
0x1d07   :  { %v7493_v16 = vpop.eup %7492 }
0x1d08   :  { %v3685_v48 = vmul.f32 %v7493_v16, %v3682_v29 }
0x1d0a   :  { %3687 = vrot.lane.b32.xlu1 %v3685_v48, %s7631_s18 }
0x1d58   :  { %v3606_v26 = vpop.permute.xlu0 %3605 }
0x1d59   :  { %v3608_v27 = vadd.f32 %v3606_v26, %v9005_v10 }
0x1d5b   :  { %v5882_v28 = vmul.f32 -1.442695, %v3608_v27 }
0x1d7c   :  { %v3688_v60 = vpop.permute.xlu1 %3687 }
0x1d7d   :  { %v3690_v37 = vadd.f32 %v3688_v60, %v9005_v10 }
0x1d7f   :  { %7494 = vtanh.f32 %v3690_v37 }
0x1d80   :  { %7496 = vpow2.f32 %v5882_v28 }
0x1d8c   :  { %v7495_v39 = vpop.eup %7494 }
0x1d8d   :  { %v3692_v49 = vsub.f32 %v9115_v17, %v7495_v39  ;;  %v7497_v32 = vpop.eup %7496 }
0x1d8e   :  { %v3612_v57 = vadd.f32 1.0, %v7497_v32 }
0x1d8f   :  { %3694 = vrot.lane.b32.xlu1 %v3692_v49, %s7633_s26 }
0x1d90   :  { %7498 = vrcp.f32 %v3612_v57 }
0x1d9d   :  { %v7499_v61 = vpop.eup %7498 }
0x1e01   :  { %v3695_v15 = vpop.permute.xlu1 %3694 }
0x1e02   :  { %v3697_v25 = vmul.f32 %v7499_v61, %v3695_v15 }
0x1e04   :  { %3699 = vrot.lane.b32.xlu0 %v3697_v25, %s7632_s19 }
0x1e76   :  { %v3700_v63 = vpop.permute.xlu0 %3699 }
0x1e77   :  { %v9189_v51 = vadd.f32 %v7495_v39, %v3700_v63 }
0x1e79   :  { %3707 = vrot.lane.b32.xlu0 %v9189_v51, %s7633_s26  ;;  %3704 = vrot.lane.b32.xlu1 %v9189_v51, %s7631_s18 }
0x1eeb   :  { %v3708_v10 = vpop.permute.xlu0 %3707  ;;  %v3705_v22 = vpop.permute.xlu1 %3704 }
0x1eec   :  { %v3710_v33 = vsel %vm128_vm0, %v3705_v22, %v3708_v10 }
0x1eed   :  { %v3711_v1 = vmul.f32 %v8067_v8, %v3710_v33 }
0x1eef   :  { %7093 = vmatmul.mubr.msk.f32.vlgmr.msra.gmra.mxu1 %vm410_vm8, %v3711_v1  ;;  %7112 = vmatmul.mubr.msk.f32.vlgmr.msra.gmra.mxu0 %vm410_vm8, %v3711_v1 }
0x1ef0   :  { %7115 = vmatpush3.msra.mxu1 %v8891_v40  ;;  %7130 = vmatprep.mubr.msk.f32.mxu1 %vm7630_vm1, %v7629_v31 }
0x1ef1   :  { %7116 = vmatprep.subr.mxu1 %v7629_v31  ;;  %7134 = vmatpush3.msra.mxu0 %v8775_v41 }
0x1ef2   :  { %7117 = vmatpush3.msra.mxu1 %v8899_v59  ;;  %7135 = vmatprep.subr.mxu0 %v7629_v31 }
0x1ef3   :  { %7118 = vmatprep.subr.mxu1 %v7629_v31  ;;  %7136 = vmatpush3.msra.mxu0 %v8787_v43 }
0x1ef4   :  { %7119 = vmatpush3.msra.mxu1 %v8909_v3  ;;  %7137 = vmatprep.subr.mxu0 %v7629_v31 }
0x1ef5   :  { %7120 = vmatprep.subr.mxu1 %v7629_v31  ;;  %7138 = vmatpush3.msra.mxu0 %v8801_v47 }
0x1ef6   :  { %7121 = vmatpush3.msra.mxu1 %v8918_v58  ;;  %7139 = vmatprep.subr.mxu0 %v7629_v31 }
0x1ef7   :  { %7122 = vmatprep.subr.mxu1 %v7629_v31  ;;  %7140 = vmatpush3.msra.mxu0 %v8815_v62 }
0x1ef8   :  { %7123 = vmatpush3.msra.mxu1 %v8927_v42  ;;  %7141 = vmatprep.subr.mxu0 %v7629_v31 }
0x1ef9   :  { %7124 = vmatprep.subr.mxu1 %v7629_v31  ;;  %7142 = vmatpush3.msra.mxu0 %v8829_v18 }
0x1efa   :  { %7125 = vmatpush3.msra.mxu1 %v8936_v44  ;;  %7143 = vmatprep.subr.mxu0 %v7629_v31 }
0x1efb   :  { %7126 = vmatprep.subr.mxu1 %v7629_v31  ;;  %7144 = vmatpush3.msra.mxu0 %v8843_v19 }
0x1efc   :  { %7127 = vmatpush3.msra.mxu1 %v8945_v24  ;;  %7145 = vmatprep.subr.mxu0 %v7629_v31 }
0x1efd   :  { %7128 = vmatprep.subr.mxu1 %v7629_v31  ;;  %7146 = vmatpush3.msra.mxu0 %v8857_v52 }
0x1efe   :  { %7129 = vmatpush3.msra.mxu1 %v8954_v46  ;;  %7147 = vmatprep.subr.mxu0 %v7629_v31 }
0x1eff   :  { %7131 = vmatmul.mubr.msk.f32.vlgmr.msra.gmra.mxu1 %vm410_vm8, %v3711_v1  ;;  %7152 = vmatprep.subr.mxu1 %v7629_v31 }
0x1f00   :  { %7153 = vmatpush3.msra.mxu1 %v8780_v5  ;;  %7148 = vmatpush3.msra.mxu0 %v8871_v56 }
0x1f01   :  { %7154 = vmatprep.subr.mxu1 %v7629_v31  ;;  %7149 = vmatprep.mubr.msk.f32.mxu0 %vm7630_vm1, %v7629_v31 }
0x1f02   :  { %7155 = vmatpush3.msra.mxu1 %v8792_v45  ;;  %7168 = vmatprep.mubr.msk.f32.mxu1 %vm7630_vm1, %v7629_v31 }
0x1f03   :  { %7156 = vmatprep.subr.mxu1 %v7629_v31  ;;  %7171 = vmatprep.subr.mxu0 %v7629_v31 }
0x1f04   :  { %7157 = vmatpush3.msra.mxu1 %v8806_v13 }
0x1f05   :  { %7158 = vmatprep.subr.mxu1 %v7629_v31 }
0x1f06   :  { %7159 = vmatpush3.msra.mxu1 %v8820_v50 }
0x1f07   :  { %7160 = vmatprep.subr.mxu1 %v7629_v31 }
0x1f08   :  { %7161 = vmatpush3.msra.mxu1 %v8834_v35 }
0x1f09   :  { %7162 = vmatprep.subr.mxu1 %v7629_v31 }
0x1f0a   :  { %7163 = vmatpush3.msra.mxu1 %v8848_v4 }
0x1f0b   :  { %7164 = vmatprep.subr.mxu1 %v7629_v31 }
0x1f0c   :  { %7165 = vmatpush3.msra.mxu1 %v8862_v54 }
0x1f0d   :  { %7166 = vmatprep.subr.mxu1 %v7629_v31 }
0x1f0e   :  { %7167 = vmatpush3.msra.mxu1 %v8878_v11 }
0x1f0f   :  { %7190 = vmatprep.subr.mxu1 %v7629_v31 }
0x1faf   :  { %v3791_v5 = vpop.f32.mrf.mxu1  ;;  %v3861_v45 = vpop.f32.mrf.mxu0 }
0x1fb0   :  { %v3865_v13 = vadd.f32 %v3791_v5, %v9013_v30  ;;  %3873 = vrot.lane.b32.xlu0 %v3861_v45, %s7632_s19 }
0x1fb1   :  { %v7094_v50 = vpop.f32.mrf.mxu1  ;;  %v7113_v35 = vpop.f32.mrf.mxu0 }
0x1fb2   :  { %v5886_v34 = vmul.f32 -1.442695, %v3865_v13 }
0x1fb4   :  { %7500 = vpow2.f32 %v5886_v34 }
0x1fbf   :  { %v3949_v4 = vpop.f32.mrf.mxu1 }
0x1fc0   :  { %v3950_v23 = vadd.f32 %v3949_v4, %v9035_v53 }
0x1fc1   :  { %v7501_v6 = vpop.eup %7500  ;;  %v7132_v55 = vpop.f32.mrf.mxu1 }
0x1fc2   :  { %v3869_v36 = vadd.f32 1.0, %v7501_v6 }
0x1fc4   :  { %7502 = vrcp.f32 %v3869_v36 }
0x1fd1   :  { %v7503_v14 = vpop.eup %7502 }
0x1fd2   :  { %v3953_v38 = vmul.f32 %v7503_v14, %v3950_v23 }
0x1fd4   :  { %3955 = vrot.lane.b32.xlu1 %v3953_v38, %s7631_s18 }
0x2022   :  { %v3874_v60 = vpop.permute.xlu0 %3873 }
0x2023   :  { %v3876_v37 = vadd.f32 %v3874_v60, %v9013_v30  ;;  %v9403_v60 = vld [vmem:[%s9852_s14 + $0x30] sm:$0xff] }
0x2025   :  { %v5887_v39 = vmul.f32 -1.442695, %v3876_v37  ;;  %v9409_v37 = vld [vmem:[%s9854_s16 + $0x28] sm:$0xff] }
0x2046   :  { %v3956_v21 = vpop.permute.xlu1 %3955 }
0x2047   :  { %v3958_v29 = vadd.f32 %v3956_v21, %v9013_v30 }
0x2049   :  { %7504 = vtanh.f32 %v3958_v29  ;;  %v9380_v29 = vld [vmem:[%s9854_s16 + $0x38] sm:$0xff] }
0x204a   :  { %7506 = vpow2.f32 %v5887_v39  ;;  %v9417_v39 = vld [vmem:[%s9852_s14 + $0x28] sm:$0xff] }
0x2056   :  { %v7505_v16 = vpop.eup %7504 }
0x2057   :  { %v3960_v48 = vsub.f32 %v9189_v51, %v7505_v16  ;;  %v7507_v49 = vpop.eup %7506 }
0x2058   :  { %v3880_v26 = vadd.f32 1.0, %v7507_v49  ;;  %v9423_v49 = vld [vmem:[%s9854_s16 + $0x20] sm:$0xff] }
0x2059   :  { %3962 = vrot.lane.b32.xlu1 %v3960_v48, %s7633_s26  ;;  %v9395_v48 = vld [vmem:[%s9854_s16 + $0x30] sm:$0xff] }
0x205a   :  { %7508 = vrcp.f32 %v3880_v26  ;;  %v9431_v26 = vld [vmem:[%s9852_s14 + $0x20] sm:$0xff] }
0x2067   :  { %v7509_v27 = vpop.eup %7508 }
0x20cb   :  { %v3963_v28 = vpop.permute.xlu1 %3962 }
0x20cc   :  { %v3965_v32 = vmul.f32 %v7509_v27, %v3963_v28  ;;  %v9437_v27 = vld [vmem:[%s9854_s16 + $0x18] sm:$0xff] }
0x20cd   :  { %v9445_v28 = vld [vmem:[%s9852_s14 + $0x18] sm:$0xff] }
0x20ce   :  { %3967 = vrot.lane.b32.xlu0 %v3965_v32, %s7632_s19  ;;  %v9451_v32 = vld [vmem:[%s9854_s16 + $0x10] sm:$0xff] }
0x2140   :  { %v3968_v57 = vpop.permute.xlu0 %3967 }
0x2141   :  { %v9263_v61 = vadd.f32 %v7505_v16, %v3968_v57  ;;  %v9389_v16 = vld [vmem:[%s9852_s14 + $0x38] sm:$0xff]  ;;  %v9459_v57 = vld [vmem:[%s9852_s14 + $0x10] sm:$0xff] }
0x2143   :  { %3975 = vrot.lane.b32.xlu0 %v9263_v61, %s7633_s26  ;;  %3972 = vrot.lane.b32.xlu1 %v9263_v61, %s7631_s18 }
0x21b5   :  { %v3976_v30 = vpop.permute.xlu0 %3975  ;;  %v3973_v15 = vpop.permute.xlu1 %3972 }
0x21b6   :  { %v3978_v25 = vsel %vm128_vm0, %v3973_v15, %v3976_v30  ;;  %v9465_v30 = vld [vmem:[%s9854_s16 + $0x8] sm:$0xff] }
0x21b7   :  { %v3979_v63 = vmul.f32 %v8067_v8, %v3978_v25  ;;  %v9473_v15 = vld [vmem:[%s9852_s14 + $0x8] sm:$0xff]  ;;  %v9479_v25 = vld [vmem:[%s9854_s16] sm:$0xff] }
0x21b9   :  { %7150 = vmatmul.mubr.msk.f32.vlgmr.msra.gmra.mxu0 %vm410_vm8, %v3979_v63  ;;  %7169 = vmatmul.mubr.msk.f32.vlgmr.msra.gmra.mxu1 %vm410_vm8, %v3979_v63 }
0x21ba   :  { %7172 = vmatpush3.msra.mxu0 %v8891_v40  ;;  %7187 = vmatprep.mubr.msk.f32.mxu0 %vm7630_vm1, %v7629_v31 }
0x21bb   :  { %7173 = vmatprep.subr.mxu0 %v7629_v31  ;;  %7191 = vmatpush3.msra.mxu1 %v8775_v41  ;;  %v9309_v41 = vld [vmem:[%s9853_s15 + $0x38] sm:$0xff] }
0x21bc   :  { %7174 = vmatpush3.msra.mxu0 %v8899_v59  ;;  %7192 = vmatprep.subr.mxu1 %v7629_v31 }
0x21bd   :  { %7175 = vmatprep.subr.mxu0 %v7629_v31  ;;  %7193 = vmatpush3.msra.mxu1 %v8787_v43  ;;  %v9319_v43 = vld [vmem:[%s9853_s15 + $0x30] sm:$0xff] }
0x21be   :  { %7176 = vmatpush3.msra.mxu0 %v8909_v3  ;;  %7194 = vmatprep.subr.mxu1 %v7629_v31 }
0x21bf   :  { %7177 = vmatprep.subr.mxu0 %v7629_v31  ;;  %7195 = vmatpush3.msra.mxu1 %v8801_v47  ;;  %v9329_v47 = vld [vmem:[%s9853_s15 + $0x28] sm:$0xff] }
0x21c0   :  { %7178 = vmatpush3.msra.mxu0 %v8918_v58  ;;  %7196 = vmatprep.subr.mxu1 %v7629_v31 }
0x21c1   :  { %7179 = vmatprep.subr.mxu0 %v7629_v31  ;;  %7197 = vmatpush3.msra.mxu1 %v8815_v62  ;;  %v9336_v62 = vld [vmem:[%s9853_s15 + $0x20] sm:$0xff] }
0x21c2   :  { %7180 = vmatpush3.msra.mxu0 %v8927_v42  ;;  %7198 = vmatprep.subr.mxu1 %v7629_v31 }
0x21c3   :  { %7181 = vmatprep.subr.mxu0 %v7629_v31  ;;  %7199 = vmatpush3.msra.mxu1 %v8829_v18  ;;  %v9343_v18 = vld [vmem:[%s9853_s15 + $0x18] sm:$0xff] }
0x21c4   :  { %7182 = vmatpush3.msra.mxu0 %v8936_v44  ;;  %7200 = vmatprep.subr.mxu1 %v7629_v31 }
0x21c5   :  { %7183 = vmatprep.subr.mxu0 %v7629_v31  ;;  %7201 = vmatpush3.msra.mxu1 %v8843_v19  ;;  %v9350_v19 = vld [vmem:[%s9853_s15 + $0x10] sm:$0xff] }
0x21c6   :  { %7184 = vmatpush3.msra.mxu0 %v8945_v24  ;;  %7202 = vmatprep.subr.mxu1 %v7629_v31 }
0x21c7   :  { %7185 = vmatprep.subr.mxu0 %v7629_v31  ;;  %7203 = vmatpush3.msra.mxu1 %v8857_v52 }
0x21c8   :  { %7186 = vmatpush3.msra.mxu0 %v8954_v46  ;;  %7204 = vmatprep.subr.mxu1 %v7629_v31 }
0x21c9   :  { %7188 = vmatmul.mubr.msk.f32.vlgmr.msra.gmra.mxu0 %vm410_vm8, %v3979_v63  ;;  %7209 = vmatprep.subr.mxu0 %v7629_v31  ;;  %v9489_v63 = vld [vmem:[%s9852_s14] sm:$0xff] }
0x21ca   :  { %7210 = vmatpush3.msra.mxu0 %v9309_v41  ;;  %7205 = vmatpush3.msra.mxu1 %v8871_v56 }
0x21cb   :  { %7211 = vmatprep.subr.mxu0 %v7629_v31  ;;  %7206 = vmatprep.mubr.msk.f32.mxu1 %vm7630_vm1, %v7629_v31 }
0x21cc   :  { %7212 = vmatpush3.msra.mxu0 %v9319_v43  ;;  %7225 = vmatprep.mubr.msk.f32.mxu0 %vm7630_vm1, %v7629_v31 }
0x21cd   :  { %7213 = vmatprep.subr.mxu0 %v7629_v31  ;;  %7228 = vmatprep.subr.mxu1 %v7629_v31 }
0x21ce   :  { %7214 = vmatpush3.msra.mxu0 %v9329_v47 }
0x21cf   :  { %7215 = vmatprep.subr.mxu0 %v7629_v31 }
0x21d0   :  { %7216 = vmatpush3.msra.mxu0 %v9336_v62 }
0x21d1   :  { %7217 = vmatprep.subr.mxu0 %v7629_v31 }
0x21d2   :  { %7218 = vmatpush3.msra.mxu0 %v9343_v18 }
0x21d3   :  { %7219 = vmatprep.subr.mxu0 %v7629_v31 }
0x21d4   :  { %7220 = vmatpush3.msra.mxu0 %v9350_v19 }
0x21d5   :  { %7221 = vmatprep.subr.mxu0 %v7629_v31 }
0x21d6   :  { %7222 = vmatpush3.msra.mxu0 %v8862_v54 }
0x21d7   :  { %7223 = vmatprep.subr.mxu0 %v7629_v31 }
0x21d8   :  { %7224 = vmatpush3.msra.mxu0 %v8878_v11 }
0x21d9   :  { %7247 = vmatprep.subr.mxu0 %v7629_v31 }
0x2279   :  { %v4059_v52 = vpop.f32.mrf.mxu0  ;;  %v4129_v56 = vpop.f32.mrf.mxu1 }
0x227a   :  { %v4133_v40 = vadd.f32 %v4059_v52, %v9025_v7  ;;  %4141 = vrot.lane.b32.xlu0 %v4129_v56, %s7632_s19  ;;  %v9511_v52 = vld [vmem:[%s9853_s15 + $0x8] sm:$0xff]  ;;  %v9518_v56 = vld [vmem:[%s9853_s15] sm:$0xff] }
0x227b   :  { %v7151_v59 = vpop.f32.mrf.mxu0  ;;  %v7170_v3 = vpop.f32.mrf.mxu1 }
0x227c   :  { %v5892_v58 = vmul.f32 -1.442695, %v4133_v40 }
0x227e   :  { %7510 = vpow2.f32 %v5892_v58 }
0x2289   :  { %v4217_v42 = vpop.f32.mrf.mxu0 }
0x228a   :  { %v4218_v46 = vadd.f32 %v4217_v42, %v9035_v53 }
0x228b   :  { %v7511_v44 = vpop.eup %7510  ;;  %v7189_v24 = vpop.f32.mrf.mxu0 }
0x228c   :  { %v4137_v54 = vadd.f32 1.0, %v7511_v44 }
0x228e   :  { %7512 = vrcp.f32 %v4137_v54 }
0x229b   :  { %v7513_v11 = vpop.eup %7512 }
0x229c   :  { %v4221_v10 = vmul.f32 %v7513_v11, %v4218_v46 }
0x229e   :  { %4223 = vrot.lane.b32.xlu1 %v4221_v10, %s7631_s18 }
0x22ec   :  { %v4142_v45 = vpop.permute.xlu0 %4141 }
0x22ed   :  { %v4144_v13 = vadd.f32 %v4142_v45, %v9025_v7 }
0x22ef   :  { %v5893_v50 = vmul.f32 -1.442695, %v4144_v13 }
0x2310   :  { %v4224_v22 = vpop.permute.xlu1 %4223 }
0x2311   :  { %v4226_v33 = vadd.f32 %v4224_v22, %v9025_v7 }
0x2313   :  { %7514 = vtanh.f32 %v4226_v33 }
0x2314   :  { %7516 = vpow2.f32 %v5893_v50 }
0x2320   :  { %v7515_v1 = vpop.eup %7514 }
0x2321   :  { %v4228_v5 = vsub.f32 %v9263_v61, %v7515_v1  ;;  %v7517_v35 = vpop.eup %7516 }
0x2322   :  { %v4148_v34 = vadd.f32 1.0, %v7517_v35 }
0x2323   :  { %4230 = vrot.lane.b32.xlu1 %v4228_v5, %s7633_s26 }
0x2324   :  { %7518 = vrcp.f32 %v4148_v34 }
0x2331   :  { %v7519_v4 = vpop.eup %7518 }
0x2395   :  { %v4231_v6 = vpop.permute.xlu1 %4230 }
0x2396   :  { %v4233_v55 = vmul.f32 %v7519_v4, %v4231_v6 }
0x2398   :  { %4235 = vrot.lane.b32.xlu0 %v4233_v55, %s7632_s19 }
0x240a   :  { %v4236_v36 = vpop.permute.xlu0 %4235 }
0x240b   :  { %v9367_v23 = vadd.f32 %v7515_v1, %v4236_v36 }
0x240d   :  { %4243 = vrot.lane.b32.xlu0 %v9367_v23, %s7633_s26  ;;  %4240 = vrot.lane.b32.xlu1 %v9367_v23, %s7631_s18 }
0x247f   :  { %v4244_v7 = vpop.permute.xlu0 %4243  ;;  %v4241_v14 = vpop.permute.xlu1 %4240 }
0x2480   :  { %v4246_v38 = vsel %vm128_vm0, %v4241_v14, %v4244_v7 }
0x2481   :  { %v4247_v21 = vmul.f32 %v8067_v8, %v4246_v38 }
0x2483   :  { %7207 = vmatmul.mubr.msk.f32.vlgmr.msra.gmra.mxu1 %vm410_vm8, %v4247_v21  ;;  %7226 = vmatmul.mubr.msk.f32.vlgmr.msra.gmra.mxu0 %vm410_vm8, %v4247_v21 }
0x2484   :  { %7229 = vmatpush3.msra.mxu1 %v9380_v29  ;;  %7244 = vmatprep.mubr.msk.f32.mxu1 %vm7630_vm1, %v7629_v31 }
0x2485   :  { %7230 = vmatprep.subr.mxu1 %v7629_v31  ;;  %7248 = vmatpush3.msra.mxu0 %v9389_v16 }
0x2486   :  { %7231 = vmatpush3.msra.mxu1 %v9395_v48  ;;  %7249 = vmatprep.subr.mxu0 %v7629_v31 }
0x2487   :  { %7232 = vmatprep.subr.mxu1 %v7629_v31  ;;  %7250 = vmatpush3.msra.mxu0 %v9403_v60 }
0x2488   :  { %7233 = vmatpush3.msra.mxu1 %v9409_v37  ;;  %7251 = vmatprep.subr.mxu0 %v7629_v31 }
0x2489   :  { %7234 = vmatprep.subr.mxu1 %v7629_v31  ;;  %7252 = vmatpush3.msra.mxu0 %v9417_v39 }
0x248a   :  { %7235 = vmatpush3.msra.mxu1 %v9423_v49  ;;  %7253 = vmatprep.subr.mxu0 %v7629_v31 }
0x248b   :  { %7236 = vmatprep.subr.mxu1 %v7629_v31  ;;  %7254 = vmatpush3.msra.mxu0 %v9431_v26 }
0x248c   :  { %7237 = vmatpush3.msra.mxu1 %v9437_v27  ;;  %7255 = vmatprep.subr.mxu0 %v7629_v31 }
0x248d   :  { %7238 = vmatprep.subr.mxu1 %v7629_v31  ;;  %7256 = vmatpush3.msra.mxu0 %v9445_v28 }
0x248e   :  { %7239 = vmatpush3.msra.mxu1 %v9451_v32  ;;  %7257 = vmatprep.subr.mxu0 %v7629_v31 }
0x248f   :  { %7240 = vmatprep.subr.mxu1 %v7629_v31  ;;  %7258 = vmatpush3.msra.mxu0 %v9459_v57 }
0x2490   :  { %7241 = vmatpush3.msra.mxu1 %v9465_v30  ;;  %7259 = vmatprep.subr.mxu0 %v7629_v31 }
0x2491   :  { %7242 = vmatprep.subr.mxu1 %v7629_v31  ;;  %7260 = vmatpush3.msra.mxu0 %v9473_v15 }
0x2492   :  { %7243 = vmatpush3.msra.mxu1 %v9479_v25  ;;  %7261 = vmatprep.subr.mxu0 %v7629_v31 }
0x2493   :  { %7245 = vmatmul.mubr.msk.f32.vlgmr.msra.gmra.mxu1 %vm410_vm8, %v4247_v21  ;;  %7266 = vmatprep.subr.mxu1 %v7629_v31 }
0x2494   :  { %7267 = vmatpush3.msra.mxu1 %v9309_v41  ;;  %7262 = vmatpush3.msra.mxu0 %v9489_v63 }
0x2495   :  { %7268 = vmatprep.subr.mxu1 %v7629_v31  ;;  %7263 = vmatprep.mubr.msk.f32.mxu0 %vm7630_vm1, %v7629_v31 }
0x2496   :  { %7269 = vmatpush3.msra.mxu1 %v9319_v43  ;;  %7282 = vmatprep.mubr.msk.f32.mxu1 %vm7630_vm1, %v7629_v31 }
0x2497   :  { %7270 = vmatprep.subr.mxu1 %v7629_v31  ;;  %7285 = vmatprep.subr.mxu0 %v7629_v31 }
0x2498   :  { %7271 = vmatpush3.msra.mxu1 %v9329_v47 }
0x2499   :  { %7272 = vmatprep.subr.mxu1 %v7629_v31 }
0x249a   :  { %7273 = vmatpush3.msra.mxu1 %v9336_v62 }
0x249b   :  { %7274 = vmatprep.subr.mxu1 %v7629_v31 }
0x249c   :  { %7275 = vmatpush3.msra.mxu1 %v9343_v18 }
0x249d   :  { %7276 = vmatprep.subr.mxu1 %v7629_v31 }
0x249e   :  { %7277 = vmatpush3.msra.mxu1 %v9350_v19 }
0x249f   :  { %7278 = vmatprep.subr.mxu1 %v7629_v31 }
0x24a0   :  { %7279 = vmatpush3.msra.mxu1 %v9511_v52 }
0x24a1   :  { %7280 = vmatprep.subr.mxu1 %v7629_v31 }
0x24a2   :  { %7281 = vmatpush3.msra.mxu1 %v9518_v56 }
0x24a3   :  { %7304 = vmatprep.subr.mxu1 %v7629_v31 }
0x2543   :  { %v4327_v40 = vpop.f32.mrf.mxu1  ;;  %v4397_v59 = vpop.f32.mrf.mxu0 }
0x2544   :  { %v4401_v3 = vadd.f32 %v4327_v40, %v9028_v9  ;;  %4409 = vrot.lane.b32.xlu0 %v4397_v59, %s7632_s19 }
0x2545   :  { %v7208_v58 = vpop.f32.mrf.mxu1  ;;  %v7227_v42 = vpop.f32.mrf.mxu0 }
0x2546   :  { %v5897_v44 = vmul.f32 -1.442695, %v4401_v3 }
0x2548   :  { %7520 = vpow2.f32 %v5897_v44 }
0x2553   :  { %v4485_v24 = vpop.f32.mrf.mxu1 }
0x2554   :  { %v4486_v10 = vadd.f32 %v4485_v24, %v9035_v53 }
0x2555   :  { %v7521_v54 = vpop.eup %7520  ;;  %v7246_v46 = vpop.f32.mrf.mxu1 }
0x2556   :  { %v4405_v11 = vadd.f32 1.0, %v7521_v54 }
0x2558   :  { %7522 = vrcp.f32 %v4405_v11 }
0x2565   :  { %v7523_v22 = vpop.eup %7522 }
0x2566   :  { %v4489_v33 = vmul.f32 %v7523_v22, %v4486_v10 }
0x2568   :  { %4491 = vrot.lane.b32.xlu1 %v4489_v33, %s7631_s18 }
0x25b6   :  { %v4410_v50 = vpop.permute.xlu0 %4409 }
0x25b7   :  { %v4412_v35 = vadd.f32 %v4410_v50, %v9028_v9 }
0x25b9   :  { %v5898_v34 = vmul.f32 -1.442695, %v4412_v35 }
0x25da   :  { %v4492_v1 = vpop.permute.xlu1 %4491 }
0x25db   :  { %v4494_v5 = vadd.f32 %v4492_v1, %v9028_v9 }
0x25dd   :  { %7524 = vtanh.f32 %v4494_v5 }
0x25de   :  { %7526 = vpow2.f32 %v5898_v34 }
0x25ea   :  { %v7525_v45 = vpop.eup %7524 }
0x25eb   :  { %v4496_v13 = vsub.f32 %v9367_v23, %v7525_v45  ;;  %v7527_v4 = vpop.eup %7526 }
0x25ec   :  { %v4416_v53 = vadd.f32 1.0, %v7527_v4 }
0x25ed   :  { %4498 = vrot.lane.b32.xlu1 %v4496_v13, %s7633_s26 }
0x25ee   :  { %7528 = vrcp.f32 %v4416_v53 }
0x25fb   :  { %v7529_v6 = vpop.eup %7528 }
0x265f   :  { %v4499_v55 = vpop.permute.xlu1 %4498 }
0x2660   :  { %v4501_v36 = vmul.f32 %v7529_v6, %v4499_v55 }
0x2662   :  { %4503 = vrot.lane.b32.xlu0 %v4501_v36, %s7632_s19 }
0x26d4   :  { %v4504_v7 = vpop.permute.xlu0 %4503 }
0x26d5   :  { %v9531_v14 = vadd.f32 %v7525_v45, %v4504_v7 }
0x26d7   :  { %4511 = vrot.lane.b32.xlu0 %v9531_v14, %s7633_s26  ;;  %4508 = vrot.lane.b32.xlu1 %v9531_v14, %s7631_s18 }
0x2749   :  { %v4512_v9 = vpop.permute.xlu0 %4511  ;;  %v4509_v38 = vpop.permute.xlu1 %4508 }
0x274a   :  { %v4514_v21 = vsel %vm128_vm0, %v4509_v38, %v4512_v9 }
0x274b   :  { %v4515_v40 = vmul.f32 %v8067_v8, %v4514_v21 }
0x274d   :  { %7264 = vmatmul.mubr.msk.f32.vlgmr.msra.gmra.mxu0 %vm410_vm8, %v4515_v40  ;;  %7283 = vmatmul.mubr.msk.f32.vlgmr.msra.gmra.mxu1 %vm410_vm8, %v4515_v40 }
0x274e   :  { %7286 = vmatpush3.msra.mxu0 %v9380_v29  ;;  %7301 = vmatprep.mubr.msk.f32.mxu0 %vm7630_vm1, %v7629_v31 }
0x274f   :  { %7287 = vmatprep.subr.mxu0 %v7629_v31  ;;  %7305 = vmatpush3.msra.mxu1 %v9389_v16 }
0x2750   :  { %7288 = vmatpush3.msra.mxu0 %v9395_v48  ;;  %7306 = vmatprep.subr.mxu1 %v7629_v31 }
0x2751   :  { %7289 = vmatprep.subr.mxu0 %v7629_v31  ;;  %7307 = vmatpush3.msra.mxu1 %v9403_v60 }
0x2752   :  { %7290 = vmatpush3.msra.mxu0 %v9409_v37  ;;  %7308 = vmatprep.subr.mxu1 %v7629_v31 }
0x2753   :  { %7291 = vmatprep.subr.mxu0 %v7629_v31  ;;  %7309 = vmatpush3.msra.mxu1 %v9417_v39 }
0x2754   :  { %7292 = vmatpush3.msra.mxu0 %v9423_v49  ;;  %7310 = vmatprep.subr.mxu1 %v7629_v31 }
0x2755   :  { %7293 = vmatprep.subr.mxu0 %v7629_v31  ;;  %7311 = vmatpush3.msra.mxu1 %v9431_v26 }
0x2756   :  { %7294 = vmatpush3.msra.mxu0 %v9437_v27  ;;  %7312 = vmatprep.subr.mxu1 %v7629_v31 }
0x2757   :  { %7295 = vmatprep.subr.mxu0 %v7629_v31  ;;  %7313 = vmatpush3.msra.mxu1 %v9445_v28  ;;  %v9601_v28 = vld [vmem:[%s9851_s13] sm:$0xf]  ;;  %s7636_s13 = smov [#allocation2]  }
0x2758   :  { %7296 = vmatpush3.msra.mxu0 %v9451_v32  ;;  %7314 = vmatprep.subr.mxu1 %v7629_v31 }
0x2759   :  { %7297 = vmatprep.subr.mxu0 %v7629_v31  ;;  %7315 = vmatpush3.msra.mxu1 %v9459_v57 }
0x275a   :  { %7298 = vmatpush3.msra.mxu0 %v9465_v30  ;;  %7316 = vmatprep.subr.mxu1 %v7629_v31 }
0x275b   :  { %7299 = vmatprep.subr.mxu0 %v7629_v31  ;;  %7317 = vmatpush3.msra.mxu1 %v9473_v15 }
0x275c   :  { %7300 = vmatpush3.msra.mxu0 %v9479_v25  ;;  %7318 = vmatprep.subr.mxu1 %v7629_v31 }
0x275d   :  { %7302 = vmatmul.mubr.msk.f32.vlgmr.msra.gmra.mxu0 %vm410_vm8, %v4515_v40  ;;  %7323 = vmatprep.subr.mxu0 %v7629_v31 }
0x275e   :  { %7324 = vmatpush3.msra.mxu0 %v9309_v41  ;;  %7319 = vmatpush3.msra.mxu1 %v9489_v63 }
0x275f   :  { %7325 = vmatprep.subr.mxu0 %v7629_v31  ;;  %7320 = vmatprep.mubr.msk.f32.mxu1 %vm7630_vm1, %v7629_v31 }
0x2760   :  { %7326 = vmatpush3.msra.mxu0 %v9319_v43  ;;  %7339 = vmatprep.mubr.msk.f32.mxu0 %vm7630_vm1, %v7629_v31 }
0x2761   :  { %7327 = vmatprep.subr.mxu0 %v7629_v31  ;;  %7342 = vmatprep.subr.mxu1 %v7629_v31 }
0x2762   :  { %7328 = vmatpush3.msra.mxu0 %v9329_v47 }
0x2763   :  { %7329 = vmatprep.subr.mxu0 %v7629_v31 }
0x2764   :  { %7330 = vmatpush3.msra.mxu0 %v9336_v62 }
0x2765   :  { %7331 = vmatprep.subr.mxu0 %v7629_v31 }
0x2766   :  { %7332 = vmatpush3.msra.mxu0 %v9343_v18 }
0x2767   :  { %7333 = vmatprep.subr.mxu0 %v7629_v31 }
0x2768   :  { %7334 = vmatpush3.msra.mxu0 %v9350_v19 }
0x2769   :  { %7335 = vmatprep.subr.mxu0 %v7629_v31 }
0x276a   :  { %7336 = vmatpush3.msra.mxu0 %v9511_v52 }
0x276b   :  { %7337 = vmatprep.subr.mxu0 %v7629_v31 }
0x276c   :  { %7338 = vmatpush3.msra.mxu0 %v9518_v56 }
0x276d   :  { %7361 = vmatprep.subr.mxu0 %v7629_v31 }
0x280d   :  { %v4595_v41 = vpop.f32.mrf.mxu0  ;;  %v4665_v43 = vpop.f32.mrf.mxu1 }
0x280e   :  { %v4669_v47 = vadd.f32 %v4595_v41, %v9019_v20  ;;  %4677 = vrot.lane.b32.xlu0 %v4665_v43, %s7632_s19 }
0x280f   :  { %v7265_v62 = vpop.f32.mrf.mxu0  ;;  %v7284_v18 = vpop.f32.mrf.mxu1 }
0x2810   :  { %v5903_v16 = vmul.f32 -1.442695, %v4669_v47  ;;  %v5435_v47 = vrot.slane %v9041_v2, 2  ;;  %v7635_v62 = vmov 1966171168  }
0x2811   :  { %v5044_v18 = vunpack.c.l.s4 %v7635_v62 }
0x2812   :  { %7530 = vpow2.f32 %v5903_v16 }
0x2813   :  { %v5045_v16 = vunpack.c.0.s8 %v5044_v18 }
0x281d   :  { %v4753_v19 = vpop.f32.mrf.mxu0 }
0x281e   :  { %v4754_v57 = vadd.f32 %v9601_v28, %v4753_v19  ;;  %v9658_v19 = vsub.s32 %v5045_v16, %v7755_v12 }
0x281f   :  { %v7531_v60 = vpop.eup %7530  ;;  %v7303_v39 = vpop.f32.mrf.mxu0 }
0x2820   :  { %v4673_v26 = vadd.f32 1.0, %v7531_v60  ;;  %v5049_v60 = vrot.slane %v9041_v2, %v9658_v19  ;;  %v5095_v39 = vrot.slane %v9189_v51, %v9658_v19  ;;  %v5139_v2 = vrot.slane %v9367_v23, %v9658_v19 }
0x2822   :  { %7532 = vrcp.f32 %v4673_v26 }
0x282f   :  { %v7533_v15 = vpop.eup %7532 }
0x2830   :  { %v4757_v63 = vmul.f32 %v7533_v15, %v4754_v57  ;;  %v5117_v57 = vrot.slane %v9263_v61, %v9658_v19 }
0x2832   :  { %4759 = vrot.lane.b32.xlu1 %v4757_v63, %s7631_s18  ;;  %v5096_v63 = vcombine.high %v5095_v39, %v5095_v39  ;;  %v5118_v61 = vcombine.high %v5117_v57, %v5117_v57 }
0x2880   :  { %v4678_v58 = vpop.permute.xlu0 %4677 }
0x2881   :  { %v4680_v42 = vadd.f32 %v4678_v58, %v9019_v20 }
0x2883   :  { %v5904_v44 = vmul.f32 -1.442695, %v4680_v42  ;;  %v9697_v42 = vrot.slane %v5049_v60, %v9658_v19 }
0x28a4   :  { %v4760_v52 = vpop.permute.xlu1 %4759 }
0x28a5   :  { %v4762_v56 = vadd.f32 %v4760_v52, %v9019_v20 }
0x28a7   :  { %7534 = vtanh.f32 %v4762_v56  ;;  %v9683_v56 = vrot.slane %v5095_v39, %v9658_v19 }
0x28a8   :  { %7536 = vpow2.f32 %v5904_v44  ;;  %v5125_v44 = vrot.slane %v5117_v57, %v9658_v19 }
0x28b4   :  { %v7535_v59 = vpop.eup %7534 }
0x28b5   :  { %v4764_v3 = vsub.f32 %v9531_v14, %v7535_v59  ;;  %v7537_v24 = vpop.eup %7536 }
0x28b6   :  { %v4684_v54 = vadd.f32 1.0, %v7537_v24  ;;  %v5140_v24 = vcombine.high %v5139_v2, %v5139_v2 }
0x28b7   :  { %4766 = vrot.lane.b32.xlu1 %v4764_v3, %s7633_s26  ;;  %v9688_v3 = vrot.slane %v5096_v63, %v9658_v19 }
0x28b8   :  { %7538 = vrcp.f32 %v4684_v54 }
0x28c5   :  { %v7539_v46 = vpop.eup %7538 }
0x2929   :  { %v4767_v11 = vpop.permute.xlu1 %4766 }
0x292a   :  { %v4769_v10 = vmul.f32 %v7539_v46, %v4767_v11  ;;  %v9703_v46 = vrot.slane %v5118_v61, %v9658_v19 }
0x292c   :  { %4771 = vrot.lane.b32.xlu0 %v4769_v10, %s7632_s19 }
0x299e   :  { %v4772_v22 = vpop.permute.xlu0 %4771 }
0x299f   :  { %v9610_v33 = vadd.f32 %v7535_v59, %v4772_v22 }
0x29a1   :  { %4779 = vrot.lane.b32.xlu0 %v9610_v33, %s7633_s26  ;;  %4776 = vrot.lane.b32.xlu1 %v9610_v33, %s7631_s18  ;;  %v5183_v23 = vrot.slane %v9610_v33, %v9658_v19 }
0x2a13   :  { %v4780_v20 = vpop.permute.xlu0 %4779  ;;  %v4777_v1 = vpop.permute.xlu1 %4776 }
0x2a14   :  { %v4782_v5 = vsel %vm128_vm0, %v4777_v1, %v4780_v20  ;;  %v9714_v20 = vrot.slane %v5139_v2, %v9658_v19  ;;  %v5184_v1 = vcombine.high %v5183_v23, %v5183_v23 }
0x2a15   :  { %v4783_v45 = vmul.f32 %v8067_v8, %v4782_v5 }
0x2a17   :  { %7321 = vmatmul.mubr.msk.f32.vlgmr.msra.gmra.mxu1 %vm410_vm8, %v4783_v45  ;;  %7340 = vmatmul.mubr.msk.f32.vlgmr.msra.gmra.mxu0 %vm410_vm8, %v4783_v45 }
0x2a18   :  { %7343 = vmatpush3.msra.mxu1 %v9380_v29  ;;  %7358 = vmatprep.mubr.msk.f32.mxu1 %vm7630_vm1, %v7629_v31 }
0x2a19   :  { %7344 = vmatprep.subr.mxu1 %v7629_v31  ;;  %7363 = vmatprep.mubr.msk.f32.mxu0 %vm7630_vm1, %v7629_v31 }
0x2a1a   :  { %7345 = vmatpush3.msra.mxu1 %v9395_v48 }
0x2a1b   :  { %7346 = vmatprep.subr.mxu1 %v7629_v31 }
0x2a1c   :  { %7347 = vmatpush3.msra.mxu1 %v9409_v37 }
0x2a1d   :  { %7348 = vmatprep.subr.mxu1 %v7629_v31 }
0x2a1e   :  { %7349 = vmatpush3.msra.mxu1 %v9423_v49 }
0x2a1f   :  { %7350 = vmatprep.subr.mxu1 %v7629_v31 }
0x2a20   :  { %7351 = vmatpush3.msra.mxu1 %v9437_v27 }
0x2a21   :  { %7352 = vmatprep.subr.mxu1 %v7629_v31 }
0x2a22   :  { %7353 = vmatpush3.msra.mxu1 %v9451_v32 }
0x2a23   :  { %7354 = vmatprep.subr.mxu1 %v7629_v31 }
0x2a24   :  { %7355 = vmatpush3.msra.mxu1 %v9465_v30 }
0x2a25   :  { %7356 = vmatprep.subr.mxu1 %v7629_v31 }
0x2a26   :  { %7357 = vmatpush3.msra.mxu1 %v9479_v25 }
0x2a27   :  { %7359 = vmatmul.mubr.msk.f32.vlgmr.msra.gmra.mxu1 %vm410_vm8, %v4783_v45  ;;  %7366 = vmatprep.subr.mxu1 %v7629_v31 }
0x2a28   :  { %7368 = vmatprep.mubr.msk.f32.mxu1 %vm7630_vm1, %v7629_v31 }
0x2ad7   :  { %v4863_v8 = vpop.f32.mrf.mxu1  ;;  %v4933_v29 = vpop.f32.mrf.mxu0 }
0x2ad8   :  { %v4937_v48 = vadd.f32 %v4863_v8, %v9022_v0  ;;  %4945 = vrot.lane.b32.xlu0 %v4933_v29, %s7632_s19  ;;  %v5324_v8 = vcombine.high %v9683_v56, %v9683_v56 }
0x2ad9   :  { %v7322_v37 = vpop.f32.mrf.mxu1  ;;  %v7341_v49 = vpop.f32.mrf.mxu0 }
0x2ada   :  { %v5908_v27 = vmul.f32 -1.442695, %v4937_v48  ;;  %v5322_v48 = vcombine.high %v5125_v44, %v5125_v44  ;;  %v5154_v37 = vrot.slane %v5140_v24, %v9658_v19 }
0x2adc   :  { %7540 = vpow2.f32 %v5908_v27  ;;  %v9727_v27 = vrot.slane %v5183_v23, %v9658_v19 }
0x2ae7   :  { %v5021_v32 = vpop.f32.mrf.mxu1 }
0x2ae8   :  { %v5022_v50 = vadd.f32 %v9601_v28, %v5021_v32  ;;  %v5050_v28 = vcombine.high %v5049_v60, %v5049_v60 }
0x2ae9   :  { %v7541_v30 = vpop.eup %7540  ;;  %v7360_v25 = vpop.f32.mrf.mxu1 }
0x2aea   :  { %v4941_v13 = vadd.f32 1.0, %v7541_v30  ;;  %v9680_v51 = vrot.slane %v5050_v28, %v9658_v19 }
0x2aec   :  { %7542 = vrcp.f32 %v4941_v13 }
0x2af9   :  { %v7543_v35 = vpop.eup %7542 }
0x2afa   :  { %v5025_v34 = vmul.f32 %v7543_v35, %v5022_v50  ;;  %v5325_v35 = vcombine.high %v9688_v3, %v9688_v3 }
0x2afc   :  { %5027 = vrot.lane.b32.xlu1 %v5025_v34, %s7631_s18  ;;  %v5323_v34 = vcombine.high %v9703_v46, %v9703_v46 }
0x2b4a   :  { %v4946_v36 = vpop.permute.xlu0 %4945 }
0x2b4b   :  { %v4948_v7 = vadd.f32 %v4946_v36, %v9022_v0 }
0x2b4d   :  { %v5909_v9 = vmul.f32 -1.442695, %v4948_v7 }
0x2b6e   :  { %v5028_v4 = vpop.permute.xlu1 %5027 }
0x2b6f   :  { %v5030_v53 = vadd.f32 %v5028_v4, %v9022_v0  ;;  %v5073_v0 = vrot.slane %v9115_v17, %v9658_v19  ;;  %v9675_v17 = vsub.s32 0, %v7755_v12  ;;  %v5161_v12 = vrot.slane %v9531_v14, %v9658_v19 }
0x2b70   :  { %v5329_v14 = vcombine.high %v9680_v51, %v9680_v51  ;;  %v5320_v4 = vcombine.high %v9714_v20, %v9714_v20 }
0x2b71   :  { %7544 = vtanh.f32 %v5030_v53  ;;  %v5074_v26 = vcombine.high %v5073_v0, %v5073_v0  ;;  %v9669_v15 = vrot.slane %v5073_v0, %v9658_v19  ;;  %v5235_v54 = vrot.slane %v9683_v56, %v9675_v17 }
0x2b72   :  { %7546 = vpow2.f32 %v5909_v9  ;;  %v5239_v11 = vrot.slane %v9688_v3, %v9675_v17  ;;  %v5162_v10 = vcombine.high %v5161_v12, %v5161_v12  ;;  %v5245_v29 = vrot.slane %v5125_v44, %v9675_v17 }
0x2b73   :  { %v9672_v52 = vrot.slane %v5074_v26, %v9658_v19  ;;  %v5225_v59 = vrot.slane %v9669_v15, %v9675_v17  ;;  %v5249_v49 = vrot.slane %v9703_v46, %v9675_v17  ;;  %v5169_v30 = vrot.slane %v5161_v12, %v9658_v19 }
0x2b74   :  { %v5176_v25 = vrot.slane %v5162_v10, %v9658_v19  ;;  %v5363_v36 = vrot.slane %v5322_v48, %v9675_v17  ;;  %v5259_v7 = vrot.slane %v5154_v37, %v9675_v17  ;;  %v5321_v9 = vcombine.high %v5154_v37, %v5154_v37 }
0x2b75   :  { %v5229_v58 = vrot.slane %v9672_v52, %v9675_v17  ;;  %v5293_v22 = vsel %vm5292_vm9, %v9697_v42, %v5225_v59  ;;  %v5327_v45 = vcombine.high %v9672_v52, %v9672_v52  ;;  %v5353_v18 = vrot.slane %v5320_v4, %v9675_v17 }
0x2b76   :  { %v5295_v32 = vsel %vm408_vm2, %v5293_v22, %v5235_v54  ;;  %v5269_v62 = vrot.slane %v5176_v25, %v9675_v17  ;;  %v5357_v39 = vrot.slane %v5321_v9, %v9675_v17  ;;  %v5265_v61 = vrot.slane %v5169_v30, %v9675_v17 }
0x2b77   :  { %v5294_v5 = vsel %vm5292_vm9, %v9680_v51, %v5229_v58  ;;  %v5397_v56 = vrot.slane %v5329_v14, %v9675_v17 }
0x2b78   :  { %v5296_v50 = vsel %vm408_vm2, %v5294_v5, %v5239_v11  ;;  %v5275_v11 = vrot.slane %v9727_v27, %v9675_v17 }
0x2b7e   :  { %v9648_v6 = vpop.eup %7544 }
0x2b7f   :  { %v5032_v55 = vsub.f32 %v9610_v33, %v9648_v6  ;;  %v7547_v38 = vpop.eup %7546  ;;  %v5326_v33 = vcombine.high %v9669_v15, %v9669_v15 }
0x2b80   :  { %v4952_v21 = vadd.f32 1.0, %v7547_v38  ;;  %v5298_v38 = vsel %vm5297_vm10, %v5295_v32, %v5245_v29  ;;  %v5367_v29 = vrot.slane %v5323_v34, %v9675_v17  ;;  %v5328_v34 = vcombine.high %v9697_v42, %v9697_v42 }
0x2b81   :  { %5034 = vrot.lane.b32.xlu1 %v5032_v55, %s7633_s26  ;;  %v5198_v55 = vrot.slane %v5184_v1, %v9658_v19  ;;  %v5383_v42 = vrot.slane %v5326_v33, %v9675_v17 }
0x2b82   :  { %7548 = vrcp.f32 %v4952_v21  ;;  %v5316_v21 = vcombine.high %v9727_v27, %v9727_v27  ;;  %v5377_v27 = vrot.slane %v5325_v35, %v9675_v17  ;;  %v5393_v14 = vrot.slane %v5328_v34, %v9675_v17 }
0x2b83   :  { %v5317_v60 = vcombine.high %v5198_v55, %v5198_v55  ;;  %v5279_v26 = vrot.slane %v5198_v55, %v9675_v17 }
0x2b84   :  { %v5333_v57 = vrot.slane %v5316_v21, %v9675_v17 }
0x2b85   :  { %v5337_v24 = vrot.slane %v5317_v60, %v9675_v17 }
0x2b8f   :  { %v7549_v40 = vpop.eup %7548 }
0x2bf3   :  { %v5035_v41 = vpop.permute.xlu1 %5034 }
0x2bf4   :  { %v5037_v43 = vmul.f32 %v7549_v40, %v5035_v41  ;;  %v5299_v41 = vsel %vm5297_vm10, %v5296_v50, %v5249_v49 }
0x2bf5   :  { %v5302_v28 = vsel %vm5300_vm11, %v5299_v41, %v5259_v7 }
0x2bf6   :  { %5039 = vrot.lane.b32.xlu0 %v5037_v43, %s7632_s19  ;;  %v5318_v43 = vcombine.high %v5169_v30, %v5169_v30  ;;  %v5305_v12 = vsel %vm5303_vm12, %v5302_v28, %v5269_v62  ;;  %v5373_v30 = vrot.slane %v5324_v8, %v9675_v17 }
0x2bf7   :  { %v5308_v46 = vsel %vm5306_vm13, %v5305_v12, %v5279_v26 }
0x2bf8   :  { %v5343_v59 = vrot.slane %v5318_v43, %v9675_v17 }
0x2bfa   :  { %5436 = vrot.lane.b32.xlu0 %v5435_v47, %s7633_s26  ;;  %v5319_v47 = vcombine.high %v5176_v25, %v5176_v25 }
0x2bfc   :  { %v5347_v3 = vrot.slane %v5319_v47, %v9675_v17 }
0x2c68   :  { %v5040_v13 = vpop.permute.xlu0 %5039 }
0x2c69   :  { %v5042_v53 = vadd.f32 %v9648_v6, %v5040_v13  ;;  %v5255_v6 = vrot.slane %v9714_v20, %v9675_v17  ;;  %v5387_v13 = vrot.slane %v5327_v45, %v9675_v17 }
0x2c6b   :  { %v5206_v40 = vrot.slane %v5042_v53, %v9658_v19  ;;  %5432 = vrot.lane.b32.xlu1 %v5042_v53, %s7631_s18  ;;  %v5301_v5 = vsel %vm5300_vm11, %v5298_v38, %v5255_v6 }
0x2c6c   :  { %v5304_v49 = vsel %vm5303_vm12, %v5301_v5, %v5265_v61 }
0x2c6d   :  { %v5207_v16 = vcombine.high %v5206_v40, %v5206_v40  ;;  %v5214_v0 = vrot.slane %v5206_v40, %v9658_v19  ;;  %v5307_v25 = vsel %vm5306_vm13, %v5304_v49, %v5275_v11 }
0x2c6f   :  { %v5221_v63 = vrot.slane %v5207_v16, %v9658_v19  ;;  %v5312_v2 = vcombine.high %v5214_v0, %v5214_v0  ;;  %v5285_v10 = vrot.slane %v5214_v0, %v9675_v17 }
0x2c71   :  { %v5313_v58 = vcombine.high %v5221_v63, %v5221_v63  ;;  %v5400_v23 = vsel %vm5292_vm9, %v5312_v2, %v5333_v57  ;;  %v5289_v44 = vrot.slane %v5221_v63, %v9675_v17  ;;  %v5310_v35 = vsel %vm5309_vm14, %v5307_v25, %v5285_v10 }
0x2c72   :  { %v5402_v54 = vsel %vm408_vm2, %v5400_v23, %v5343_v59 }
0x2c73   :  { %v5311_v22 = vsel %vm5309_vm14, %v5308_v46, %v5289_v44  ;;  %v5401_v20 = vsel %vm5292_vm9, %v5313_v58, %v5337_v24  ;;  %v5404_v1 = vsel %vm5297_vm10, %v5402_v54, %v5353_v18 }
0x2c74   :  { %5418 = vrot.lane.b32.xlu1 %v5311_v22, %s7631_s18  ;;  %v5403_v48 = vsel %vm408_vm2, %v5401_v20, %v5347_v3  ;;  %v5406_v37 = vsel %vm5300_vm11, %v5404_v1, %v5363_v36  ;;  %v5437_v36 = vpop.permute.xlu0 %5436 }
0x2c75   :  { %v5405_v32 = vsel %vm5297_vm10, %v5403_v48, %v5357_v39  ;;  %v5408_v4 = vsel %vm5303_vm12, %v5406_v37, %v5373_v30 }
0x2c76   :  { %v5407_v50 = vsel %vm5300_vm11, %v5405_v32, %v5367_v29  ;;  %v5410_v51 = vsel %vm5306_vm13, %v5408_v4, %v5383_v42 }
0x2c77   :  { %v5409_v8 = vsel %vm5303_vm12, %v5407_v50, %v5377_v27  ;;  %v5412_v53 = vsel %vm5309_vm14, %v5410_v51, %v5393_v14 }
0x2c78   :  { %5416 = vrot.lane.b32.xlu1 %v5310_v35, %s7631_s18  ;;  %v5411_v52 = vsel %vm5306_vm13, %v5409_v8, %v5387_v13  ;;  %s5808_s18 = sshll.u32 %s7636_s13, 4  ;;  %s5809_s18 = int_to_ptr.vmem [resolvable:$true] %s5808_s18 }
0x2c79   :  { %v5413_v45 = vsel %vm5309_vm14, %v5411_v52, %v5397_v56  ;;  %s7606_s19 = scalar_lea.vmem %s5809_s18, 32  ;;  %p7611_p1 = scmp.lt.s32.totalorder %s5809_s18, %s5809_s18 }
0x2c7a   :  { %5426 = vrot.lane.b32.xlu0 %v5413_v45, %s7633_s26  ;;  %p7607_p0 = scmp.ne.s32.totalorder %s5809_s18, %s7606_s19  ;;  %p7612_p2 = scmp.lt.s32.totalorder %s7606_s19, %s7606_s19 }
0x2c7c   :  { %p7613_p3 = por %p7612_p2, %p7611_p1 }
0x2c7e   :  { %5424 = vrot.lane.b32.xlu0 %v5412_v53, %s7633_s26  ;;  %p7614_p4 = pnand %p7613_p3, %p7607_p0 }
0x2cdd   :  { %v5433_v55 = vpop.permute.xlu1 %5432 }
0x2cde   :  { %v5439_v7 = vsel %vm128_vm0, %v5433_v55, %v5437_v36 }
0x2cdf   :  { %v5447_v9 = vrot.slane %v5439_v7, %v9658_v19 }
0x2ce1   :  { %v5448_v33 = vcombine.high %v5447_v9, %v5447_v9  ;;  %v5455_v43 = vrot.slane %v5447_v9, %v9658_v19 }
0x2ce3   :  { %v5462_v40 = vrot.slane %v5448_v33, %v9658_v19 }
0x2ce6   :  { %v5419_v15 = vpop.permute.xlu1 %5418 }
0x2cea   :  { %v5417_v17 = vpop.permute.xlu1 %5416 }
0x2cec   :  { %v5427_v38 = vpop.permute.xlu0 %5426 }
0x2ced   :  { %v5431_v21 = vsel %vm128_vm0, %v5419_v15, %v5427_v38 }
0x2cee   :  { %7367 = vmatpush3.xpose.msk.msra.mxu1 %vm410_vm8, %v5431_v21 }
0x2cef   :  { %7376 = vmatprep.subr.mxu1 %v7629_v31 }
0x2cf0   :  { %v5425_v41 = vpop.permute.xlu0 %5424 }
0x2cf1   :  { %v5430_v6 = vsel %vm128_vm0, %v5417_v17, %v5425_v41  ;;  %7369 = vmatmul.mubr.msk.f32.vlgmr.msra.gmra.mxu1 %vm410_vm8, %v5462_v40  ;;  %vm5619_vm0 = vcmask 58368  }
0x2cf2   :  { %7362 = vmatpush3.xpose.msk.msra.mxu0 %vm410_vm8, %v5430_v6  ;;  %7377 = vmatpush3.msra.mxu1 %v5431_v21 }
0x2cf3   :  { %7371 = vmatprep.subr.mxu0 %v7629_v31  ;;  %7378 = vmatprep.mubr.msk.f32.mxu1 %vm7630_vm1, %v7629_v31 }
0x2cf5   :  { %7364 = vmatmul.mubr.msk.f32.vlgmr.msra.gmra.mxu0 %vm410_vm8, %v5455_v43 }
0x2cf6   :  { %7372 = vmatpush3.msra.mxu0 %v5430_v6  ;;  %7373 = vmatprep.mubr.msk.f32.mxu0 %vm7630_vm1, %v7629_v31  ;;  %vm5648_vm1 = vcmask 64512  }
0x2db1   :  { %v5609_v47 = vpop.f32.mrf.mxu1 }
0x2db2   :  { %v5615_v18 = vrot.slane %v5609_v47, 7 }
0x2db3   :  { %v7370_v62 = vpop.f32.mrf.mxu1 }
0x2db5   :  { %v5534_v16 = vpop.f32.mrf.mxu0 }
0x2db6   :  { %v5617_v0 = vsel %vm5616_vm15, %v5615_v18, %v5534_v16 }
0x2db7   :  { %v7365_v19 = vpop.f32.mrf.mxu0  ;;  %v5620_v60 = vsel %vm5619_vm0, %v5617_v0, -inf }
0x2db8   :  { %5621 = vmax.xlane.f32.xlu1 %v5620_v60 }
0x2e41   :  { %v5622_v39 = vpop.xlane.xlu1 %5621 }
0x2e42   :  { %v5624_v26 = vrot.slane %v5622_v39, 1  ;;  %v5627_v28 = vsub.f32 %v5534_v16, %v5622_v39 }
0x2e44   :  { %v5628_v57 = vsub.f32 %v5609_v47, %v5624_v26  ;;  %v5629_v63 = vmul.f32 1.442695, %v5627_v28 }
0x2e46   :  { %v5631_v2 = vmul.f32 1.442695, %v5628_v57 }
0x2e48   :  { %7550 = vpow2.f32 %v5631_v2 }
0x2e49   :  { %7552 = vpow2.f32 %v5629_v63 }
0x2e55   :  { %v7551_v31 = vpop.eup %7550 }
0x2e56   :  { %v5635_v61 = vrot.slane %v7551_v31, 7  ;;  %v7553_v59 = vpop.eup %7552 }
0x2e58   :  { %v5636_v3 = vsel %vm5616_vm15, %v5635_v61, %v7553_v59 }
0x2e59   :  { %v5638_v12 = vsel %vm5619_vm0, %v5636_v3, 0.0 }
0x2e5a   :  { %5639 = vadd.xlane.f32.xlu0 %v5638_v12 }
0x2ee3   :  { %v5640_v58 = vpop.xlane.xlu0 %5639 }
0x2ee4   :  { %7554 = vrcp.f32 %v5640_v58 }
0x2ef1   :  { %v7555_v23 = vpop.eup %7554 }
0x2ef2   :  { %v5643_v44 = vrot.slane %v7555_v23, 1  ;;  %v5646_v24 = vmul.f32 %v7555_v23, %v7553_v59 }
0x2ef4   :  { %7374 = vmatmul.mubr.msk.f32.vlgmr.msra.gmra.mxu0 %vm5648_vm1, %v5646_v24  ;;  %v5647_v54 = vmul.f32 %v7551_v31, %v5643_v44 }
0x2ef6   :  { %7379 = vmatmul.mubr.msk.f32.vlgmr.msra.gmra.mxu1 %vm5648_vm1, %v5647_v54 }
0x2fb4   :  { %v5718_v46 = vpop.f32.mrf.mxu0 }
0x2fb6   :  { %v7375_v11 = vpop.f32.mrf.mxu0  ;;  %v5791_v10 = vpop.f32.mrf.mxu1 }
0x2fb7   :  { %v5797_v22 = vrot.slane %v5791_v10, 7 }
0x2fb8   :  { %v7380_v20 = vpop.f32.mrf.mxu1 }
0x2fb9   :  { %v5798_v1 = vsel %vm5616_vm15, %v5797_v22, %v5718_v46 }
0x2fba   :  { %v5800_v5 = vsel %vm410_vm8, %v5798_v1, 0.0 }
0x2fbb   :  { %5801 = vst [vmem:[#allocation2] sm:$0x3] %v5800_v5 }
0x2fbc   :  { %7617 = shalt.err (!%p7614_p4)
}
0x2fbd   :  { %5811 = dma.vmem_to_hbm [thread:$0]  %s5809_s18, 32, %s9855_s17, [#allocation3]  }
0x2fbe   :  { %7626 = dma.done.wait [#allocation3], 32  }
0x2fbf   :  { %7627 = vsyncadd [#allocation3], 4294967264 }
0x2fc0   :  { %5815 = vsyncpa [#allocation3], 1 }

</bundles_post_ra>
